<compile_context>
chip_gen: v5e
topology: v5e:2x2
jax: 0.10.0
libtpu: 0.0.40
codegen_flags: <defaults>
</compile_context>

<pallas_src>
import functools

import jax
import jax.numpy as jnp
from jax import lax
from jax.experimental import pallas as pl
from jax.experimental.pallas import tpu as pltpu


def _multibox_kernel(xloc_ref, xconf_ref, loc_ref, label_ref, out_ref, *, k):
    xloc = xloc_ref[...]            # (Bt, A, 4) f32  predicted offsets
    xconf = xconf_ref[...]          # (Bt, A, C) f32  class logits
    loc = loc_ref[...]              # (Bt, A, 4) f32  target offsets
    label = label_ref[...][:, 0, :]  # (Bt, A)   int32 labels (lane-dense on A)

    Bt, A, C = xconf.shape
    jb = min(A, 512)                # j-chunk for the rank compare (bounds VMEM)

    pos = label > 0                              # (Bt, A)
    neg = label == 0                             # (Bt, A)
    label_c = jnp.maximum(label, 0)              # label.clamp(min=0)
    posf = pos.astype(jnp.float32)
    negf = neg.astype(jnp.float32)

    # ---- smooth-L1 localisation loss over positive anchors (sum) -----------
    diff = xloc - loc
    absd = jnp.abs(diff)
    sl1 = jnp.where(absd < 1.0, 0.5 * diff * diff, absd - 0.5)   # (Bt, A, 4)
    sl1_a = jnp.sum(sl1, axis=-1)                                # (Bt, A)
    loc_sum = jnp.sum(sl1_a * posf)                              # scalar

    # ---- per-anchor softmax cross-entropy (classes on the lane axis) -------
    x_max = jnp.max(xconf, axis=-1, keepdims=True)               # (Bt, A, 1)
    lse = jnp.log(jnp.sum(jnp.exp(xconf - x_max), axis=-1,
                          keepdims=True)) + x_max                # (Bt, A, 1)
    cls_iota = lax.broadcasted_iota(jnp.int32, (Bt, A, C), 2)
    onehot = (cls_iota == label_c[..., None]).astype(jnp.float32)
    xt = jnp.sum(xconf * onehot, axis=-1, keepdims=True)         # (Bt, A, 1)
    conf_l = (lse - xt)[..., 0]                                  # (Bt, A)

    npos_all = jnp.sum(posf)                                     # scalar

    # ---- hard negative mining (per-sample; rank depends on per-sample npos)
    # PyTorch: rank = (loss * -neg).sort(1)[1].sort(1)[1]; hard_neg = rank < npos*k
    # Stable rank: rank_i = #{j: key_j < key_i} + #{j < i: key_j == key_i}
    conf_sum = 0.0
    ii = lax.broadcasted_iota(jnp.int32, (1, A), 1)              # lane index i
    for b in range(Bt):
        key = conf_l[b:b + 1] * (-negf[b:b + 1])                 # (1, A)
        key_col = jnp.transpose(key)                             # (A, 1)
        rank = jnp.zeros((1, A), jnp.float32)
        for j0 in range(0, A, jb):
            jc = min(jb, A - j0)
            kc = key_col[j0:j0 + jc]                             # (jc, 1)
            jj = lax.broadcasted_iota(jnp.int32, (jc, 1), 0) + j0
            # fused "less OR tie-with-smaller-index" count, bool->f32 in one go
            cnt = jnp.where(
                jnp.logical_or(kc < key,
                               jnp.logical_and(kc == key, jj < ii)),
                1.0, 0.0)                                        # (jc, A)
            rank = rank + jnp.sum(cnt, axis=0, keepdims=True)    # (1, A)
        npos_b = jnp.sum(posf[b:b + 1])                          # scalar (exact int)
        hard_neg = rank < npos_b * k                             # (1, A)
        keep = jnp.logical_or(pos[b:b + 1], hard_neg).astype(jnp.float32)
        conf_sum = conf_sum + jnp.sum(conf_l[b:b + 1] * keep)

    # ---- pack the three per-step partial sums into one (8,128) tile --------
    row = lax.broadcasted_iota(jnp.int32, (8, 128), 0)
    out_ref[0] = jnp.where(row == 0, loc_sum,
                           jnp.where(row == 1, conf_sum,
                                     jnp.where(row == 2, npos_all, 0.0)))


def multibox_loss(xloc, xconf, loc, label, k=3):
    """Pallas implementation of MultiBoxLoss.forward.

    xloc:  (B, A, 4) f32   predicted box offsets
    xconf: (B, A, C) f32   class logits
    loc:   (B, A, 4) f32   target box offsets
    label: (B, A)    int32 class labels (>0 pos, ==0 neg, <0 ignored)
    returns (loc_loss / N, conf_loss / N)
    """
    B, A, _ = xloc.shape
    C = xconf.shape[-1]

    # Batch tiling: Bt samples per grid step.  Keep the grid even when
    # possible so v7x can shard steps across its two TensorCores.
    G = 2 if (B % 2 == 0 and B >= 2) else 1
    Bt = B // G

    label3 = label.reshape(B, 1, A).astype(jnp.int32)   # cheap, lane-dense on A

    kernel = functools.partial(_multibox_kernel, k=k)

    bytes_accessed = (2 * B * A * 4 + B * A * C + B * A) * 4 + G * 8 * 128 * 4
    flops = B * (3 * A * A + 8 * A * C + 12 * A)
    transcendentals = B * A * (C + 1)

    out = pl.pallas_call(
        kernel,
        out_shape=jax.ShapeDtypeStruct((G, 8, 128), jnp.float32),
        grid=(G,),
        in_specs=[
            pl.BlockSpec((Bt, A, 4), lambda g: (g, 0, 0)),   # xloc  (natural layout)
            pl.BlockSpec((Bt, A, C), lambda g: (g, 0, 0)),   # xconf (natural layout)
            pl.BlockSpec((Bt, A, 4), lambda g: (g, 0, 0)),   # loc
            pl.BlockSpec((Bt, 1, A), lambda g: (g, 0, 0)),   # label (lane-dense)
        ],
        out_specs=pl.BlockSpec((1, 8, 128), lambda g: (g, 0, 0)),  # per-step partials
        compiler_params=pltpu.CompilerParams(
            dimension_semantics=("parallel",)),
        cost_estimate=pl.CostEstimate(
            flops=flops,
            transcendentals=transcendentals,
            bytes_accessed=bytes_accessed),
    )(xloc, xconf, loc, label3)

    loc_sum = jnp.sum(out[:, 0, 0])
    conf_sum = jnp.sum(out[:, 1, 0])
    n = jnp.sum(out[:, 2, 0]) + 0.001
    return loc_sum / n, conf_sum / n


def multibox_loss_ref(xloc, xconf, loc, label, k=3):
    """Pure-JAX reference mirroring the PyTorch module."""
    pos = label > 0
    neg = label == 0
    label_c = jnp.clip(label, 0)

    diff = xloc - loc
    absd = jnp.abs(diff)
    sl1 = jnp.where(absd < 1.0, 0.5 * diff * diff, absd - 0.5)
    loc_loss = jnp.sum(sl1 * pos[..., None].astype(jnp.float32))

    x_max = jnp.max(xconf, axis=-1, keepdims=True)
    lse = jnp.log(jnp.sum(jnp.exp(xconf - x_max), axis=-1)) + x_max[..., 0]
    xt = jnp.take_along_axis(xconf, label_c[..., None], axis=-1)[..., 0]
    conf_l = lse - xt

    key = conf_l * (-neg.astype(jnp.float32))
    rank = jnp.argsort(jnp.argsort(key, axis=1), axis=1)
    hard_neg = rank < (jnp.sum(pos.astype(jnp.int32), axis=1, keepdims=True) * k)
    keep = jnp.logical_or(pos, hard_neg).astype(jnp.float32)
    conf_loss = jnp.sum(conf_l * keep)

    n = jnp.sum(pos.astype(jnp.float32)) + 0.001
    return loc_loss / n, conf_loss / n


if __name__ == "__main__":
    B, A, C = 4, 128, 8
    root = jax.random.PRNGKey(0)
    kx, kc, kl, kb = jax.random.split(root, 4)

    xloc = jax.random.normal(kx, (B, A, 4), jnp.float32)
    xconf = jax.random.normal(kc, (B, A, C), jnp.float32)
    loc = jax.random.normal(kl, (B, A, 4), jnp.float32)

    raw = jax.random.randint(kb, (B, A), 0, 20)
    # ~15% positives (classes 1..3), ~5% ignored (-1), rest background (0)
    label = jnp.where(raw >= 17, raw - 16,
                      jnp.where(raw == 0, -1, 0)).astype(jnp.int32)

    loc_l, conf_l = multibox_loss(xloc, xconf, loc, label, k=3)
    jax.block_until_ready((loc_l, conf_l))

    ref_loc, ref_conf = multibox_loss_ref(xloc, xconf, loc, label, k=3)
    jax.block_until_ready((ref_loc, ref_conf))

    ok = (jnp.allclose(loc_l, ref_loc, rtol=2e-3, atol=2e-3) and
          jnp.allclose(conf_l, ref_conf, rtol=2e-3, atol=2e-3))
    if not ok:
        raise AssertionError(
            f"mismatch: kernel=({loc_l}, {conf_l}) ref=({ref_loc}, {ref_conf})")
    print("KERNEL_OK")
</pallas_src>

<mosaic_0001>
module attributes {stable_mosaic.version = 11 : i64} {
  func.func @_multibox_kernel(%arg0: i32, %arg1: memref<2x128x4xf32, #tpu.memory_space<vmem>>, %arg2: memref<2x128x8xf32, #tpu.memory_space<vmem>>, %arg3: memref<2x128x4xf32, #tpu.memory_space<vmem>>, %arg4: memref<2x1x128xi32, #tpu.memory_space<vmem>>, %arg5: memref<1x8x128xf32, #tpu.memory_space<vmem>>) attributes {dimension_semantics = [#tpu.dimension_semantics<parallel>], iteration_bounds = array<i64: 2>, scalar_prefetch = 0 : i64, scratch_operands = 0 : i64, tpu.core_type = #tpu.core_type<tc>, window_params = [{transform_indices = @transform_0, window_bounds = array<i64: 2, 128, 4>}, {transform_indices = @transform_1, window_bounds = array<i64: 2, 128, 8>}, {transform_indices = @transform_2, window_bounds = array<i64: 2, 128, 4>}, {transform_indices = @transform_3, window_bounds = array<i64: 2, 1, 128>}, {transform_indices = @transform_4, window_bounds = array<i64: 1, 8, 128>}]} {
    %c0 = arith.constant 0 : index
    %c0_0 = arith.constant 0 : index
    %c0_1 = arith.constant 0 : index
    %0 = vector.load %arg1[%c0, %c0_0, %c0_1] : memref<2x128x4xf32, #tpu.memory_space<vmem>>, vector<2x128x4xf32>
    %c0_2 = arith.constant 0 : index
    %c0_3 = arith.constant 0 : index
    %c0_4 = arith.constant 0 : index
    %1 = vector.load %arg2[%c0_2, %c0_3, %c0_4] : memref<2x128x8xf32, #tpu.memory_space<vmem>>, vector<2x128x8xf32>
    %c0_5 = arith.constant 0 : index
    %c0_6 = arith.constant 0 : index
    %c0_7 = arith.constant 0 : index
    %2 = vector.load %arg3[%c0_5, %c0_6, %c0_7] : memref<2x128x4xf32, #tpu.memory_space<vmem>>, vector<2x128x4xf32>
    %c0_8 = arith.constant 0 : index
    %c0_9 = arith.constant 0 : index
    %c0_10 = arith.constant 0 : index
    %3 = vector.load %arg4[%c0_8, %c0_9, %c0_10] : memref<2x1x128xi32, #tpu.memory_space<vmem>>, vector<2x1x128xi32>
    %4 = vector.shape_cast %3 : vector<2x1x128xi32> to vector<2x128xi32>
    %c0_i32 = arith.constant 0 : i32
    %5 = vector.broadcast %c0_i32 : i32 to vector<2x128xi32>
    %6 = arith.cmpi sgt, %4, %5 : vector<2x128xi32>
    %c0_i32_11 = arith.constant 0 : i32
    %7 = vector.broadcast %c0_i32_11 : i32 to vector<2x128xi32>
    %8 = arith.cmpi eq, %4, %7 : vector<2x128xi32>
    %c0_i32_12 = arith.constant 0 : i32
    %9 = vector.broadcast %c0_i32_12 : i32 to vector<2x128xi32>
    %10 = arith.maxsi %4, %9 : vector<2x128xi32>
    %11 = arith.extui %6 : vector<2x128xi1> to vector<2x128xi32>
    %12 = arith.sitofp %11 : vector<2x128xi32> to vector<2x128xf32>
    %13 = arith.extui %8 : vector<2x128xi1> to vector<2x128xi32>
    %14 = arith.sitofp %13 : vector<2x128xi32> to vector<2x128xf32>
    %15 = arith.subf %0, %2 : vector<2x128x4xf32>
    %16 = math.absf %15 : vector<2x128x4xf32>
    %cst = arith.constant 1.000000e+00 : f32
    %17 = vector.broadcast %cst : f32 to vector<2x128x4xf32>
    %18 = arith.cmpf olt, %16, %17 : vector<2x128x4xf32>
    %cst_13 = arith.constant 5.000000e-01 : f32
    %19 = vector.broadcast %cst_13 : f32 to vector<2x128x4xf32>
    %20 = arith.mulf %19, %15 : vector<2x128x4xf32>
    %21 = arith.mulf %20, %15 : vector<2x128x4xf32>
    %cst_14 = arith.constant 5.000000e-01 : f32
    %22 = vector.broadcast %cst_14 : f32 to vector<2x128x4xf32>
    %23 = arith.subf %16, %22 : vector<2x128x4xf32>
    %24 = arith.select %18, %21, %23 : vector<2x128x4xi1>, vector<2x128x4xf32>
    %cst_15 = arith.constant dense<0.000000e+00> : vector<2x128xf32>
    %25 = vector.multi_reduction <add>, %24, %cst_15 [2] : vector<2x128x4xf32> to vector<2x128xf32>
    %26 = arith.mulf %25, %12 : vector<2x128xf32>
    %27 = vector.shape_cast %26 : vector<2x128xf32> to vector<1x2x128xf32>
    %cst_16 = arith.constant dense<0.000000e+00> : vector<1xf32>
    %28 = vector.multi_reduction <add>, %27, %cst_16 [1, 2] : vector<1x2x128xf32> to vector<1xf32>
    %29 = vector.shape_cast %28 : vector<1xf32> to vector<1x1x1xf32>
    %30 = vector.extract %29[0, 0, 0] : f32 from vector<1x1x1xf32>
    %cst_17 = arith.constant dense<0xFF800000> : vector<2x128xf32>
    %31 = vector.multi_reduction <maximumf>, %1, %cst_17 [2] : vector<2x128x8xf32> to vector<2x128xf32>
    %32 = vector.shape_cast %31 : vector<2x128xf32> to vector<2x128x1xf32>
    %33 = vector.broadcast %32 : vector<2x128x1xf32> to vector<2x128x8xf32>
    %34 = arith.subf %1, %33 : vector<2x128x8xf32>
    %35 = math.exp %34 : vector<2x128x8xf32>
    %cst_18 = arith.constant dense<0.000000e+00> : vector<2x128xf32>
    %36 = vector.multi_reduction <add>, %35, %cst_18 [2] : vector<2x128x8xf32> to vector<2x128xf32>
    %37 = vector.shape_cast %36 : vector<2x128xf32> to vector<2x128x1xf32>
    %38 = math.log %37 : vector<2x128x1xf32>
    %39 = arith.addf %38, %32 : vector<2x128x1xf32>
    %40 = tpu.iota {dimensions = array<i32: 2>} : vector<2x128x8xi32>
    %41 = vector.shape_cast %10 : vector<2x128xi32> to vector<2x128x1xi32>
    %42 = vector.broadcast %41 : vector<2x128x1xi32> to vector<2x128x8xi32>
    %43 = arith.cmpi eq, %40, %42 : vector<2x128x8xi32>
    %44 = arith.extui %43 : vector<2x128x8xi1> to vector<2x128x8xi32>
    %45 = arith.sitofp %44 : vector<2x128x8xi32> to vector<2x128x8xf32>
    %46 = arith.mulf %1, %45 : vector<2x128x8xf32>
    %cst_19 = arith.constant dense<0.000000e+00> : vector<2x128xf32>
    %47 = vector.multi_reduction <add>, %46, %cst_19 [2] : vector<2x128x8xf32> to vector<2x128xf32>
    %48 = vector.shape_cast %47 : vector<2x128xf32> to vector<2x128x1xf32>
    %49 = arith.subf %39, %48 : vector<2x128x1xf32>
    %50 = vector.shape_cast %49 : vector<2x128x1xf32> to vector<2x128xf32>
    %51 = vector.shape_cast %12 : vector<2x128xf32> to vector<1x2x128xf32>
    %cst_20 = arith.constant dense<0.000000e+00> : vector<1xf32>
    %52 = vector.multi_reduction <add>, %51, %cst_20 [1, 2] : vector<1x2x128xf32> to vector<1xf32>
    %53 = vector.shape_cast %52 : vector<1xf32> to vector<1x1x1xf32>
    %54 = vector.extract %53[0, 0, 0] : f32 from vector<1x1x1xf32>
    %55 = tpu.iota {dimensions = array<i32: 1>} : vector<1x128xi32>
    %56 = vector.extract_strided_slice %50 {offsets = [0, 0], sizes = [1, 128], strides = [1, 1]} : vector<2x128xf32> to vector<1x128xf32>
    %57 = vector.extract_strided_slice %14 {offsets = [0, 0], sizes = [1, 128], strides = [1, 1]} : vector<2x128xf32> to vector<1x128xf32>
    %cst_21 = arith.constant 0.000000e+00 : f32
    %58 = vector.broadcast %cst_21 : f32 to vector<1x128xf32>
    %59 = arith.subf %58, %57 : vector<1x128xf32>
    %60 = arith.mulf %56, %59 : vector<1x128xf32>
    %61 = tpu.transpose %60, [1, 0] : vector<1x128xf32> -> vector<128x1xf32>
    %cst_22 = arith.constant 0.000000e+00 : f32
    %62 = vector.broadcast %cst_22 : f32 to vector<1x128xf32>
    %63 = tpu.iota {dimensions = array<i32: 0>} : vector<128x1xi32>
    %c0_i32_23 = arith.constant 0 : i32
    %64 = vector.broadcast %c0_i32_23 : i32 to vector<128x1xi32>
    %65 = arith.addi %63, %64 : vector<128x1xi32>
    %66 = vector.broadcast %61 : vector<128x1xf32> to vector<128x128xf32>
    %67 = vector.broadcast %60 : vector<1x128xf32> to vector<128x128xf32>
    %68 = arith.cmpf olt, %66, %67 : vector<128x128xf32>
    %69 = vector.broadcast %61 : vector<128x1xf32> to vector<128x128xf32>
    %70 = vector.broadcast %60 : vector<1x128xf32> to vector<128x128xf32>
    %71 = arith.cmpf oeq, %69, %70 : vector<128x128xf32>
    %72 = vector.broadcast %65 : vector<128x1xi32> to vector<128x128xi32>
    %73 = vector.broadcast %55 : vector<1x128xi32> to vector<128x128xi32>
    %74 = arith.cmpi slt, %72, %73 : vector<128x128xi32>
    %75 = arith.andi %71, %74 : vector<128x128xi1>
    %76 = arith.ori %68, %75 : vector<128x128xi1>
    %cst_24 = arith.constant 1.000000e+00 : f32
    %cst_25 = arith.constant 0.000000e+00 : f32
    %77 = vector.broadcast %cst_24 : f32 to vector<128x128xf32>
    %78 = vector.broadcast %cst_25 : f32 to vector<128x128xf32>
    %79 = arith.select %76, %77, %78 : vector<128x128xi1>, vector<128x128xf32>
    %cst_26 = arith.constant dense<0.000000e+00> : vector<128xf32>
    %80 = vector.multi_reduction <add>, %79, %cst_26 [0] : vector<128x128xf32> to vector<128xf32>
    %81 = vector.shape_cast %80 : vector<128xf32> to vector<1x128xf32>
    %82 = arith.addf %62, %81 : vector<1x128xf32>
    %83 = vector.extract_strided_slice %12 {offsets = [0, 0], sizes = [1, 128], strides = [1, 1]} : vector<2x128xf32> to vector<1x128xf32>
    %84 = vector.shape_cast %83 : vector<1x128xf32> to vector<1x1x128xf32>
    %cst_27 = arith.constant dense<0.000000e+00> : vector<1xf32>
    %85 = vector.multi_reduction <add>, %84, %cst_27 [1, 2] : vector<1x1x128xf32> to vector<1xf32>
    %86 = vector.shape_cast %85 : vector<1xf32> to vector<1x1x1xf32>
    %87 = vector.extract %86[0, 0, 0] : f32 from vector<1x1x1xf32>
    %cst_28 = arith.constant 3.000000e+00 : f32
    %88 = arith.mulf %87, %cst_28 : f32
    %89 = vector.broadcast %88 : f32 to vector<1x128xf32>
    %90 = arith.cmpf olt, %82, %89 : vector<1x128xf32>
    %91 = vector.extract_strided_slice %6 {offsets = [0, 0], sizes = [1, 128], strides = [1, 1]} : vector<2x128xi1> to vector<1x128xi1>
    %92 = arith.ori %91, %90 : vector<1x128xi1>
    %93 = arith.extui %92 : vector<1x128xi1> to vector<1x128xi32>
    %94 = arith.sitofp %93 : vector<1x128xi32> to vector<1x128xf32>
    %95 = vector.extract_strided_slice %50 {offsets = [0, 0], sizes = [1, 128], strides = [1, 1]} : vector<2x128xf32> to vector<1x128xf32>
    %96 = arith.mulf %95, %94 : vector<1x128xf32>
    %97 = vector.shape_cast %96 : vector<1x128xf32> to vector<1x1x128xf32>
    %cst_29 = arith.constant dense<0.000000e+00> : vector<1xf32>
    %98 = vector.multi_reduction <add>, %97, %cst_29 [1, 2] : vector<1x1x128xf32> to vector<1xf32>
    %99 = vector.shape_cast %98 : vector<1xf32> to vector<1x1x1xf32>
    %100 = vector.extract %99[0, 0, 0] : f32 from vector<1x1x1xf32>
    %cst_30 = arith.constant 0.000000e+00 : f32
    %101 = arith.addf %cst_30, %100 : f32
    %102 = vector.extract_strided_slice %50 {offsets = [1, 0], sizes = [1, 128], strides = [1, 1]} : vector<2x128xf32> to vector<1x128xf32>
    %103 = vector.extract_strided_slice %14 {offsets = [1, 0], sizes = [1, 128], strides = [1, 1]} : vector<2x128xf32> to vector<1x128xf32>
    %cst_31 = arith.constant 0.000000e+00 : f32
    %104 = vector.broadcast %cst_31 : f32 to vector<1x128xf32>
    %105 = arith.subf %104, %103 : vector<1x128xf32>
    %106 = arith.mulf %102, %105 : vector<1x128xf32>
    %107 = tpu.transpose %106, [1, 0] : vector<1x128xf32> -> vector<128x1xf32>
    %cst_32 = arith.constant 0.000000e+00 : f32
    %108 = vector.broadcast %cst_32 : f32 to vector<1x128xf32>
    %109 = tpu.iota {dimensions = array<i32: 0>} : vector<128x1xi32>
    %c0_i32_33 = arith.constant 0 : i32
    %110 = vector.broadcast %c0_i32_33 : i32 to vector<128x1xi32>
    %111 = arith.addi %109, %110 : vector<128x1xi32>
    %112 = vector.broadcast %107 : vector<128x1xf32> to vector<128x128xf32>
    %113 = vector.broadcast %106 : vector<1x128xf32> to vector<128x128xf32>
    %114 = arith.cmpf olt, %112, %113 : vector<128x128xf32>
    %115 = vector.broadcast %107 : vector<128x1xf32> to vector<128x128xf32>
    %116 = vector.broadcast %106 : vector<1x128xf32> to vector<128x128xf32>
    %117 = arith.cmpf oeq, %115, %116 : vector<128x128xf32>
    %118 = vector.broadcast %111 : vector<128x1xi32> to vector<128x128xi32>
    %119 = vector.broadcast %55 : vector<1x128xi32> to vector<128x128xi32>
    %120 = arith.cmpi slt, %118, %119 : vector<128x128xi32>
    %121 = arith.andi %117, %120 : vector<128x128xi1>
    %122 = arith.ori %114, %121 : vector<128x128xi1>
    %cst_34 = arith.constant 1.000000e+00 : f32
    %cst_35 = arith.constant 0.000000e+00 : f32
    %123 = vector.broadcast %cst_34 : f32 to vector<128x128xf32>
    %124 = vector.broadcast %cst_35 : f32 to vector<128x128xf32>
    %125 = arith.select %122, %123, %124 : vector<128x128xi1>, vector<128x128xf32>
    %cst_36 = arith.constant dense<0.000000e+00> : vector<128xf32>
    %126 = vector.multi_reduction <add>, %125, %cst_36 [0] : vector<128x128xf32> to vector<128xf32>
    %127 = vector.shape_cast %126 : vector<128xf32> to vector<1x128xf32>
    %128 = arith.addf %108, %127 : vector<1x128xf32>
    %129 = vector.extract_strided_slice %12 {offsets = [1, 0], sizes = [1, 128], strides = [1, 1]} : vector<2x128xf32> to vector<1x128xf32>
    %130 = vector.shape_cast %129 : vector<1x128xf32> to vector<1x1x128xf32>
    %cst_37 = arith.constant dense<0.000000e+00> : vector<1xf32>
    %131 = vector.multi_reduction <add>, %130, %cst_37 [1, 2] : vector<1x1x128xf32> to vector<1xf32>
    %132 = vector.shape_cast %131 : vector<1xf32> to vector<1x1x1xf32>
    %133 = vector.extract %132[0, 0, 0] : f32 from vector<1x1x1xf32>
    %cst_38 = arith.constant 3.000000e+00 : f32
    %134 = arith.mulf %133, %cst_38 : f32
    %135 = vector.broadcast %134 : f32 to vector<1x128xf32>
    %136 = arith.cmpf olt, %128, %135 : vector<1x128xf32>
    %137 = vector.extract_strided_slice %6 {offsets = [1, 0], sizes = [1, 128], strides = [1, 1]} : vector<2x128xi1> to vector<1x128xi1>
    %138 = arith.ori %137, %136 : vector<1x128xi1>
    %139 = arith.extui %138 : vector<1x128xi1> to vector<1x128xi32>
    %140 = arith.sitofp %139 : vector<1x128xi32> to vector<1x128xf32>
    %141 = vector.extract_strided_slice %50 {offsets = [1, 0], sizes = [1, 128], strides = [1, 1]} : vector<2x128xf32> to vector<1x128xf32>
    %142 = arith.mulf %141, %140 : vector<1x128xf32>
    %143 = vector.shape_cast %142 : vector<1x128xf32> to vector<1x1x128xf32>
    %cst_39 = arith.constant dense<0.000000e+00> : vector<1xf32>
    %144 = vector.multi_reduction <add>, %143, %cst_39 [1, 2] : vector<1x1x128xf32> to vector<1xf32>
    %145 = vector.shape_cast %144 : vector<1xf32> to vector<1x1x1xf32>
    %146 = vector.extract %145[0, 0, 0] : f32 from vector<1x1x1xf32>
    %147 = arith.addf %101, %146 : f32
    %148 = tpu.iota {dimensions = array<i32: 0>} : vector<8x128xi32>
    %c0_i32_40 = arith.constant 0 : i32
    %149 = vector.broadcast %c0_i32_40 : i32 to vector<8x128xi32>
    %150 = arith.cmpi eq, %148, %149 : vector<8x128xi32>
    %c1_i32 = arith.constant 1 : i32
    %151 = vector.broadcast %c1_i32 : i32 to vector<8x128xi32>
    %152 = arith.cmpi eq, %148, %151 : vector<8x128xi32>
    %c2_i32 = arith.constant 2 : i32
    %153 = vector.broadcast %c2_i32 : i32 to vector<8x128xi32>
    %154 = arith.cmpi eq, %148, %153 : vector<8x128xi32>
    %cst_41 = arith.constant 0.000000e+00 : f32
    %155 = vector.broadcast %54 : f32 to vector<8x128xf32>
    %156 = vector.broadcast %cst_41 : f32 to vector<8x128xf32>
    %157 = arith.select %154, %155, %156 : vector<8x128xi1>, vector<8x128xf32>
    %158 = vector.broadcast %147 : f32 to vector<8x128xf32>
    %159 = arith.select %152, %158, %157 : vector<8x128xi1>, vector<8x128xf32>
    %160 = vector.broadcast %30 : f32 to vector<8x128xf32>
    %161 = arith.select %150, %160, %159 : vector<8x128xi1>, vector<8x128xf32>
    %c0_42 = arith.constant 0 : index
    %c0_43 = arith.constant 0 : index
    %c0_44 = arith.constant 0 : index
    %162 = vector.load %arg5[%c0_42, %c0_43, %c0_44] : memref<1x8x128xf32, #tpu.memory_space<vmem>>, vector<1x8x128xf32>
    %163 = vector.shape_cast %162 : vector<1x8x128xf32> to vector<8x128xf32>
    %164 = vector.shape_cast %161 : vector<8x128xf32> to vector<1x8x128xf32>
    tpu.vector_store %arg5[%c0_42, %c0_43, %c0_44], %164 {strides = array<i32>} : memref<1x8x128xf32, #tpu.memory_space<vmem>>, vector<1x8x128xf32>,
    return
  }
  func.func @transform_0(%arg0: i32) -> (i32, i32, i32) {
    %c0_i32 = arith.constant 0 : i32
    %c0_i32_0 = arith.constant 0 : i32
    %c0_i32_1 = arith.constant 0 : i32
    return %arg0, %c0_i32, %c0_i32_0 : i32, i32, i32
  }
  func.func @transform_1(%arg0: i32) -> (i32, i32, i32) {
    %c0_i32 = arith.constant 0 : i32
    %c0_i32_0 = arith.constant 0 : i32
    %c0_i32_1 = arith.constant 0 : i32
    return %arg0, %c0_i32, %c0_i32_0 : i32, i32, i32
  }
  func.func @transform_2(%arg0: i32) -> (i32, i32, i32) {
    %c0_i32 = arith.constant 0 : i32
    %c0_i32_0 = arith.constant 0 : i32
    %c0_i32_1 = arith.constant 0 : i32
    return %arg0, %c0_i32, %c0_i32_0 : i32, i32, i32
  }
  func.func @transform_3(%arg0: i32) -> (i32, i32, i32) {
    %c0_i32 = arith.constant 0 : i32
    %c0_i32_0 = arith.constant 0 : i32
    %c0_i32_1 = arith.constant 0 : i32
    return %arg0, %c0_i32, %c0_i32_0 : i32, i32, i32
  }
  func.func @transform_4(%arg0: i32) -> (i32, i32, i32) {
    %c0_i32 = arith.constant 0 : i32
    %c0_i32_0 = arith.constant 0 : i32
    %c0_i32_1 = arith.constant 0 : i32
    return %arg0, %c0_i32, %c0_i32_0 : i32, i32, i32
  }
}

</mosaic_0001>

<bundles_post_ra>
// kernel: tpu_custom_call.1
= control target key start
LH: loop header
LB: loop body
LE: loop exit
PB: predicated region body
PF: predicated region fallthrough
CT: control target
= control target key end

     0   :  { %9 = vsyncpa [#allocation3], 0  ;;  %s6445_s0 = inlined_call_operand.vmem [shape: f32[4,128,4], index: 0, kind: input, shape index: {}]   ;;  %s6446_s1 = inlined_call_operand.vmem [shape: f32[4,128,8], index: 1, kind: input, shape index: {}]   ;;  %s6447_s2 = inlined_call_operand.vmem [shape: f32[4,128,4], index: 2, kind: input, shape index: {}]   ;;  %s6448_s3 = inlined_call_operand.vmem [shape: s32[4,1,128], index: 3, kind: input, shape index: {}]   ;;  %s6449_s4 = inlined_call_operand.hbm [shape: f32[2,8,128], index: 4, kind: output, shape index: {}]  }
   0x1   :  { %11 = vsyncpa [#allocation3 + $0x1], 0  ;;  %s4203_s15 = smov 0   ;;  %s4205_s16 = smov 0  }
   0x2   :  { %s4207_s17 = smov 0   ;;  %s4209_s18 = smov 0  }
   0x3 LB: > { %s4224_s19 = sadd.s32 4294967295, %s4174_s18   ;;  %s3611_s20 = sadd.s32 4294967294, %s4174_s18   ;;  %s4174_s18 = sphi %s4209_s18, %s6887_s18   ;;  %s4170_s17 = sphi %s4207_s17, %s6886_s17   ;;  %s4166_s16 = sphi %s4205_s16, %s6885_s16   ;;  %s4162_s15 = sphi %s4203_s15, %s6884_s15  }
   0x4   : > { %s4228_s21 = sadd.s32 1, %s4174_s18   ;;  %s128_s22 = sadd.s32 1, %s4170_s17 }
   0x5   : > { %s125_s23 = ssub.s32 %s4174_s18, %s4228_s21  ;;  %p138_p0 = scmp.ne.s32.totalorder %s4170_s17, %s4166_s16 }
   0x6   : > { %p126_p1 = scmp.eq.s32.totalorder %s125_s23, 0  ;;  %p139_p2 = scmp.eq.s32.totalorder %s4224_s19, 1 }
   0x7   : > { %p144_p3 = scmp.ne.s32.totalorder %s4166_s16, %s4162_s15  ;;  %p145_p4 = scmp.eq.s32.totalorder %s3611_s20, 1 }
   0x8   : > { %s4239_s24 = scalar_select %p126_p1, %s4170_s17, %s128_s22  }
   0x9   : > { %p4241_p5 = por %p139_p2, %p138_p0  ;;  %p4245_p6 = por %p145_p4, %p144_p3 }
   0xa   : > { %p3614_p7 = scmp.ge.s32.totalorder %s4174_s18, 1  ;;  %p201_p8 = scmp.lt.s32.totalorder %s4174_s18, 3 }
   0xc   : > { %p202_p9 = pnand %p3614_p7, %p201_p8 }
   0xe   : > { %205 = sbr.rel (%p202_p9) target bundleno = 3543 (0xdd7), region = 36 }
  0x13   : > { %s3616_s27 = sshll.u32 %s4224_s19, 1  ;;  %vm608_vm0 = vcmask 31744   ;;  %s3697_s7 = sshll.u32 %s4224_s19, 3 }
  0x14   : > { %p245_p10 = scmp.lt.s32.totalorder %s3616_s27, 3  ;;  %s3514_s10 = scalar_lea.hbm %s6449_s4, %s3697_s7 }
  0x16   : > { %s6889_s27 = smov (!%p245_p10, %s3616_s27), 3 }
  0x17   : > { %s4255_s28 = sshll.u32 %s6889_s27, 7  ;;  %s4545_s11 = scalar_lea.vmem %s6448_s3, %s6889_s27 }
  0x18   : > { %s4261_s5 = scalar_lea.vmem %s6445_s0, %s4255_s28  ;;  %s4267_s8 = scalar_lea.vmem %s6447_s2, %s4255_s28 }
  0x19   : > { %v274_v0 = vld [vmem:[%s4261_s5 + $0x20] sm:$0xff]  ;;  %v272_v2 = vld [vmem:[%s4261_s5 + $0x10] sm:$0xff]  ;;  %v275_v9 = vld [vmem:[%s4261_s5 + $0x28] sm:$0xff]  ;;  %s4815_s14 = scalar_lea.vmem %s6446_s1, %s4255_s28 }
  0x1a   : > { %v338_v1 = vld [vmem:[%s4267_s8 + $0x20] sm:$0xff]  ;;  %v336_v4 = vld [vmem:[%s4267_s8 + $0x10] sm:$0xff]  ;;  %v339_v10 = vld [vmem:[%s4267_s8 + $0x28] sm:$0xff] }
  0x1b   : > { %v388_v3 = vsub.f32 %v274_v0, %v338_v1  ;;  %v270_v5 = vld [vmem:[%s4261_s5] sm:$0xff]  ;;  %v386_v7 = vsub.f32 %v272_v2, %v336_v4  ;;  %v389_v13 = vsub.f32 %v275_v9, %v339_v10  ;;  %v273_v22 = vld [vmem:[%s4261_s5 + $0x18] sm:$0xff]  ;;  %v271_v28 = vld [vmem:[%s4261_s5 + $0x8] sm:$0xff] }
  0x1c   : > { %v334_v6 = vld [vmem:[%s4267_s8] sm:$0xff]  ;;  %v337_v23 = vld [vmem:[%s4267_s8 + $0x18] sm:$0xff]  ;;  %v335_v29 = vld [vmem:[%s4267_s8 + $0x8] sm:$0xff] }
  0x1d   : > { %v384_v8 = vsub.f32 %v270_v5, %v334_v6  ;;  %v420_v11 = vand.u32 2147483647, %v388_v3  ;;  %v484_v12 = vmul.f32 0.5, %v388_v3  ;;  %v418_v14 = vand.u32 2147483647, %v386_v7  ;;  %v278_v30 = vld [vmem:[%s4261_s5 + $0x40] sm:$0xff] }
  0x1e   : > { %v482_v15 = vmul.f32 0.5, %v386_v7  ;;  %v421_v21 = vand.u32 2147483647, %v389_v13  ;;  %v342_v35 = vld [vmem:[%s4267_s8 + $0x40] sm:$0xff]  ;;  %v277_v36 = vld [vmem:[%s4261_s5 + $0x38] sm:$0xff]  ;;  %v485_v40 = vmul.f32 0.5, %v389_v13  ;;  %v387_v44 = vsub.f32 %v273_v22, %v337_v23 }
  0x1f   : > { %v416_v16 = vand.u32 2147483647, %v384_v8  ;;  %v480_v17 = vmul.f32 0.5, %v384_v8  ;;  %vm4277_vm1 = vcmp.lt.f32.partialorder %v420_v11, 1.0  ;;  %v516_v19 = vmul.f32 %v484_v12, %v388_v3  ;;  %v341_v37 = vld [vmem:[%s4267_s8 + $0x38] sm:$0xff]  ;;  %v276_v62 = vld [vmem:[%s4261_s5 + $0x30] sm:$0xff] }
  0x20   : > { %v3634_v20 = vadd.f32 -0.5, %v420_v11  ;;  %vm4283_vm2 = vcmp.lt.f32.partialorder %v418_v14, 1.0  ;;  %v514_v25 = vmul.f32 %v482_v15, %v386_v7  ;;  %v3632_v26 = vadd.f32 -0.5, %v418_v14  ;;  %v340_v63 = vld [vmem:[%s4267_s8 + $0x30] sm:$0xff]  ;;  %v281_v4 = vld [vmem:[%s4261_s5 + $0x58] sm:$0xff]  ;;  %v279_v12 = vld [vmem:[%s4261_s5 + $0x48] sm:$0xff] }
  0x21   : > { %vm4287_vm3 = vcmp.lt.f32.partialorder %v416_v16, 1.0  ;;  %v512_v32 = vmul.f32 %v480_v17, %v384_v8  ;;  %v3630_v33 = vadd.f32 -0.5, %v416_v16  ;;  %vm4296_vm4 = vcmp.lt.f32.partialorder %v421_v21, 1.0  ;;  %v345_v5 = vld [vmem:[%s4267_s8 + $0x58] sm:$0xff]  ;;  %v280_v6 = vld [vmem:[%s4261_s5 + $0x50] sm:$0xff] }
  0x22   : > { %v580_v31 = vsel %vm4277_vm1, %v516_v19, %v3634_v20  ;;  %v578_v39 = vsel %vm4283_vm2, %v514_v25, %v3632_v26  ;;  %v3635_v41 = vadd.f32 -0.5, %v421_v21  ;;  %v385_v45 = vsub.f32 %v271_v28, %v335_v29  ;;  %v344_v11 = vld [vmem:[%s4267_s8 + $0x50] sm:$0xff] }
  0x23   : > { %v621_v38 = vsel %vm608_vm0, %v580_v31, 0.0  ;;  %v615_v42 = vsel %vm608_vm0, %v578_v39, 0.0  ;;  %v576_v43 = vsel %vm4287_vm3, %v512_v32, %v3630_v33  ;;  %v517_v47 = vmul.f32 %v485_v40, %v389_v13  ;;  %v343_v13 = vld [vmem:[%s4267_s8 + $0x48] sm:$0xff]  ;;  %v348_v39 = vld [vmem:[%s4267_s8 + $0x70] sm:$0xff] }
  0x24   : > { %622 = vadd.xlane.f32.xlu2 %v621_v38  ;;  %616 = vadd.xlane.f32.xlu1 %v615_v42  ;;  %v609_v46 = vsel %vm608_vm0, %v576_v43, 0.0  ;;  %v392_v48 = vsub.f32 %v278_v30, %v342_v35  ;;  %v391_v49 = vsub.f32 %v277_v36, %v341_v37  ;;  %v419_v50 = vand.u32 2147483647, %v387_v44  ;;  %v284_v38 = vld [vmem:[%s4261_s5 + $0x70] sm:$0xff] }
  0x25   : > { %610 = vadd.xlane.f32.xlu0 %v609_v46  ;;  %v483_v51 = vmul.f32 0.5, %v387_v44  ;;  %v417_v52 = vand.u32 2147483647, %v385_v45  ;;  %v481_v53 = vmul.f32 0.5, %v385_v45  ;;  %v581_v54 = vsel %vm4296_vm4, %v517_v47, %v3635_v41  ;;  %v282_v46 = vld [vmem:[%s4261_s5 + $0x60] sm:$0xff] }
  0x26   : > { %v424_v55 = vand.u32 2147483647, %v392_v48  ;;  %v488_v56 = vmul.f32 0.5, %v392_v48  ;;  %v423_v57 = vand.u32 2147483647, %v391_v49  ;;  %v624_v58 = vsel %vm608_vm0, %v581_v54, 0.0 }
  0x27   : > { %vm4313_vm5 = vcmp.lt.f32.partialorder %v419_v50, 1.0  ;;  %v515_v60 = vmul.f32 %v483_v51, %v387_v44  ;;  %v3633_v61 = vadd.f32 -0.5, %v419_v50  ;;  %vm4319_vm6 = vcmp.lt.f32.partialorder %v417_v52, 1.0  ;;  %v283_v44 = vld [vmem:[%s4261_s5 + $0x68] sm:$0xff]  ;;  %v346_v51 = vld [vmem:[%s4267_s8 + $0x60] sm:$0xff] }
  0x28   : > { %v513_v1 = vmul.f32 %v481_v53, %v385_v45  ;;  %v3631_v2 = vadd.f32 -0.5, %v417_v52  ;;  %vm4323_vm7 = vcmp.lt.f32.partialorder %v424_v55, 1.0  ;;  %v520_v8 = vmul.f32 %v488_v56, %v392_v48  ;;  %v347_v45 = vld [vmem:[%s4267_s8 + $0x68] sm:$0xff] }
  0x29   : > { %v579_v7 = vsel %vm4313_vm5, %v515_v60, %v3633_v61  ;;  %v3638_v9 = vadd.f32 -0.5, %v424_v55  ;;  %vm4332_vm8 = vcmp.lt.f32.partialorder %v423_v57, 1.0  ;;  %v487_v16 = vmul.f32 0.5, %v391_v49  ;;  %v287_v52 = vld [vmem:[%s4261_s5 + $0x88] sm:$0xff] }
  0x2a   : > { %v618_v14 = vsel %vm608_vm0, %v579_v7, 0.0  ;;  %v577_v15 = vsel %vm4319_vm6, %v513_v1, %v3631_v2  ;;  %v3637_v17 = vadd.f32 -0.5, %v423_v57  ;;  %v390_v20 = vsub.f32 %v276_v62, %v340_v63  ;;  %v351_v53 = vld [vmem:[%s4267_s8 + $0x88] sm:$0xff] }
  0x2b   : > { %v612_v18 = vsel %vm608_vm0, %v577_v15, 0.0  ;;  %v584_v19 = vsel %vm4323_vm7, %v520_v8, %v3638_v9  ;;  %v395_v21 = vsub.f32 %v281_v4, %v345_v5  ;;  %v519_v23 = vmul.f32 %v487_v16, %v391_v49  ;;  %v350_v15 = vld [vmem:[%s4267_s8 + $0x80] sm:$0xff] }
  0x2c   : > { %625 = vadd.xlane.f32.xlu2 %v624_v58  ;;  %619 = vadd.xlane.f32.xlu1 %v618_v14  ;;  %v633_v22 = vsel %vm608_vm0, %v584_v19, 0.0  ;;  %v394_v24 = vsub.f32 %v280_v6, %v344_v11  ;;  %v393_v25 = vsub.f32 %v279_v12, %v343_v13  ;;  %v422_v26 = vand.u32 2147483647, %v390_v20  ;;  %v286_v14 = vld [vmem:[%s4261_s5 + $0x80] sm:$0xff] }
  0x2d   : > { %613 = vadd.xlane.f32.xlu0 %v612_v18  ;;  %v486_v27 = vmul.f32 0.5, %v390_v20  ;;  %v427_v28 = vand.u32 2147483647, %v395_v21  ;;  %v491_v29 = vmul.f32 0.5, %v395_v21  ;;  %v583_v30 = vsel %vm4332_vm8, %v519_v23, %v3637_v17 }
  0x2e   : > { %v426_v31 = vand.u32 2147483647, %v394_v24  ;;  %v490_v32 = vmul.f32 0.5, %v394_v24  ;;  %v425_v33 = vand.u32 2147483647, %v393_v25  ;;  %v630_v34 = vsel %vm608_vm0, %v583_v30, 0.0 }
  0x2f   : > { %vm4349_vm9 = vcmp.lt.f32.partialorder %v422_v26, 1.0  ;;  %v518_v36 = vmul.f32 %v486_v27, %v390_v20  ;;  %v3636_v37 = vadd.f32 -0.5, %v422_v26  ;;  %vm4355_vm10 = vcmp.lt.f32.partialorder %v427_v28, 1.0  ;;  %v285_v20 = vld [vmem:[%s4261_s5 + $0x78] sm:$0xff]  ;;  %v354_v27 = vld [vmem:[%s4267_s8 + $0xa0] sm:$0xff] }
  0x30   : > { %v523_v41 = vmul.f32 %v491_v29, %v395_v21  ;;  %v3641_v42 = vadd.f32 -0.5, %v427_v28  ;;  %vm4359_vm11 = vcmp.lt.f32.partialorder %v426_v31, 1.0  ;;  %v522_v48 = vmul.f32 %v490_v32, %v394_v24  ;;  %v349_v21 = vld [vmem:[%s4267_s8 + $0x78] sm:$0xff] }
  0x31   : > { %v582_v47 = vsel %vm4349_vm9, %v518_v36, %v3636_v37  ;;  %v3640_v49 = vadd.f32 -0.5, %v426_v31  ;;  %vm4368_vm12 = vcmp.lt.f32.partialorder %v425_v33, 1.0  ;;  %v489_v56 = vmul.f32 0.5, %v393_v25  ;;  %v289_v28 = vld [vmem:[%s4261_s5 + $0x98] sm:$0xff] }
  0x32   : > { %v627_v54 = vsel %vm608_vm0, %v582_v47, 0.0  ;;  %v587_v55 = vsel %vm4355_vm10, %v523_v41, %v3641_v42  ;;  %v3639_v57 = vadd.f32 -0.5, %v425_v33  ;;  %v398_v60 = vsub.f32 %v284_v38, %v348_v39  ;;  %v353_v29 = vld [vmem:[%s4267_s8 + $0x98] sm:$0xff] }
  0x33   : > { %v642_v58 = vsel %vm608_vm0, %v587_v55, 0.0  ;;  %v586_v59 = vsel %vm4359_vm11, %v522_v48, %v3640_v49  ;;  %v397_v61 = vsub.f32 %v283_v44, %v347_v45  ;;  %v521_v63 = vmul.f32 %v489_v56, %v393_v25  ;;  %v352_v55 = vld [vmem:[%s4267_s8 + $0x90] sm:$0xff] }
  0x34   : > { %634 = vadd.xlane.f32.xlu2 %v633_v22  ;;  %631 = vadd.xlane.f32.xlu1 %v630_v34  ;;  %v639_v62 = vsel %vm608_vm0, %v586_v59, 0.0  ;;  %v396_v0 = vsub.f32 %v282_v46, %v346_v51  ;;  %v401_v1 = vsub.f32 %v287_v52, %v351_v53  ;;  %v430_v2 = vand.u32 2147483647, %v398_v60  ;;  %v290_v22 = vld [vmem:[%s4261_s5 + $0xa0] sm:$0xff] }
  0x35   : > { %628 = vadd.xlane.f32.xlu0 %v627_v54  ;;  %v494_v3 = vmul.f32 0.5, %v398_v60  ;;  %v429_v4 = vand.u32 2147483647, %v397_v61  ;;  %v493_v5 = vmul.f32 0.5, %v397_v61  ;;  %v585_v6 = vsel %vm4368_vm12, %v521_v63, %v3639_v57  ;;  %v288_v54 = vld [vmem:[%s4261_s5 + $0x90] sm:$0xff] }
  0x36   : > { %v428_v7 = vand.u32 2147483647, %v396_v0  ;;  %v492_v8 = vmul.f32 0.5, %v396_v0  ;;  %v433_v9 = vand.u32 2147483647, %v401_v1  ;;  %v636_v10 = vsel %vm608_vm0, %v585_v6, 0.0 }
  0x37   : > { %vm4385_vm13 = vcmp.lt.f32.partialorder %v430_v2, 1.0  ;;  %v526_v12 = vmul.f32 %v494_v3, %v398_v60  ;;  %v3644_v13 = vadd.f32 -0.5, %v430_v2  ;;  %vm4391_vm14 = vcmp.lt.f32.partialorder %v429_v4, 1.0  ;;  %v293_v60 = vld [vmem:[%s4261_s5 + $0xb8] sm:$0xff]  ;;  %v356_v3 = vld [vmem:[%s4267_s8 + $0xb0] sm:$0xff] }
  0x38   : > { %v525_v17 = vmul.f32 %v493_v5, %v397_v61  ;;  %v3643_v18 = vadd.f32 -0.5, %v429_v4  ;;  %vm4395_vm15 = vcmp.lt.f32.partialorder %v428_v7, 1.0  ;;  %v524_v24 = vmul.f32 %v492_v8, %v396_v0  ;;  %v357_v61 = vld [vmem:[%s4267_s8 + $0xb8] sm:$0xff]  ;;  %v291_v4 = vld [vmem:[%s4261_s5 + $0xa8] sm:$0xff] }
  0x39   : > { %v590_v23 = vsel %vm4385_vm13, %v526_v12, %v3644_v13  ;;  %v3642_v25 = vadd.f32 -0.5, %v428_v7  ;;  %vm4404_vm1 = vcmp.lt.f32.partialorder %v433_v9, 1.0  ;;  %v497_v32 = vmul.f32 0.5, %v401_v1  ;;  %v355_v5 = vld [vmem:[%s4267_s8 + $0xa8] sm:$0xff] }
  0x3a   : > { %v651_v30 = vsel %vm608_vm0, %v590_v23, 0.0  ;;  %v589_v31 = vsel %vm4391_vm14, %v525_v17, %v3643_v18  ;;  %v3647_v33 = vadd.f32 -0.5, %v433_v9  ;;  %v400_v36 = vsub.f32 %v286_v14, %v350_v15 }
  0x3b   : > { %v648_v34 = vsel %vm608_vm0, %v589_v31, 0.0  ;;  %v588_v35 = vsel %vm4395_vm15, %v524_v24, %v3642_v25  ;;  %v399_v37 = vsub.f32 %v285_v20, %v349_v21  ;;  %v529_v39 = vmul.f32 %v497_v32, %v401_v1  ;;  %v360_v31 = vld [vmem:[%s4267_s8 + $0xd0] sm:$0xff] }
  0x3c   : > { %643 = vadd.xlane.f32.xlu2 %v642_v58  ;;  %640 = vadd.xlane.f32.xlu1 %v639_v62  ;;  %v645_v38 = vsel %vm608_vm0, %v588_v35, 0.0  ;;  %v404_v40 = vsub.f32 %v290_v22, %v354_v27  ;;  %v403_v41 = vsub.f32 %v289_v28, %v353_v29  ;;  %v432_v42 = vand.u32 2147483647, %v400_v36  ;;  %v292_v62 = vld [vmem:[%s4261_s5 + $0xb0] sm:$0xff] }
  0x3d   : > { %637 = vadd.xlane.f32.xlu0 %v636_v10  ;;  %v496_v43 = vmul.f32 0.5, %v400_v36  ;;  %v431_v44 = vand.u32 2147483647, %v399_v37  ;;  %v495_v45 = vmul.f32 0.5, %v399_v37  ;;  %v593_v46 = vsel %vm4404_vm1, %v529_v39, %v3647_v33 }
  0x3e   : > { %v436_v47 = vand.u32 2147483647, %v404_v40  ;;  %v500_v48 = vmul.f32 0.5, %v404_v40  ;;  %v435_v49 = vand.u32 2147483647, %v403_v41  ;;  %v4421_v50 = vsel %vm608_vm0, %v593_v46, 0.0 }
  0x3f   : > { %vm4423_vm2 = vcmp.lt.f32.partialorder %v432_v42, 1.0  ;;  %v528_v52 = vmul.f32 %v496_v43, %v400_v36  ;;  %v3646_v53 = vadd.f32 -0.5, %v432_v42  ;;  %vm4429_vm3 = vcmp.lt.f32.partialorder %v431_v44, 1.0  ;;  %v295_v36 = vld [vmem:[%s4261_s5 + $0xc8] sm:$0xff]  ;;  %v358_v43 = vld [vmem:[%s4267_s8 + $0xc0] sm:$0xff] }
  0x40   : > { %v527_v57 = vmul.f32 %v495_v45, %v399_v37  ;;  %v3645_v58 = vadd.f32 -0.5, %v431_v44  ;;  %vm4433_vm4 = vcmp.lt.f32.partialorder %v436_v47, 1.0  ;;  %v532_v0 = vmul.f32 %v500_v48, %v404_v40  ;;  %v359_v37 = vld [vmem:[%s4267_s8 + $0xc8] sm:$0xff] }
  0x41   : > { %v592_v63 = vsel %vm4423_vm2, %v528_v52, %v3646_v53  ;;  %v3650_v1 = vadd.f32 -0.5, %v436_v47  ;;  %vm4442_vm5 = vcmp.lt.f32.partialorder %v435_v49, 1.0  ;;  %v499_v8 = vmul.f32 0.5, %v403_v41  ;;  %v299_v44 = vld [vmem:[%s4261_s5 + $0xe8] sm:$0xff] }
  0x42   : > { %v657_v6 = vsel %vm608_vm0, %v592_v63, 0.0  ;;  %v591_v7 = vsel %vm4429_vm3, %v527_v57, %v3645_v58  ;;  %v3649_v9 = vadd.f32 -0.5, %v435_v49  ;;  %v402_v12 = vsub.f32 %v288_v54, %v352_v55  ;;  %v363_v45 = vld [vmem:[%s4267_s8 + $0xe8] sm:$0xff] }
  0x43   : > { %v654_v10 = vsel %vm608_vm0, %v591_v7, 0.0  ;;  %v596_v11 = vsel %vm4433_vm4, %v532_v0, %v3650_v1  ;;  %v407_v13 = vsub.f32 %v293_v60, %v357_v61  ;;  %v531_v15 = vmul.f32 %v499_v8, %v403_v41  ;;  %v362_v7 = vld [vmem:[%s4267_s8 + $0xe0] sm:$0xff] }
  0x44   : > { %652 = vadd.xlane.f32.xlu2 %v651_v30  ;;  %649 = vadd.xlane.f32.xlu1 %v648_v34  ;;  %v4456_v14 = vsel %vm608_vm0, %v596_v11, 0.0  ;;  %v406_v16 = vsub.f32 %v292_v62, %v356_v3  ;;  %v405_v17 = vsub.f32 %v291_v4, %v355_v5  ;;  %v434_v18 = vand.u32 2147483647, %v402_v12  ;;  %v296_v30 = vld [vmem:[%s4261_s5 + $0xd0] sm:$0xff] }
  0x45   : > { %646 = vadd.xlane.f32.xlu0 %v645_v38  ;;  %v498_v19 = vmul.f32 0.5, %v402_v12  ;;  %v439_v20 = vand.u32 2147483647, %v407_v13  ;;  %v503_v21 = vmul.f32 0.5, %v407_v13  ;;  %v595_v22 = vsel %vm4442_vm5, %v531_v15, %v3649_v9  ;;  %v294_v38 = vld [vmem:[%s4261_s5 + $0xc0] sm:$0xff]  ;;  %v301_v15 = vld [vmem:[%s4261_s5 + $0xf8] sm:$0xff] }
  0x46   : > { %v438_v23 = vand.u32 2147483647, %v406_v16  ;;  %v502_v24 = vmul.f32 0.5, %v406_v16  ;;  %v437_v25 = vand.u32 2147483647, %v405_v17  ;;  %v4461_v26 = vsel %vm608_vm0, %v595_v22, 0.0 }
  0x47   : > { %vm4463_vm6 = vcmp.lt.f32.partialorder %v434_v18, 1.0  ;;  %v530_v28 = vmul.f32 %v498_v19, %v402_v12  ;;  %v3648_v29 = vadd.f32 -0.5, %v434_v18  ;;  %vm4469_vm7 = vcmp.lt.f32.partialorder %v439_v20, 1.0  ;;  %v297_v12 = vld [vmem:[%s4261_s5 + $0xd8] sm:$0xff]  ;;  %v364_v22 = vld [vmem:[%s4267_s8 + $0xf0] sm:$0xff] }
  0x48   : > { %v535_v33 = vmul.f32 %v503_v21, %v407_v13  ;;  %v3653_v34 = vadd.f32 -0.5, %v439_v20  ;;  %vm4473_vm8 = vcmp.lt.f32.partialorder %v438_v23, 1.0  ;;  %v534_v40 = vmul.f32 %v502_v24, %v406_v16  ;;  %v361_v13 = vld [vmem:[%s4267_s8 + $0xd8] sm:$0xff]  ;;  %v300_v21 = vld [vmem:[%s4261_s5 + $0xf0] sm:$0xff] }
  0x49   : > { %v594_v39 = vsel %vm4463_vm6, %v530_v28, %v3648_v29  ;;  %v3652_v41 = vadd.f32 -0.5, %v438_v23  ;;  %vm4482_vm9 = vcmp.lt.f32.partialorder %v437_v25, 1.0  ;;  %v501_v48 = vmul.f32 0.5, %v405_v17  ;;  %v365_v20 = vld [vmem:[%s4267_s8 + $0xf8] sm:$0xff] }
  0x4a   : > { %v663_v46 = vsel %vm608_vm0, %v594_v39, 0.0  ;;  %v599_v47 = vsel %vm4469_vm7, %v535_v33, %v3653_v34  ;;  %v3651_v49 = vadd.f32 -0.5, %v437_v25  ;;  %v410_v53 = vsub.f32 %v296_v30, %v360_v31 }
  0x4b   : > { %v4494_v51 = vsel %vm608_vm0, %v599_v47, 0.0  ;;  %v598_v52 = vsel %vm4473_vm8, %v534_v40, %v3652_v41  ;;  %v409_v54 = vsub.f32 %v295_v36, %v359_v37  ;;  %v533_v56 = vmul.f32 %v501_v48, %v405_v17 }
  0x4c   : > { %661 = vadd.xlane.f32.xlu2 %v4421_v50  ;;  %658 = vadd.xlane.f32.xlu1 %v657_v6  ;;  %v4499_v55 = vsel %vm608_vm0, %v598_v52, 0.0  ;;  %v408_v57 = vsub.f32 %v294_v38, %v358_v43  ;;  %v413_v58 = vsub.f32 %v299_v44, %v363_v45  ;;  %v442_v59 = vand.u32 2147483647, %v410_v53  ;;  %v298_v6 = vld [vmem:[%s4261_s5 + $0xe0] sm:$0xff]  ;;  %s241_s5 = sand.u32 1, %s4166_s16  }
  0x4d   : > { %655 = vadd.xlane.f32.xlu0 %v654_v10  ;;  %v506_v50 = vmul.f32 0.5, %v410_v53  ;;  %v441_v60 = vand.u32 2147483647, %v409_v54  ;;  %v505_v61 = vmul.f32 0.5, %v409_v54  ;;  %v597_v62 = vsel %vm4482_vm9, %v533_v56, %v3651_v49  ;;  %v4559_v49 = vld [vmem:[%s4545_s11] sm:$0x1] }
  0x4e   : > { %v440_v63 = vand.u32 2147483647, %v408_v57  ;;  %v504_v0 = vmul.f32 0.5, %v408_v57  ;;  %v445_v1 = vand.u32 2147483647, %v413_v58  ;;  %v4504_v2 = vsel %vm608_vm0, %v597_v62, 0.0 }
  0x4f   : > { %vm4506_vm10 = vcmp.lt.f32.partialorder %v442_v59, 1.0  ;;  %v538_v4 = vmul.f32 %v506_v50, %v410_v53  ;;  %v3656_v5 = vadd.f32 -0.5, %v442_v59  ;;  %vm4512_vm11 = vcmp.lt.f32.partialorder %v441_v60, 1.0  ;;  %6621 = vst [vmem:[#allocation5_spill] sm:$0xff] %v4559_v49  ;;  %s3615_s6 = sshll.u32 %s241_s5, 3  ;;  %s3504_s19 = scalar_lea.sflag [#allocation3], %s241_s5 }
  0x50   : > { %v537_v9 = vmul.f32 %v505_v61, %v409_v54  ;;  %v3655_v10 = vadd.f32 -0.5, %v441_v60  ;;  %vm4516_vm12 = vcmp.lt.f32.partialorder %v440_v63, 1.0  ;;  %v536_v17 = vmul.f32 %v504_v0, %v408_v57  ;;  %v4566_v57 = vld [vmem:[%s4545_s11 + $0x1] sm:$0x1]  ;;  %s243_s12 = scalar_lea.vmem [#allocation2], %s3615_s6 }
  0x51   : > { %v602_v16 = vsel %vm4506_vm10, %v538_v4, %v3656_v5  ;;  %v3654_v18 = vadd.f32 -0.5, %v440_v63  ;;  %vm4525_vm13 = vcmp.lt.f32.partialorder %v445_v1, 1.0  ;;  %v509_v25 = vmul.f32 0.5, %v413_v58  ;;  %6624 = vst [vmem:[#allocation6_spill] sm:$0xff] %v4566_v57  ;;  %s3516_s13 = sshll.u32 %s243_s12, 4  ;;  %s3517_s13 = int_to_ptr.vmem [resolvable:$true] %s3516_s13 }
  0x52   : > { %v687_v23 = vsel %vm608_vm0, %v602_v16, 0.0  ;;  %v601_v24 = vsel %vm4512_vm11, %v537_v9, %v3655_v10  ;;  %v3659_v27 = vadd.f32 -0.5, %v445_v1  ;;  %v412_v30 = vsub.f32 %v298_v6, %v362_v7 }
  0x53   : > { %v684_v28 = vsel %vm608_vm0, %v601_v24, 0.0  ;;  %v600_v29 = vsel %vm4516_vm12, %v536_v17, %v3654_v18  ;;  %v411_v31 = vsub.f32 %v297_v12, %v361_v13  ;;  %v541_v33 = vmul.f32 %v509_v25, %v413_v58 }
  0x54   : > { %670 = vadd.xlane.f32.xlu2 %v4456_v14  ;;  %667 = vadd.xlane.f32.xlu1 %v4461_v26  ;;  %v681_v32 = vsel %vm608_vm0, %v600_v29, 0.0  ;;  %v415_v34 = vsub.f32 %v301_v15, %v365_v20  ;;  %v414_v35 = vsub.f32 %v300_v21, %v364_v22  ;;  %v444_v36 = vand.u32 2147483647, %v412_v30 }
  0x55   : > { %664 = vadd.xlane.f32.xlu0 %v663_v46  ;;  %v508_v37 = vmul.f32 0.5, %v412_v30  ;;  %v443_v38 = vand.u32 2147483647, %v411_v31  ;;  %v507_v39 = vmul.f32 0.5, %v411_v31  ;;  %v605_v14 = vsel %vm4525_vm13, %v541_v33, %v3659_v27 }
  0x56   : > { %v447_v26 = vand.u32 2147483647, %v415_v34  ;;  %v511_v40 = vmul.f32 0.5, %v415_v34  ;;  %v446_v41 = vand.u32 2147483647, %v414_v35  ;;  %v696_v42 = vsel %vm608_vm0, %v605_v14, 0.0 }
  0x57   : > { %vm476_vm14 = vcmp.lt.f32.partialorder %v444_v36, 1.0  ;;  %v540_v43 = vmul.f32 %v508_v37, %v412_v30  ;;  %v3658_v44 = vadd.f32 -0.5, %v444_v36  ;;  %vm4550_vm15 = vcmp.lt.f32.partialorder %v443_v38, 1.0 }
  0x58   : > { %v539_v46 = vmul.f32 %v507_v39, %v411_v31  ;;  %v3657_v47 = vadd.f32 -0.5, %v443_v38  ;;  %vm4554_vm1 = vcmp.lt.f32.partialorder %v447_v26, 1.0  ;;  %v543_v53 = vmul.f32 %v511_v40, %v415_v34 }
  0x59   : > { %v604_v52 = vsel %vm476_vm14, %v540_v43, %v3658_v44  ;;  %v3661_v54 = vadd.f32 -0.5, %v447_v26  ;;  %vm4561_vm2 = vcmp.lt.f32.partialorder %v446_v41, 1.0  ;;  %v510_v50 = vmul.f32 0.5, %v414_v35 }
  0x5a   : > { %v693_v58 = vsel %vm608_vm0, %v604_v52, 0.0  ;;  %v603_v59 = vsel %vm4550_vm15, %v539_v46, %v3657_v47  ;;  %v3660_v60 = vadd.f32 -0.5, %v446_v41  ;;  %v6454_v63 = vlaneseq }
  0x5b   : > { %v690_v61 = vsel %vm608_vm0, %v603_v59, 0.0  ;;  %v607_v62 = vsel %vm4554_vm1, %v543_v53, %v3661_v54  ;;  %vm6524_vm3 = vcmp.gt.s32.totalorder %v4559_v49, 0  ;;  %v542_v1 = vmul.f32 %v510_v50, %v414_v35 }
  0x5c   : > { %679 = vadd.xlane.f32.xlu2 %v4494_v51  ;;  %676 = vadd.xlane.f32.xlu1 %v4499_v55  ;;  %v702_v0 = vsel %vm608_vm0, %v607_v62, 0.0  ;;  %vm6520_vm4 = vcmp.gt.s32.totalorder %v4566_v57, 0  ;;  %v4581_v3 = vshrl.u32 %v6454_v63, 7  ;;  %v6452_v51 = vmov 0.0  }
  0x5d   : > { %673 = vadd.xlane.f32.xlu0 %v4504_v2  ;;  %v4586_v4 = vsel %vm6524_vm3, 1.0, %v6452_v51  ;;  %v606_v5 = vsel %vm4561_vm2, %v542_v1, %v3660_v60  ;;  %v4593_v55 = vsel %vm6520_vm4, 1.0, %v6452_v51  ;;  %v6450_v41 = vmov 0  }
  0x5e   : > { %6625 = vst [vmem:[#allocation7_spill] sm:$0xff] %v4581_v3  ;;  %v699_v2 = vsel %vm608_vm0, %v606_v5, 0.0  ;;  %3756 = vset.pattern.permute.xlu2 %v4581_v3  ;;  %v4599_v6 = vadd.s32 8, %v4581_v3  ;;  %v4604_v7 = vadd.s32 16, %v4581_v3  ;;  %v707_v8 = vperm.slane %v4586_v4, 0 }
  0x5f   : > { %6626 = vst [vmem:[#allocation8_spill] sm:$0xff] %v4586_v4  ;;  %v708_v9 = vperm.slane %v4593_v55, 0  ;;  %v4613_v11 = vadd.s32 24, %v4581_v3  ;;  %v4619_v12 = vadd.s32 64, %v4581_v3  ;;  %v4623_v13 = vadd.s32 40, %v4581_v3 }
  0x60   : > { %6627 = vst [vmem:[#allocation9_spill] sm:$0xff] %v4593_v55  ;;  %3762 = vset.pattern.permute.xlu0 %v4599_v6  ;;  %3768 = vset.pattern.permute.xlu1 %v4604_v7  ;;  %v4632_v17 = vadd.s32 32, %v4581_v3  ;;  %v4640_v19 = vadd.s32 104, %v4581_v3  ;;  %v4659_v27 = vadd.s32 48, %v4581_v3  ;;  %v4680_v34 = vadd.s32 72, %v4581_v3 }
  0x61   : > { %2036 = vst [vmem:[#allocation1] ss:$9 sm:$0xff] %v4586_v4  ;;  %v4609_v10 = vpack.i.bf16 %v708_v9, %v707_v8  ;;  %v4693_v39 = vadd.s32 96, %v4581_v3  ;;  %v4702_v40 = vadd.s32 88, %v4581_v3  ;;  %v4714_v45 = vadd.s32 120, %v4581_v3 }
  0x62   : > { %6628 = vst [vmem:[#allocation10_spill] sm:$0xff] %v4599_v6  ;;  %v4723_v48 = vadd.s32 112, %v4581_v3  ;;  %vm1201_vm0 = vcmask 64512   ;;  %vm6540_vm5 = vcmask 130112   ;;  %vm6538_vm6 = vcmask 195712  }
  0x63   : > { %2038 = vst [vmem:[#allocation1 + $0x1] ss:$9 sm:$0xff] %v4593_v55  ;;  %vm6536_vm7 = vcmask 261312   ;;  %vm6535_vm8 = vcmask 326912   ;;  %vm6534_vm9 = vcmask 392512   ;;  %vm6533_vm10 = vcmask 458112  }
  0x64   : > { %688 = vadd.xlane.f32.xlu2 %v687_v23  ;;  %6629 = vst [vmem:[#allocation11_spill] sm:$0xff] %v4604_v7  ;;  %685 = vadd.xlane.f32.xlu1 %v684_v28  ;;  %v4650_v23 = vadd.s32 56, %v4581_v3  ;;  %vm6532_vm11 = vcmask 523712   ;;  %vm6531_vm12 = vcmask 589312   ;;  %vm6468_vm13 = vcmask 654912  }
  0x65   : > { %682 = vadd.xlane.f32.xlu0 %v681_v32  ;;  %v4673_v32 = vadd.s32 80, %v4581_v3  ;;  %6630 = vst [vmem:[#allocation12_spill] sm:$0xff] %v4714_v45  ;;  %vm6465_vm14 = vcmask 720512   ;;  %vm6467_vm15 = vcmask 786112   ;;  %vm6466_vm1 = vcmask 851712  }
  0x66   : > { %vm6530_vm2 = vcmask 917312  }
  0x6c   : > { %697 = vadd.xlane.f32.xlu2 %v696_v42  ;;  %694 = vadd.xlane.f32.xlu1 %v693_v58 }
  0x6d   : > { %691 = vadd.xlane.f32.xlu0 %v690_v61 }
  0x74   : > { %703 = vadd.xlane.f32.xlu1 %v702_v0 }
  0x75   : > { %700 = vadd.xlane.f32.xlu0 %v699_v2 }
  0x84   : > { %3758 = vperm.xlu2 %3756, %v4609_v10  }
  0x89   : > { %3764 = vperm.xlu0 %3762, %v4609_v10  }
  0x8c   : > { %3774 = vset.pattern.permute.xlu2 %v4613_v11 }
  0x8d   : > { %3770 = vperm.xlu1 %3768, %v4609_v10  }
  0x91   : > { %3804 = vset.pattern.permute.xlu0 %v4619_v12 }
  0x94   : > { %3776 = vperm.xlu2 %3774, %v4609_v10  }
  0x95   : > { %3786 = vset.pattern.permute.xlu1 %v4623_v13 }
  0x97   : > { %v4627_v15 = vpop.xlane.xlu2 %622  ;;  %v4629_v16 = vpop.xlane.xlu1 %616 }
  0x98   : > { %v4634_v18 = vpop.xlane.xlu0 %610 }
  0x99   : > { %3806 = vperm.xlu0 %3804, %v4609_v10  }
  0x9c   : > { %3780 = vset.pattern.permute.xlu2 %v4632_v17 }
  0x9d   : > { %3788 = vperm.xlu1 %3786, %v4609_v10  }
  0x9f   : > { %v4642_v20 = vpop.xlane.xlu2 %625  ;;  %v4644_v21 = vpop.xlane.xlu1 %619 }
  0xa0   : > { %v4646_v22 = vpop.xlane.xlu0 %613 }
  0xa1   : > { %3834 = vset.pattern.permute.xlu0 %v4640_v19 }
  0xa4   : > { %3782 = vperm.xlu2 %3780, %v4609_v10  }
  0xa5   : > { %3798 = vset.pattern.permute.xlu1 %v4650_v23 }
  0xa7   : > { %v4654_v24 = vpop.xlane.xlu2 %634  ;;  %v4656_v25 = vpop.xlane.xlu1 %631 }
  0xa8   : > { %v4661_v28 = vpop.xlane.xlu0 %628 }
  0xa9   : > { %3836 = vperm.xlu0 %3834, %v4609_v10  }
  0xac   : > { %3792 = vset.pattern.permute.xlu2 %v4659_v27 }
  0xad   : > { %3800 = vperm.xlu1 %3798, %v4609_v10  }
  0xaf   : > { %v4666_v29 = vpop.xlane.xlu2 %643  ;;  %v4670_v31 = vpop.xlane.xlu1 %640 }
  0xb0   : > { %v4668_v30 = vpop.xlane.xlu0 %637 }
  0xb1   : > { %3854 = vset.pattern.permute.xlu0 %v6450_v41 }
  0xb4   : > { %3794 = vperm.xlu2 %3792, %v4609_v10  }
  0xb5   : > { %3816 = vset.pattern.permute.xlu1 %v4673_v32 }
  0xb7   : > { %v4677_v33 = vpop.xlane.xlu2 %652  ;;  %v4684_v36 = vpop.xlane.xlu1 %649 }
  0xb8   : > { %v4682_v35 = vpop.xlane.xlu0 %646 }
  0xbc   : > { %3810 = vset.pattern.permute.xlu2 %v4680_v34 }
  0xbd   : > { %3818 = vperm.xlu1 %3816, %v4609_v10  }
  0xbf   : > { %v4688_v37 = vpop.xlane.xlu2 %661  ;;  %v4696_v14 = vpop.xlane.xlu1 %658 }
  0xc0   : > { %v4690_v38 = vpop.xlane.xlu0 %655 }
  0xc4   : > { %3812 = vperm.xlu2 %3810, %v4609_v10  }
  0xc5   : > { %3828 = vset.pattern.permute.xlu1 %v4693_v39 }
  0xc7   : > { %v4699_v26 = vpop.xlane.xlu2 %670  ;;  %v4711_v44 = vpop.xlane.xlu1 %667 }
  0xc8   : > { %v4705_v42 = vpop.xlane.xlu0 %664 }
  0xcc   : > { %3822 = vset.pattern.permute.xlu2 %v4702_v40 }
  0xcd   : > { %3830 = vperm.xlu1 %3828, %v4609_v10  }
  0xcf   : > { %v4709_v43 = vpop.xlane.xlu2 %679  ;;  %v4725_v52 = vpop.xlane.xlu1 %676 }
  0xd0   : > { %v4717_v46 = vpop.xlane.xlu0 %673 }
  0xd4   : > { %3824 = vperm.xlu2 %3822, %v4609_v10  }
  0xd5   : > { %3846 = vset.pattern.permute.xlu1 %v4714_v45 }
  0xd7   : > { %v4720_v47 = vpop.xlane.xlu2 %688  ;;  %v4733_v56 = vpop.xlane.xlu1 %685 }
  0xd8   : > { %v4729_v53 = vpop.xlane.xlu0 %682 }
  0xdc   : > { %3840 = vset.pattern.permute.xlu2 %v4723_v48 }
  0xdd   : > { %3848 = vperm.xlu1 %3846, %v4609_v10  }
  0xdf   : > { %v4731_v54 = vpop.xlane.xlu2 %697  ;;  %v4744_v61 = vpop.xlane.xlu1 %694 }
  0xe0   : > { %v4740_v50 = vpop.xlane.xlu0 %691 }
  0xe4   : > { %3842 = vperm.xlu2 %3840, %v4609_v10  }
  0xe5   : > { %3853 = vset.pattern.permute.xlu1 %v6450_v41 }
  0xe7   : > { %v4737_v58 = vpop.permute.xlu2 %3758  ;;  %v4752_v2 = vpop.xlane.xlu1 %703 }
  0xe8   : > { %v3760_v59 = vunpack.i.l.bf16 %v4737_v58  ;;  %v4749_v1 = vpop.xlane.xlu0 %700 }
  0xea   : > { %v933_v60 = vmul.f32 %v3760_v59, %v4634_v18 }
  0xec   : > { %3852 = vset.pattern.permute.xlu2 %v6450_v41 }
  0xed   : > { %998 = vperm.xlu2 %3852, %v933_v60  }
  0xef   : > { %v4746_v62 = vpop.permute.xlu2 %3776 }
  0xf0   : > { %v3778_v0 = vunpack.i.l.bf16 %v4746_v62 }
  0xf2   : > { %v936_v5 = vmul.f32 %v3778_v0, %v4644_v21 }
  0xf5   : > { %1007 = vperm.xlu2 %3852, %v936_v5  }
  0xfb   : > { %v3765_v8 = vpop.permute.xlu0 %3764 }
  0xfc   : > { %v3766_v9 = vunpack.i.l.bf16 %v3765_v8 }
  0xfe   : > { %v934_v10 = vmul.f32 %v3766_v9, %v4646_v22  ;;  %v4755_v18 = vpop.permute.xlu2 %3782 }
  0xff   : > { %v4757_v59 = vpop.permute.xlu1 %3770  ;;  %v3784_v41 = vunpack.i.l.bf16 %v4755_v18 }
 0x100   : > { %v3772_v60 = vunpack.i.l.bf16 %v4757_v59  ;;  %1001 = vperm.xlu1 %3853, %v934_v10  }
 0x101   : > { %v937_v21 = vmul.f32 %v3784_v41, %v4627_v15 }
 0x102   : > { %v935_v51 = vmul.f32 %v3772_v60, %v4629_v16 }
 0x104   : > { %1004 = vperm.xlu0 %3854, %v935_v51  }
 0x108   : > { %1010 = vperm.xlu1 %3853, %v937_v21  }
 0x10b   : > { %v4768_v10 = vpop.permute.xlu0 %3806 }
 0x10c   : > { %v3808_v16 = vunpack.i.l.bf16 %v4768_v10 }
 0x10e   : > { %v3795_v0 = vpop.permute.xlu2 %3794  ;;  %v941_v51 = vmul.f32 %v3808_v16, %v4654_v24 }
 0x10f   : > { %v3796_v5 = vunpack.i.l.bf16 %v3795_v0  ;;  %v4763_v63 = vpop.permute.xlu1 %3788 }
 0x110   : > { %v3790_v22 = vunpack.i.l.bf16 %v4763_v63 }
 0x111   : > { %v939_v9 = vmul.f32 %v3796_v5, %v4661_v28 }
 0x112   : > { %v938_v55 = vmul.f32 %v3790_v22, %v4642_v20 }
 0x113   : > { %1016 = vperm.xlu1 %3853, %v939_v9  }
 0x114   : > { %1013 = vperm.xlu2 %3852, %v938_v55  }
 0x11b   : > { %v3837_v16 = vpop.permute.xlu0 %3836 }
 0x11c   : > { %1022 = vperm.xlu2 %3852, %v941_v51   ;;  %v3838_v51 = vunpack.i.l.bf16 %v3837_v16 }
 0x11e   : > { %v3813_v15 = vpop.permute.xlu2 %3812 }
 0x11f   : > { %v3814_v41 = vunpack.i.l.bf16 %v3813_v15  ;;  %v3801_v60 = vpop.permute.xlu1 %3800 }
 0x120   : > { %v3802_v21 = vunpack.i.l.bf16 %v3801_v60 }
 0x121   : > { %v942_v4 = vmul.f32 %v3814_v41, %v4668_v30  ;;  %v946_v30 = vmul.f32 %v3838_v51, %v4684_v36  ;;  %v3803_v51 = vunpack.i.h.bf16 %v3801_v60 }
 0x122   : > { %v940_v28 = vmul.f32 %v3802_v21, %v4656_v25  ;;  %v3761_v25 = vunpack.i.h.bf16 %v4737_v58 }
 0x123   : > { %1025 = vperm.xlu1 %3853, %v942_v4  }
 0x124   : > { %1019 = vperm.xlu0 %3854, %v940_v28  }
 0x12e   : > { %v4774_v5 = vpop.permute.xlu2 %3824 }
 0x12f   : > { %v3826_v20 = vunpack.i.l.bf16 %v4774_v5  ;;  %v3819_v55 = vpop.permute.xlu1 %3818 }
 0x130   : > { %v3820_v22 = vunpack.i.l.bf16 %v3819_v55 }
 0x131   : > { %v944_v9 = vmul.f32 %v3826_v20, %v4666_v29  ;;  %v949_v29 = vmul.f32 %v3761_v25, %v4696_v14  ;;  %v4833_v25 = vld [vmem:[%s4815_s14] sm:$0xff] }
 0x132   : > { %v943_v24 = vmul.f32 %v3820_v22, %v4670_v31  ;;  %v3767_v31 = vunpack.i.h.bf16 %v3765_v8  ;;  %v3779_v22 = vunpack.i.h.bf16 %v4746_v62  ;;  %v3815_v62 = vunpack.i.h.bf16 %v3813_v15 }
 0x133   : > { %1031 = vperm.xlu2 %3852, %v944_v9   ;;  %v3785_v9 = vunpack.i.h.bf16 %v4755_v18  ;;  %v3839_v15 = vunpack.i.h.bf16 %v3837_v16 }
 0x134   : > { %1028 = vperm.xlu0 %3854, %v943_v24   ;;  %v950_v36 = vmul.f32 %v3767_v31, %v4688_v37  ;;  %v952_v58 = vmul.f32 %v3779_v22, %v4711_v44  ;;  %v3797_v24 = vunpack.i.h.bf16 %v3795_v0  ;;  %v3773_v37 = vunpack.i.h.bf16 %v4757_v59 }
 0x135   : > { %v953_v14 = vmul.f32 %v3785_v9, %v4699_v26  ;;  %v956_v44 = vmul.f32 %v3803_v51, %v4709_v43  ;;  %v958_v18 = vmul.f32 %v3815_v62, %v4733_v56  ;;  %v3791_v26 = vunpack.i.h.bf16 %v4763_v63 }
 0x136   : > { %v951_v0 = vmul.f32 %v3773_v37, %v4705_v42  ;;  %v3809_v43 = vunpack.i.h.bf16 %v4768_v10  ;;  %v962_v42 = vmul.f32 %v3839_v15, %v4731_v54 }
 0x137   : > { %v954_v59 = vmul.f32 %v3791_v26, %v4717_v46 }
 0x13c   : > { %1037 = vperm.xlu0 %3854, %v946_v30   ;;  %v3821_v30 = vunpack.i.h.bf16 %v3819_v55  ;;  %v957_v55 = vmul.f32 %v3809_v43, %v4729_v53  ;;  %v4818_v53 = vld [vmem:[%s4815_s14 + $0x8] sm:$0xff]  ;;  %v4894_v43 = vld [vmem:[%s4815_s14 + $0x58] sm:$0xff] }
 0x13e   : > { %v3843_v4 = vpop.permute.xlu2 %3842 }
 0x13f   : > { %v3844_v41 = vunpack.i.l.bf16 %v3843_v4  ;;  %v3831_v21 = vpop.permute.xlu1 %3830 }
 0x140   : > { %v3832_v28 = vunpack.i.l.bf16 %v3831_v21 }
 0x141   : > { %v947_v45 = vmul.f32 %v3844_v41, %v4677_v33  ;;  %v1202_v41 = vsel %vm1201_vm0, %v4833_v25, -inf }
 0x142   : > { %v945_v20 = vmul.f32 %v3832_v28, %v4682_v35  ;;  %v955_v35 = vmul.f32 %v3797_v24, %v4725_v52  ;;  %v3833_v52 = vunpack.i.h.bf16 %v3831_v21 }
 0x143   : > { %1040 = vperm.xlu2 %3852, %v947_v45  }
 0x144   : > { %1046 = vperm.xlu0 %3854, %v949_v29   ;;  %1034 = vperm.xlu1 %3853, %v945_v20   ;;  %v961_v60 = vmul.f32 %v3833_v52, %v4744_v61  ;;  %v3845_v61 = vunpack.i.h.bf16 %v3843_v4  ;;  %v4842_v29 = vld [vmem:[%s4815_s14 + $0x18] sm:$0xff] }
 0x145   : > { %v1211_v31 = vsel %vm1201_vm0, %v4842_v29, -inf }
 0x146   : > { %v963_v54 = vmul.f32 %v3845_v61, %v4749_v1 }
 0x14b   : > { %1049 = vperm.xlu2 %3852, %v950_v36   ;;  %v4851_v36 = vld [vmem:[%s4815_s14 + $0x30] sm:$0xff] }
 0x14c   : > { %1055 = vperm.xlu0 %3854, %v952_v58   ;;  %v1220_v24 = vsel %vm1201_vm0, %v4851_v36, -inf }
 0x14f   : > { %v3849_v33 = vpop.permute.xlu1 %3848 }
 0x150   : > { %v3850_v45 = vunpack.i.l.bf16 %v3849_v33  ;;  %v3851_v56 = vunpack.i.h.bf16 %v3849_v33 }
 0x152   : > { %v948_v8 = vmul.f32 %v3850_v45, %v4690_v38  ;;  %v959_v38 = vmul.f32 %v3821_v30, %v4720_v47  ;;  %v964_v63 = vmul.f32 %v3851_v56, %v4752_v2  ;;  %v3827_v47 = vunpack.i.h.bf16 %v4774_v5  ;;  %v4809_v2 = vpop.permute.xlu2 %998  ;;  %v4862_v45 = vld [vmem:[%s4815_s14 + $0x48] sm:$0xff] }
 0x153   : > { %1058 = vperm.xlu2 %3852, %v953_v14   ;;  %v1229_v51 = vsel %vm1201_vm0, %v4862_v45, -inf }
 0x154   : > { %1064 = vperm.xlu0 %3854, %v955_v35   ;;  %1043 = vperm.xlu1 %3853, %v948_v8   ;;  %v960_v46 = vmul.f32 %v3827_v47, %v4740_v50  ;;  %v1205_v50 = vsel %vm1201_vm0, %v4818_v53, -inf  ;;  %v4867_v35 = vld [vmem:[%s4815_s14 + $0x28] sm:$0xff] }
 0x155   : > { %v1217_v37 = vsel %vm1201_vm0, %v4867_v35, -inf }
 0x15a   : > { %v4822_v1 = vpop.permute.xlu2 %1007 }
 0x15b   : > { %1067 = vperm.xlu2 %3852, %v956_v44   ;;  %v4876_v44 = vld [vmem:[%s4815_s14 + $0x60] sm:$0xff] }
 0x15c   : > { %1073 = vperm.xlu0 %3854, %v958_v18   ;;  %1052 = vperm.xlu1 %3853, %v951_v0   ;;  %v4879_v18 = vld [vmem:[%s4815_s14 + $0x40] sm:$0xff]  ;;  %v1238_v30 = vsel %vm1201_vm0, %v4876_v44, -inf }
 0x15d   : > { %v1226_v26 = vsel %vm1201_vm0, %v4879_v18, -inf }
 0x163   : > { %1076 = vperm.xlu2 %3852, %v959_v38  }
 0x164   : > { %1082 = vperm.xlu0 %3854, %v961_v60   ;;  %1061 = vperm.xlu1 %3853, %v954_v59   ;;  %v4888_v60 = vld [vmem:[%s4815_s14 + $0x78] sm:$0xff]  ;;  %v6631_v59 = vlaneseq }
 0x165   : > { %v1247_v56 = vsel %vm1201_vm0, %v4888_v60, -inf }
 0x166   : > { %v4891_v15 = vand.u32 127, %v6631_v59 }
 0x16b   : > { %1085 = vperm.xlu2 %3852, %v962_v42   ;;  %v1235_v42 = vsel %vm1201_vm0, %v4894_v43, -inf }
 0x16c   : > { %1091 = vperm.xlu0 %3854, %v964_v63   ;;  %1070 = vperm.xlu1 %3853, %v957_v55   ;;  %v4901_v63 = vadd.s32 4294967288, %v4891_v15  ;;  %v4904_v55 = vadd.s32 4294967280, %v4891_v15 }
 0x16e   : > { %v4828_v16 = vpop.permute.xlu2 %1013  ;;  %6632 = vst [vmem:[#allocation13_spill] sm:$0xff] %v4901_v63 }
 0x16f   : > { %6633 = vst [vmem:[#allocation14_spill] sm:$0xff] %v4904_v55 }
 0x172   : > { %v4826_v5 = vpop.permute.xlu1 %1001 }
 0x173   : > { %3855 = vset.pattern.permute.xlu2 %v4581_v3 }
 0x174   : > { %1079 = vperm.xlu1 %3853, %v960_v46   ;;  %3862 = vset.pattern.permute.xlu0 %v4619_v12 }
 0x176   : > { %v4824_v10 = vpop.permute.xlu0 %1004  ;;  %v4844_v20 = vpop.permute.xlu2 %1022 }
 0x17a   : > { %v4837_v21 = vpop.permute.xlu1 %1010 }
 0x17c   : > { %1088 = vperm.xlu1 %3853, %v963_v54   ;;  %v1097_v54 = vperm.slane %v4826_v5, %v4901_v63 }
 0x184   : > { %3856 = vset.pattern.permute.xlu1 %v4604_v7 }
 0x185   : > { %v4848_v22 = vpop.permute.xlu1 %1016 }
 0x18d   : > { %v4853_v58 = vpop.permute.xlu2 %1031 }
 0x195   : > { %v4859_v33 = vpop.permute.xlu1 %1025 }
 0x196   : > { %1206 = vmax.xlane.f32.xlu0 %v1205_v50  ;;  %v4830_v4 = vpop.permute.xlu0 %1019 }
 0x19d   : > { %v4864_v14 = vpop.permute.xlu2 %1040 }
 0x19e   : > { %1218 = vmax.xlane.f32.xlu0 %v1217_v37  ;;  %v4918_v37 = vadd.s32 4294967272, %v4891_v15 }
 0x1a0   : > { %6634 = vst [vmem:[#allocation15_spill] sm:$0xff] %v4918_v37 }
 0x1a5   : > { %v1050_v0 = vpop.permute.xlu2 %1049 }
 0x1a6   : > { %1203 = vmax.xlane.f32.xlu1 %v1202_v41  ;;  %v4839_v28 = vpop.permute.xlu0 %1028  ;;  %1227 = vmax.xlane.f32.xlu0 %v1226_v26  ;;  %v4910_v41 = vld [vmem:[%s4815_s14 + $0x90] sm:$0xff]  ;;  %v1157_v5 = vperm.slane %v1050_v0, %v4901_v63  ;;  %v1105_v0 = vperm.slane %v4822_v1, %v4918_v37 }
 0x1ad   : > { %v1059_v47 = vpop.permute.xlu2 %1058 }
 0x1ae   : > { %1212 = vmax.xlane.f32.xlu1 %v1211_v31  ;;  %v4855_v9 = vpop.permute.xlu0 %1037  ;;  %1236 = vmax.xlane.f32.xlu0 %v1235_v42  ;;  %v1101_v31 = vperm.slane %v4824_v10, %v4904_v55  ;;  %v4936_v42 = vadd.s32 4294967256, %v4891_v15 }
 0x1b0   : > { %6636 = vst [vmem:[#allocation17_spill] sm:$0xff] %v4936_v42 }
 0x1b6   : > { %1221 = vmax.xlane.f32.xlu1 %v1220_v24  ;;  %v1047_v8 = vpop.permute.xlu0 %1046  ;;  %v4873_v62 = vpop.permute.xlu1 %1034 }
 0x1b7   : > { %v1156_v50 = vperm.slane %v1047_v8, %v4891_v15  ;;  %v4922_v8 = vadd.s32 4294967264, %v4891_v15 }
 0x1b9   : > { %6635 = vst [vmem:[#allocation16_spill] sm:$0xff] %v4922_v8  ;;  %v1158_v10 = vsel %vm6540_vm5, %v1157_v5, %v1156_v50  ;;  %v4948_v5 = vadd.s32 4294967240, %v4891_v15 }
 0x1bb   : > { %6638 = vst [vmem:[#allocation19_spill] sm:$0xff] %v4948_v5 }
 0x1be   : > { %1230 = vmax.xlane.f32.xlu1 %v1229_v51  ;;  %v1056_v52 = vpop.permute.xlu0 %1055  ;;  %v1095_v51 = vperm.slane %v4809_v2, %v4891_v15 }
 0x1c0   : > { %v1099_v26 = vsel %vm6540_vm5, %v1097_v54, %v1095_v51  ;;  %v1068_v51 = vpop.permute.xlu2 %1067 }
 0x1c1   : > { %v1103_v59 = vsel %vm6538_vm6, %v1101_v31, %v1099_v26  ;;  %v1109_v31 = vperm.slane %v4837_v21, %v4922_v8  ;;  %v4953_v26 = vld [vmem:[%s4815_s14 + $0xa8] sm:$0xff] }
 0x1c2   : > { %v1107_v1 = vsel %vm6536_vm7, %v1105_v0, %v1103_v59  ;;  %v1265_v0 = vsel %vm1201_vm0, %v4953_v26, -inf }
 0x1c6   : > { %1239 = vmax.xlane.f32.xlu1 %v1238_v30  ;;  %v4885_v38 = vpop.permute.xlu1 %1043  ;;  %v1065_v61 = vpop.permute.xlu0 %1064  ;;  %v1256_v30 = vsel %vm1201_vm0, %v4910_v41, -inf }
 0x1ce   : > { %1248 = vmax.xlane.f32.xlu1 %v1247_v56  ;;  %v1053_v46 = vpop.permute.xlu1 %1052  ;;  %v4931_v56 = vld [vmem:[%s4815_s14 + $0x70] sm:$0xff]  ;;  %v1074_v21 = vpop.permute.xlu0 %1073 }
 0x1cf   : > { %v1159_v24 = vperm.slane %v1053_v46, %v4904_v55  ;;  %v1161_v46 = vperm.slane %v1056_v52, %v4918_v37  ;;  %v1244_v50 = vsel %vm1201_vm0, %v4931_v56, -inf  ;;  %v1111_v37 = vsel %vm6535_vm8, %v1109_v31, %v1107_v1  ;;  %v4972_v31 = vld [vmem:[%s4815_s14 + $0x88] sm:$0xff] }
 0x1d0   : > { %1245 = vmax.xlane.f32.xlu0 %v1244_v50 }
 0x1d1   : > { %v1160_v2 = vsel %vm6538_vm6, %v1159_v24, %v1158_v10  ;;  %v4944_v24 = vadd.s32 4294967248, %v4891_v15  ;;  %v1163_v10 = vperm.slane %v1059_v47, %v4922_v8 }
 0x1d2   : > { %v1162_v52 = vsel %vm6536_vm7, %v1161_v46, %v1160_v2  ;;  %v1113_v2 = vperm.slane %v4828_v16, %v4936_v42  ;;  %v1121_v46 = vperm.slane %v4830_v4, %v4948_v5  ;;  %v1253_v16 = vsel %vm1201_vm0, %v4972_v31, -inf }
 0x1d3   : > { %6637 = vst [vmem:[#allocation18_spill] sm:$0xff] %v4944_v24  ;;  %v1117_v50 = vperm.slane %v4848_v22, %v4944_v24  ;;  %v1164_v59 = vsel %vm6535_vm8, %v1163_v10, %v1162_v52  ;;  %v1167_v22 = vperm.slane %v1065_v61, %v4944_v24  ;;  %v4984_v61 = vadd.s32 4294967224, %v4891_v15 }
 0x1d4   : > { %v1115_v1 = vsel %vm6534_vm9, %v1113_v2, %v1111_v37  ;;  %v4989_v2 = vld [vmem:[%s4815_s14 + $0xc0] sm:$0xff] }
 0x1d5   : > { %v1119_v4 = vsel %vm6533_vm10, %v1117_v50, %v1115_v1  ;;  %6641 = vst [vmem:[#allocation22_spill] sm:$0xff] %v4984_v61  ;;  %v1077_v1 = vpop.permute.xlu2 %1076 }
 0x1d6   : > { %1257 = vmax.xlane.f32.xlu1 %v1256_v30  ;;  %v1062_v54 = vpop.permute.xlu1 %1061  ;;  %v1123_v37 = vsel %vm6532_vm11, %v1121_v46, %v1119_v4  ;;  %v1274_v4 = vsel %vm1201_vm0, %v4989_v2, -inf }
 0x1d7   : > { %v1165_v30 = vperm.slane %v1062_v54, %v4936_v42  ;;  %v4968_v54 = vadd.s32 4294967232, %v4891_v15 }
 0x1d8   : > { %1254 = vmax.xlane.f32.xlu0 %v1253_v16  ;;  %v1083_v16 = vpop.permute.xlu0 %1082 }
 0x1d9   : > { %v1166_v47 = vsel %vm6534_vm9, %v1165_v30, %v1164_v59  ;;  %6639 = vst [vmem:[#allocation20_spill] sm:$0xff] %v4968_v54  ;;  %v4979_v30 = vadd.s32 4294967216, %v4891_v15  ;;  %v1125_v50 = vperm.slane %v4844_v20, %v4968_v54  ;;  %v5004_v20 = vadd.s32 4294967208, %v4891_v15 }
 0x1da   : > { %v1168_v10 = vsel %vm6533_vm10, %v1167_v22, %v1166_v47  ;;  %v4994_v47 = vadd.s32 4294967200, %v4891_v15 }
 0x1db   : > { %6640 = vst [vmem:[#allocation21_spill] sm:$0xff] %v4979_v30  ;;  %v1133_v46 = vperm.slane %v4839_v28, %v4979_v30 }
 0x1dc   : > { %6642 = vst [vmem:[#allocation23_spill] sm:$0xff] %v4994_v47 }
 0x1dd   : > { %6643 = vst [vmem:[#allocation24_spill] sm:$0xff] %v5004_v20 }
 0x1de   : > { %1266 = vmax.xlane.f32.xlu1 %v1265_v0  ;;  %v1071_v52 = vpop.permute.xlu1 %1070  ;;  %v1169_v0 = vperm.slane %v1068_v51, %v4948_v5 }
 0x1df   : > { %v1171_v59 = vperm.slane %v1071_v52, %v4968_v54  ;;  %v1127_v52 = vsel %vm6531_vm12, %v1125_v50, %v1123_v37  ;;  %v1129_v54 = vperm.slane %v4859_v33, %v4984_v61  ;;  %v5010_v37 = vld [vmem:[%s4815_s14 + $0xa0] sm:$0xff]  ;;  %v1141_v33 = vperm.slane %v4873_v62, %v4994_v47 }
 0x1e0   : > { %v1170_v22 = vsel %vm6532_vm11, %v1169_v0, %v1168_v10  ;;  %v1173_v10 = vperm.slane %v1074_v21, %v4984_v61  ;;  %v1262_v50 = vsel %vm1201_vm0, %v5010_v37, -inf  ;;  %v1175_v21 = vperm.slane %v1077_v1, %v4979_v30 }
 0x1e1   : > { %v1172_v51 = vsel %vm6531_vm12, %v1171_v59, %v1170_v22  ;;  %v1131_v28 = vsel %vm6468_vm13, %v1129_v54, %v1127_v52  ;;  %1263 = vmax.xlane.f32.xlu0 %v1262_v50  ;;  %v1137_v54 = vperm.slane %v4853_v58, %v5004_v20  ;;  %v5024_v52 = vadd.s32 4294967192, %v4891_v15 }
 0x1e2   : > { %v1174_v59 = vsel %vm6468_vm13, %v1173_v10, %v1172_v51  ;;  %v1135_v22 = vsel %vm6465_vm14, %v1133_v46, %v1131_v28  ;;  %v5027_v51 = vld [vmem:[%s4815_s14 + $0xd8] sm:$0xff]  ;;  %v5035_v1 = vadd.s32 4294967176, %v4891_v15  ;;  %v1086_v28 = vpop.permute.xlu2 %1085  ;;  %vm1190_vm13 = vcmask 1041408  }
 0x1e3   : > { %6644 = vst [vmem:[#allocation25_spill] sm:$0xff] %v5024_v52  ;;  %v1176_v46 = vsel %vm6465_vm14, %v1175_v21, %v1174_v59  ;;  %v1139_v62 = vsel %vm6467_vm15, %v1137_v54, %v1135_v22  ;;  %v1283_v50 = vsel %vm1201_vm0, %v5027_v51, -inf  ;;  %v1145_v59 = vperm.slane %v4855_v9, %v5024_v52  ;;  %v1092_v21 = vpop.permute.xlu0 %1091  ;;  %v5046_v54 = vld [vmem:[%s4815_s14 + $0xb8] sm:$0xff] }
 0x1e4   : > { %6646 = vst [vmem:[#allocation27_spill] sm:$0xff] %v5035_v1  ;;  %v1143_v58 = vsel %vm6466_vm1, %v1141_v33, %v1139_v62  ;;  %vm6528_vm14 = vcmask 982912   ;;  %v1153_v33 = vperm.slane %v4885_v38, %v5035_v1  ;;  %v1271_v62 = vsel %vm1201_vm0, %v5046_v54, -inf }
 0x1e6   : > { %1275 = vmax.xlane.f32.xlu1 %v1274_v4  ;;  %v1080_v0 = vpop.permute.xlu1 %1079  ;;  %v5031_v4 = vadd.s32 4294967184, %v4891_v15 }
 0x1e7   : > { %v1177_v61 = vperm.slane %v1080_v0, %v5004_v20  ;;  %v1179_v0 = vperm.slane %v1083_v16, %v4994_v47 }
 0x1e8   : > { %6645 = vst [vmem:[#allocation26_spill] sm:$0xff] %v5031_v4  ;;  %v1149_v9 = vperm.slane %v4864_v14, %v5031_v4 }
 0x1e9   : > { %v1178_v10 = vsel %vm6467_vm15, %v1177_v61, %v1176_v46  ;;  %v1181_v61 = vperm.slane %v1086_v28, %v5024_v52  ;;  %v1147_v46 = vsel %vm6530_vm2, %v1145_v59, %v1143_v58  ;;  %1272 = vmax.xlane.f32.xlu0 %v1271_v62  ;;  %v1185_v28 = vperm.slane %v1092_v21, %v5035_v1  ;;  %v5075_v62 = vld [vmem:[%s4815_s14 + $0x10] sm:$0xff] }
 0x1ea   : > { %v1180_v22 = vsel %vm6466_vm1, %v1179_v0, %v1178_v10  ;;  %vm6527_vm1 = vcmask 1048512   ;;  %vm1187_vm15 = vcmask 1041409   ;;  %v5060_v0 = vld [vmem:[%s4815_s14 + $0xf0] sm:$0xff]  ;;  %v1151_v58 = vsel %vm6528_vm14, %v1149_v9, %v1147_v46  ;;  %v5080_v9 = vld [vmem:[%s4815_s14 + $0xe8] sm:$0xff] }
 0x1eb   : > { %v1182_v38 = vsel %vm6530_vm2, %v1181_v61, %v1180_v22  ;;  %v1155_v14 = vsel %vm6527_vm1, %v1153_v33, %v1151_v58  ;;  %v1292_v21 = vsel %vm1201_vm0, %v5060_v0, -inf  ;;  %v5070_v61 = vld [vmem:[%s4815_s14 + $0xd0] sm:$0xff]  ;;  %v1208_v33 = vsel %vm1201_vm0, %v5075_v62, -inf  ;;  %v5090_v58 = vld [vmem:[%s4815_s14 + $0x38] sm:$0xff] }
 0x1ec   : > { %v1280_v46 = vsel %vm1201_vm0, %v5070_v61, -inf }
 0x1ee   : > { %1284 = vmax.xlane.f32.xlu1 %v1283_v50  ;;  %v1089_v16 = vpop.permute.xlu1 %1088 }
 0x1ef   : > { %v1183_v10 = vperm.slane %v1089_v16, %v5031_v4 }
 0x1f1   : > { %v1184_v50 = vsel %vm6528_vm14, %v1183_v10, %v1182_v38  ;;  %1281 = vmax.xlane.f32.xlu0 %v1280_v46  ;;  %v1289_v10 = vsel %vm1201_vm0, %v5080_v9, -inf }
 0x1f2   : > { %v1186_v59 = vsel %vm6527_vm1, %v1185_v28, %v1184_v50  ;;  %v5085_v28 = vld [vmem:[%s4815_s14 + $0x20] sm:$0xff] }
 0x1f3   : > { %v1188_v16 = vsel %vm1187_vm15, %v1186_v59, %v1155_v14  ;;  %v1214_v38 = vsel %vm1201_vm0, %v5085_v28, -inf  ;;  %v1223_v59 = vsel %vm1201_vm0, %v5090_v58, -inf }
 0x1f4   : > { %v1191_v22 = vsel %vm1190_vm13, %v1188_v16, 0.0 }
 0x1f5   : > { %1192 = vadd.xlane.f32.xlu2 %v1191_v22 }
 0x1f6   : > { %1293 = vmax.xlane.f32.xlu1 %v1292_v21  ;;  %v5099_v21 = vld [vmem:[%s4815_s14 + $0x50] sm:$0xff] }
 0x1f7   : > { %v1232_v22 = vsel %vm1201_vm0, %v5099_v21, -inf }
 0x1f9   : > { %1290 = vmax.xlane.f32.xlu0 %v1289_v10  ;;  %v5105_v10 = vld [vmem:[%s4815_s14 + $0x68] sm:$0xff] }
 0x1fd   : > { %1209 = vmax.xlane.f32.xlu2 %v1208_v33 }
 0x205   : > { %1215 = vmax.xlane.f32.xlu2 %v1214_v38 }
 0x209   : > { %v5092_v50 = vpop.xlane.xlu0 %1206 }
 0x20a   : > { %v1299_v14 = vsub.f32 %v4818_v53, %v5092_v50 }
 0x20c   : > { %v1332_v16 = vmul.f32 1.442695, %v1299_v14  ;;  %v1241_v14 = vsel %vm1201_vm0, %v5105_v10, -inf }
 0x20d   : > { %1224 = vmax.xlane.f32.xlu2 %v1223_v59 }
 0x20e   : > { %3960 = vpow2.f32 %v1332_v16  ;;  %v5114_v16 = vld [vmem:[%s4815_s14 + $0x80] sm:$0xff] }
 0x214   : > { %v3961_v46 = vpop.eup %3960 }
 0x215   : > { %1233 = vmax.xlane.f32.xlu2 %v1232_v22  ;;  %v1397_v33 = vsel %vm1201_vm0, %v3961_v46, 0.0 }
 0x216   : > { %1398 = vadd.xlane.f32.xlu1 %v1397_v33  ;;  %v1250_v33 = vsel %vm1201_vm0, %v5114_v16, -inf }
 0x219   : > { %v5107_v53 = vpop.xlane.xlu1 %1203 }
 0x21a   : > { %v1298_v38 = vsub.f32 %v4833_v25, %v5107_v53 }
 0x21c   : > { %v1330_v59 = vmul.f32 1.442695, %v1298_v38  ;;  %v5124_v38 = vld [vmem:[%s4815_s14 + $0x98] sm:$0xff] }
 0x21d   : > { %1242 = vmax.xlane.f32.xlu2 %v1241_v14 }
 0x21e   : > { %3962 = vpow2.f32 %v1330_v59 }
 0x221   : > { %v5116_v22 = vpop.xlane.xlu1 %1212 }
 0x222   : > { %v1301_v46 = vsub.f32 %v4842_v29, %v5116_v22  ;;  %v1259_v29 = vsel %vm1201_vm0, %v5124_v38, -inf }
 0x224   : > { %v3963_v1 = vpop.eup %3962  ;;  %v1336_v4 = vmul.f32 1.442695, %v1301_v46 }
 0x225   : > { %1251 = vmax.xlane.f32.xlu2 %v1250_v33  ;;  %v1394_v25 = vsel %vm1201_vm0, %v3963_v1, 0.0 }
 0x226   : > { %3964 = vpow2.f32 %v1336_v4  ;;  %1395 = vadd.xlane.f32.xlu0 %v1394_v25  ;;  %v5134_v4 = vld [vmem:[%s4815_s14 + $0xb0] sm:$0xff] }
 0x229   : > { %v5126_v14 = vpop.xlane.xlu1 %1221 }
 0x22a   : > { %6647 = vst [vmem:[#allocation28_spill] sm:$0xff] %v5126_v14  ;;  %v1304_v59 = vsub.f32 %v4851_v36, %v5126_v14  ;;  %v1268_v36 = vsel %vm1201_vm0, %v5134_v4, -inf }
 0x22c   : > { %v3965_v52 = vpop.eup %3964  ;;  %v1342_v47 = vmul.f32 1.442695, %v1304_v59 }
 0x22d   : > { %1260 = vmax.xlane.f32.xlu2 %v1259_v29  ;;  %v1403_v46 = vsel %vm1201_vm0, %v3965_v52, 0.0 }
 0x22e   : > { %3966 = vpow2.f32 %v1342_v47  ;;  %1404 = vadd.xlane.f32.xlu0 %v1403_v46  ;;  %v5144_v47 = vld [vmem:[%s4815_s14 + $0xc8] sm:$0xff] }
 0x231   : > { %v5136_v1 = vpop.xlane.xlu1 %1230 }
 0x232   : > { %6648 = vst [vmem:[#allocation29_spill] sm:$0xff] %v5136_v1  ;;  %v1307_v33 = vsub.f32 %v4862_v45, %v5136_v1  ;;  %v1277_v45 = vsel %vm1201_vm0, %v5144_v47, -inf }
 0x234   : > { %v3967_v25 = vpop.eup %3966  ;;  %v1348_v20 = vmul.f32 1.442695, %v1307_v33 }
 0x235   : > { %1269 = vmax.xlane.f32.xlu2 %v1268_v36  ;;  %v1412_v59 = vsel %vm1201_vm0, %v3967_v25, 0.0 }
 0x236   : > { %3968 = vpow2.f32 %v1348_v20  ;;  %1413 = vadd.xlane.f32.xlu0 %v1412_v59  ;;  %v5154_v20 = vld [vmem:[%s4815_s14 + $0xe0] sm:$0xff] }
 0x239   : > { %v5146_v52 = vpop.xlane.xlu1 %1239 }
 0x23a   : > { %6649 = vst [vmem:[#allocation30_spill] sm:$0xff] %v5146_v52  ;;  %v1310_v29 = vsub.f32 %v4876_v44, %v5146_v52  ;;  %v1286_v44 = vsel %vm1201_vm0, %v5154_v20, -inf }
 0x23c   : > { %v3969_v46 = vpop.eup %3968  ;;  %v1354_v30 = vmul.f32 1.442695, %v1310_v29 }
 0x23d   : > { %1278 = vmax.xlane.f32.xlu2 %v1277_v45  ;;  %v1421_v33 = vsel %vm1201_vm0, %v3969_v46, 0.0  ;;  %v5164_v45 = vld [vmem:[%s4815_s14 + $0xf8] sm:$0xff] }
 0x23e   : > { %3970 = vpow2.f32 %v1354_v30  ;;  %1422 = vadd.xlane.f32.xlu0 %v1421_v33 }
 0x241   : > { %v5156_v36 = vpop.xlane.xlu1 %1248 }
 0x242   : > { %6650 = vst [vmem:[#allocation31_spill] sm:$0xff] %v5156_v36  ;;  %v1313_v25 = vsub.f32 %v4888_v60, %v5156_v36  ;;  %v1295_v60 = vsel %vm1201_vm0, %v5164_v45, -inf }
 0x244   : > { %v3971_v59 = vpop.eup %3970  ;;  %v1360_v5 = vmul.f32 1.442695, %v1313_v25 }
 0x245   : > { %1287 = vmax.xlane.f32.xlu2 %v1286_v44  ;;  %v1430_v29 = vsel %vm1201_vm0, %v3971_v59, 0.0  ;;  %v5177_v59 = vpop.xlane.xlu0 %1218 }
 0x246   : > { %3972 = vpow2.f32 %v1360_v5  ;;  %1431 = vadd.xlane.f32.xlu0 %v1430_v29 }
 0x249   : > { %v5166_v30 = vpop.xlane.xlu1 %1257 }
 0x24a   : > { %6651 = vst [vmem:[#allocation32_spill] sm:$0xff] %v5166_v30  ;;  %v1316_v46 = vsub.f32 %v4910_v41, %v5166_v30 }
 0x24c   : > { %v3973_v33 = vpop.eup %3972  ;;  %v1366_v42 = vmul.f32 1.442695, %v1316_v46 }
 0x24d   : > { %1296 = vmax.xlane.f32.xlu2 %v1295_v60  ;;  %v1439_v25 = vsel %vm1201_vm0, %v3973_v33, 0.0  ;;  %v5184_v33 = vpop.xlane.xlu0 %1227 }
 0x24e   : > { %3974 = vpow2.f32 %v1366_v42  ;;  %1440 = vadd.xlane.f32.xlu0 %v1439_v25 }
 0x251   : > { %v5173_v44 = vpop.xlane.xlu1 %1266 }
 0x252   : > { %6652 = vst [vmem:[#allocation33_spill] sm:$0xff] %v5173_v44  ;;  %v1319_v5 = vsub.f32 %v4953_v26, %v5173_v44 }
 0x254   : > { %v3975_v29 = vpop.eup %3974  ;;  %v1372_v24 = vmul.f32 1.442695, %v1319_v5 }
 0x255   : > { %v1448_v41 = vsel %vm1201_vm0, %v3975_v29, 0.0 }
 0x256   : > { %3976 = vpow2.f32 %v1372_v24  ;;  %1449 = vadd.xlane.f32.xlu0 %v1448_v41 }
 0x259   : > { %v5180_v30 = vpop.xlane.xlu1 %1275 }
 0x25a   : > { %6653 = vst [vmem:[#allocation34_spill] sm:$0xff] %v5180_v30  ;;  %v1322_v46 = vsub.f32 %v4989_v2, %v5180_v30  ;;  %v5192_v2 = vpop.xlane.xlu0 %1236 }
 0x25b   : > { %6655 = vst [vmem:[#allocation36_spill] sm:$0xff] %v5192_v2 }
 0x25c   : > { %v3977_v42 = vpop.eup %3976  ;;  %v1378_v60 = vmul.f32 1.442695, %v1322_v46 }
 0x25d   : > { %v1457_v25 = vsel %vm1201_vm0, %v3977_v42, 0.0 }
 0x25e   : > { %3978 = vpow2.f32 %v1378_v60  ;;  %1458 = vadd.xlane.f32.xlu0 %v1457_v25 }
 0x261   : > { %v5187_v26 = vpop.xlane.xlu1 %1284 }
 0x262   : > { %6654 = vst [vmem:[#allocation35_spill] sm:$0xff] %v5187_v26  ;;  %v1325_v5 = vsub.f32 %v5027_v51, %v5187_v26 }
 0x264   : > { %v3979_v24 = vpop.eup %3978  ;;  %v1384_v29 = vmul.f32 1.442695, %v1325_v5 }
 0x265   : > { %v1466_v41 = vsel %vm1201_vm0, %v3979_v24, 0.0 }
 0x266   : > { %3980 = vpow2.f32 %v1384_v29  ;;  %1467 = vadd.xlane.f32.xlu0 %v1466_v41  ;;  %v1303_v29 = vsub.f32 %v4867_v35, %v5177_v59  ;;  %v5203_v41 = vpop.xlane.xlu0 %1245  ;;  %v1306_v35 = vsub.f32 %v4879_v18, %v5184_v33  ;;  %v1309_v18 = vsub.f32 %v4894_v43, %v5192_v2 }
 0x267   : > { %6657 = vst [vmem:[#allocation38_spill] sm:$0xff] %v5203_v41 }
 0x268   : > { %v1193_v46 = vpop.xlane.xlu2 %1192 }
 0x269   : > { %v1194_v44 = vrot.slane %v1193_v46, 4  ;;  %v5194_v30 = vpop.xlane.xlu1 %1293 }
 0x26a   : > { %6656 = vst [vmem:[#allocation37_spill] sm:$0xff] %v5194_v30  ;;  %v1328_v42 = vsub.f32 %v5060_v0, %v5194_v30  ;;  %v1340_v30 = vmul.f32 1.442695, %v1303_v29  ;;  %v1346_v29 = vmul.f32 1.442695, %v1306_v35 }
 0x26b   : > { %v1195_v60 = vadd.f32 %v1194_v44, %v1193_v46 }
 0x26c   : > { %v3981_v25 = vpop.eup %3980  ;;  %v1390_v8 = vmul.f32 1.442695, %v1328_v42 }
 0x26d   : > { %v1475_v51 = vsel %vm1201_vm0, %v3981_v25, 0.0  ;;  %v1196_v26 = vrot.slane %v1195_v60, 2 }
 0x26e   : > { %3982 = vpow2.f32 %v1390_v8  ;;  %1476 = vadd.xlane.f32.xlu0 %v1475_v51 }
 0x26f   : > { %v1197_v5 = vadd.f32 %v1196_v26, %v1195_v60 }
 0x270   : > { %v5199_v24 = vpop.xlane.xlu2 %1209 }
 0x271   : > { %v1300_v63 = vsub.f32 %v5075_v62, %v5199_v24  ;;  %v1198_v0 = vrot.slane %v1197_v5, 1 }
 0x273   : > { %v1334_v44 = vmul.f32 1.442695, %v1300_v63  ;;  %v1199_v46 = vadd.f32 %v1198_v0, %v1197_v5  ;;  %v5214_v63 = vpop.xlane.xlu0 %1254 }
 0x274   : > { %v3983_v42 = vpop.eup %3982  ;;  %6658 = vst [vmem:[#allocation39_spill] sm:$0xff] %v5214_v63 }
 0x275   : > { %3984 = vpow2.f32 %v1334_v44  ;;  %3703 = vpush %v1199_v46  ;;  %v1484_v8 = vsel %vm1201_vm0, %v3983_v42, 0.0 }
 0x276   : > { %1485 = vadd.xlane.f32.xlu0 %v1484_v8  ;;  %3986 = vpow2.f32 %v1340_v30 }
 0x278   : > { %v5208_v26 = vpop.xlane.xlu2 %1215 }
 0x279   : > { %v1302_v60 = vsub.f32 %v5085_v28, %v5208_v26 }
 0x27b   : > { %v3985_v25 = vpop.eup %3984  ;;  %v1338_v51 = vmul.f32 1.442695, %v1302_v60  ;;  %v5225_v60 = vld [vmem:[%s4545_s11] sm:$0x1] }
 0x27c   : > { %v1400_v5 = vsel %vm1201_vm0, %v3985_v25, 0.0  ;;  %v3987_v0 = vpop.eup %3986  ;;  %v373_v35 = vsel %vm6524_vm3, %v5225_v60, 0 }
 0x27d   : > { %3988 = vpow2.f32 %v1338_v51  ;;  %1401 = vadd.xlane.f32.xlu2 %v1400_v5  ;;  %v1409_v46 = vsel %vm1201_vm0, %v3987_v0, 0.0  ;;  %v1352_v51 = vmul.f32 1.442695, %v1309_v18  ;;  %v5231_v5 = vpop.xlane.xlu0 %1263  ;;  %v5233_v43 = vperm.slane %v373_v35, 0 }
 0x27e   : > { %3990 = vpow2.f32 %v1346_v29  ;;  %6659 = vst [vmem:[#allocation40_spill] sm:$0xff] %v5231_v5 }
 0x280   : > { %v5217_v44 = vpop.xlane.xlu2 %1224 }
 0x281   : > { %v1305_v30 = vsub.f32 %v5090_v58, %v5217_v44 }
 0x283   : > { %v3989_v42 = vpop.eup %3988  ;;  %v1344_v8 = vmul.f32 1.442695, %v1305_v30  ;;  %v1312_v30 = vsub.f32 %v4931_v56, %v5203_v41  ;;  %v1315_v56 = vsub.f32 %v4972_v31, %v5214_v63  ;;  %v1318_v31 = vsub.f32 %v5010_v37, %v5231_v5 }
 0x284   : > { %v1406_v25 = vsel %vm1201_vm0, %v3989_v42, 0.0  ;;  %v3991_v29 = vpop.eup %3990 }
 0x285   : > { %3992 = vpow2.f32 %v1344_v8  ;;  %1410 = vadd.xlane.f32.xlu2 %v1409_v46  ;;  %1407 = vadd.xlane.f32.xlu1 %v1406_v25  ;;  %v1418_v18 = vsel %vm1201_vm0, %v3991_v29, 0.0  ;;  %v1358_v35 = vmul.f32 1.442695, %v1312_v30 }
 0x286   : > { %3994 = vpow2.f32 %v1352_v51  ;;  %v5244_v51 = vpop.xlane.xlu0 %1272 }
 0x287   : > { %6661 = vst [vmem:[#allocation42_spill] sm:$0xff] %v5244_v51 }
 0x288   : > { %v5235_v0 = vpop.xlane.xlu2 %1233 }
 0x289   : > { %6660 = vst [vmem:[#allocation41_spill] sm:$0xff] %v5235_v0  ;;  %v1308_v49 = vsub.f32 %v5099_v21, %v5235_v0 }
 0x28a   : > { %1639 = vperm.xlu0 %3862, %v5233_v43  }
 0x28b   : > { %v3993_v42 = vpop.eup %3992  ;;  %v1350_v8 = vmul.f32 1.442695, %v1308_v49 }
 0x28c   : > { %v1415_v46 = vsel %vm1201_vm0, %v3993_v42, 0.0  ;;  %v3995_v25 = vpop.eup %3994 }
 0x28d   : > { %3996 = vpow2.f32 %v1350_v8  ;;  %1419 = vadd.xlane.f32.xlu2 %v1418_v18  ;;  %1416 = vadd.xlane.f32.xlu1 %v1415_v46  ;;  %v1427_v49 = vsel %vm1201_vm0, %v3995_v25, 0.0  ;;  %v1364_v8 = vmul.f32 1.442695, %v1315_v56 }
 0x28e   : > { %3998 = vpow2.f32 %v1358_v35  ;;  %v5259_v63 = vpop.xlane.xlu0 %1281 }
 0x28f   : > { %6664 = vst [vmem:[#allocation45_spill] sm:$0xff] %v5259_v63 }
 0x290   : > { %v5246_v55 = vpop.xlane.xlu2 %1242 }
 0x291   : > { %6662 = vst [vmem:[#allocation43_spill] sm:$0xff] %v5246_v55  ;;  %v1311_v29 = vsub.f32 %v5105_v10, %v5246_v55 }
 0x292   : > { %3867 = vset.pattern.permute.xlu0 %v4640_v19 }
 0x293   : > { %v3997_v30 = vpop.eup %3996  ;;  %v1356_v42 = vmul.f32 1.442695, %v1311_v29 }
 0x294   : > { %v1424_v18 = vsel %vm1201_vm0, %v3997_v30, 0.0  ;;  %v3999_v46 = vpop.eup %3998 }
 0x295   : > { %4000 = vpow2.f32 %v1356_v42  ;;  %1428 = vadd.xlane.f32.xlu2 %v1427_v49  ;;  %1425 = vadd.xlane.f32.xlu1 %v1424_v18  ;;  %v1436_v29 = vsel %vm1201_vm0, %v3999_v46, 0.0  ;;  %v1370_v42 = vmul.f32 1.442695, %v1318_v31 }
 0x296   : > { %4002 = vpow2.f32 %v1364_v8  ;;  %v1321_v8 = vsub.f32 %v5046_v54, %v5244_v51 }
 0x298   : > { %v5255_v35 = vpop.xlane.xlu2 %1251 }
 0x299   : > { %6663 = vst [vmem:[#allocation44_spill] sm:$0xff] %v5255_v35  ;;  %v1314_v25 = vsub.f32 %v5114_v16, %v5255_v35 }
 0x29a   : > { %1669 = vperm.xlu0 %3867, %v5233_v43  }
 0x29b   : > { %v4001_v56 = vpop.eup %4000  ;;  %v1362_v30 = vmul.f32 1.442695, %v1314_v25 }
 0x29c   : > { %v1433_v49 = vsel %vm1201_vm0, %v4001_v56, 0.0  ;;  %v4003_v18 = vpop.eup %4002  ;;  %v5274_v56 = vpop.xlane.xlu0 %1290 }
 0x29d   : > { %4004 = vpow2.f32 %v1362_v30  ;;  %1437 = vadd.xlane.f32.xlu2 %v1436_v29  ;;  %1434 = vadd.xlane.f32.xlu1 %v1433_v49  ;;  %v1445_v46 = vsel %vm1201_vm0, %v4003_v18, 0.0  ;;  %6666 = vst [vmem:[#allocation47_spill] sm:$0xff] %v5274_v56  ;;  %v4089_v29 = vld [vmem:[%s4545_s11 + $0x1] sm:$0x1]  ;;  %v1324_v18 = vsub.f32 %v5070_v61, %v5259_v63  ;;  %v1327_v61 = vsub.f32 %v5080_v9, %v5274_v56 }
 0x29e   : > { %4006 = vpow2.f32 %v1370_v42  ;;  %v375_v30 = vsel %vm6520_vm4, %v4089_v29, 0  ;;  %v1376_v42 = vmul.f32 1.442695, %v1321_v8 }
 0x29f   : > { %v5280_v54 = vperm.slane %v375_v30, 0  ;;  %v1382_v29 = vmul.f32 1.442695, %v1324_v18 }
 0x2a0   : > { %v5266_v37 = vpop.xlane.xlu2 %1260 }
 0x2a1   : > { %6665 = vst [vmem:[#allocation46_spill] sm:$0xff] %v5266_v37  ;;  %v1317_v35 = vsub.f32 %v5124_v38, %v5266_v37 }
 0x2a2   : > { %3872 = vset.pattern.permute.xlu0 %v4604_v7 }
 0x2a3   : > { %v4005_v25 = vpop.eup %4004  ;;  %v1368_v31 = vmul.f32 1.442695, %v1317_v35 }
 0x2a4   : > { %v1442_v49 = vsel %vm1201_vm0, %v4005_v25, 0.0  ;;  %v4007_v51 = vpop.eup %4006  ;;  %v5291_v30 = vpop.xlane.xlu0 %1395 }
 0x2a5   : > { %4008 = vpow2.f32 %v1368_v31  ;;  %1446 = vadd.xlane.f32.xlu2 %v1445_v46  ;;  %1443 = vadd.xlane.f32.xlu1 %v1442_v49  ;;  %v1454_v25 = vsel %vm1201_vm0, %v4007_v51, 0.0 }
 0x2a6   : > { %4010 = vpow2.f32 %v1376_v42  ;;  %s5997_s20 = spop %3703 }
 0x2a8   : > { %v5282_v37 = vpop.xlane.xlu2 %1269 }
 0x2a9   : > { %6667 = vst [vmem:[#allocation48_spill] sm:$0xff] %v5282_v37  ;;  %v1320_v35 = vsub.f32 %v5134_v4, %v5282_v37 }
 0x2aa   : > { %1700 = vperm.xlu0 %3872, %v5280_v54  }
 0x2ab   : > { %v4009_v8 = vpop.eup %4008  ;;  %v1374_v31 = vmul.f32 1.442695, %v1320_v35 }
 0x2ac   : > { %v1451_v46 = vsel %vm1201_vm0, %v4009_v8, 0.0  ;;  %v4011_v49 = vpop.eup %4010 }
 0x2ad   : > { %4012 = vpow2.f32 %v1374_v31  ;;  %1455 = vadd.xlane.f32.xlu2 %v1454_v25  ;;  %1452 = vadd.xlane.f32.xlu1 %v1451_v46  ;;  %v1463_v35 = vsel %vm1201_vm0, %v4011_v49, 0.0  ;;  %v1388_v25 = vmul.f32 1.442695, %v1327_v61 }
 0x2ae   : > { %4014 = vpow2.f32 %v1382_v29  ;;  %v5302_v29 = vpop.xlane.xlu0 %1404 }
 0x2b0   : > { %v5293_v42 = vpop.xlane.xlu2 %1278 }
 0x2b1   : > { %6668 = vst [vmem:[#allocation49_spill] sm:$0xff] %v5293_v42  ;;  %v1323_v51 = vsub.f32 %v5144_v47, %v5293_v42 }
 0x2b2   : > { %3877 = vset.pattern.permute.xlu0 %v4650_v23 }
 0x2b3   : > { %v4013_v18 = vpop.eup %4012  ;;  %v1380_v8 = vmul.f32 1.442695, %v1323_v51 }
 0x2b4   : > { %v1460_v31 = vsel %vm1201_vm0, %v4013_v18, 0.0  ;;  %v4015_v46 = vpop.eup %4014 }
 0x2b5   : > { %4016 = vpow2.f32 %v1380_v8  ;;  %1464 = vadd.xlane.f32.xlu2 %v1463_v35  ;;  %1461 = vadd.xlane.f32.xlu1 %v1460_v31  ;;  %v1472_v49 = vsel %vm1201_vm0, %v4015_v46, 0.0 }
 0x2b6   : > { %4018 = vpow2.f32 %v1388_v25  ;;  %v5313_v8 = vpop.xlane.xlu0 %1413 }
 0x2b7   : > { %6671 = vst [vmem:[#allocation52_spill] sm:$0xff] %v5313_v8 }
 0x2b8   : > { %v5304_v57 = vpop.xlane.xlu2 %1287 }
 0x2b9   : > { %6669 = vst [vmem:[#allocation50_spill] sm:$0xff] %v5304_v57  ;;  %v1326_v9 = vsub.f32 %v5154_v20, %v5304_v57 }
 0x2ba   : > { %1730 = vperm.xlu0 %3877, %v5280_v54  }
 0x2bb   : > { %v4017_v51 = vpop.eup %4016  ;;  %v1386_v56 = vmul.f32 1.442695, %v1326_v9 }
 0x2bc   : > { %v1469_v61 = vsel %vm1201_vm0, %v4017_v51, 0.0  ;;  %v4019_v35 = vpop.eup %4018 }
 0x2bd   : > { %4020 = vpow2.f32 %v1386_v56  ;;  %1473 = vadd.xlane.f32.xlu2 %v1472_v49  ;;  %1470 = vadd.xlane.f32.xlu1 %v1469_v61  ;;  %v1481_v25 = vsel %vm1201_vm0, %v4019_v35, 0.0 }
 0x2be   : > { %v5321_v49 = vpop.xlane.xlu0 %1422 }
 0x2bf   : > { %6672 = vst [vmem:[#allocation53_spill] sm:$0xff] %v5321_v49 }
 0x2c0   : > { %v5311_v18 = vpop.xlane.xlu2 %1296 }
 0x2c1   : > { %6670 = vst [vmem:[#allocation51_spill] sm:$0xff] %v5311_v18  ;;  %v1329_v31 = vsub.f32 %v5164_v45, %v5311_v18 }
 0x2c2   : > { %3882 = vset.pattern.permute.xlu0 %v4693_v39 }
 0x2c3   : > { %v4021_v46 = vpop.eup %4020  ;;  %v1392_v63 = vmul.f32 1.442695, %v1329_v31 }
 0x2c4   : > { %v1478_v9 = vsel %vm1201_vm0, %v4021_v46, 0.0  ;;  %v5342_v46 = vpop.xlane.xlu1 %1398 }
 0x2c5   : > { %4022 = vpow2.f32 %v1392_v63  ;;  %1482 = vadd.xlane.f32.xlu2 %v1481_v25  ;;  %1479 = vadd.xlane.f32.xlu1 %v1478_v9 }
 0x2c6   : > { %v5325_v61 = vpop.xlane.xlu0 %1431  ;;  %4024 = vlog2.f32 %v5291_v30 }
 0x2c7   : > { %6673 = vst [vmem:[#allocation54_spill] sm:$0xff] %v5325_v61  ;;  %4026 = vlog2.f32 %v5302_v29 }
 0x2c8   : > { %4028 = vlog2.f32 %v5342_v46 }
 0x2ca   : > { %1760 = vperm.xlu0 %3882, %v5280_v54  }
 0x2cb   : > { %v4023_v56 = vpop.eup %4022 }
 0x2cc   : > { %v1487_v51 = vsel %vm1201_vm0, %v4023_v56, 0.0 }
 0x2cd   : > { %1488 = vadd.xlane.f32.xlu1 %v1487_v51 }
 0x2ce   : > { %v5329_v35 = vpop.xlane.xlu0 %1440 }
 0x2cf   : > { %6674 = vst [vmem:[#allocation55_spill] sm:$0xff] %v5329_v35 }
 0x2d2   : > { %3883 = vset.pattern.permute.xlu0 %v4599_v6 }
 0x2d6   : > { %v5333_v63 = vpop.xlane.xlu0 %1449 }
 0x2d7   : > { %6675 = vst [vmem:[#allocation56_spill] sm:$0xff] %v5333_v63 }
 0x2da   : > { %1597 = vperm.xlu0 %3883, %v5233_v43  }
 0x2dd   : > { %1591 = vperm.xlu2 %3855, %v5233_v43  }
 0x2de   : > { %v5339_v25 = vpop.xlane.xlu0 %1458 }
 0x2df   : > { %6676 = vst [vmem:[#allocation57_spill] sm:$0xff] %v5339_v25 }
 0x2e5   : > { %3857 = vset.pattern.permute.xlu2 %v4613_v11 }
 0x2e6   : > { %1603 = vperm.xlu1 %3856, %v5233_v43   ;;  %v5347_v56 = vpop.xlane.xlu0 %1467 }
 0x2e7   : > { %6677 = vst [vmem:[#allocation58_spill] sm:$0xff] %v5347_v56 }
 0x2ed   : > { %1609 = vperm.xlu2 %3857, %v5233_v43  }
 0x2ee   : > { %3858 = vset.pattern.permute.xlu1 %v4632_v17  ;;  %v5357_v25 = vpop.xlane.xlu0 %1476 }
 0x2ef   : > { %6678 = vst [vmem:[#allocation59_spill] sm:$0xff] %v5357_v25 }
 0x2f0   : > { %v5337_v31 = vpop.xlane.xlu2 %1401 }
 0x2f5   : > { %3859 = vset.pattern.permute.xlu2 %v4623_v13 }
 0x2f6   : > { %1615 = vperm.xlu1 %3858, %v5233_v43   ;;  %v5367_v56 = vpop.xlane.xlu0 %1485 }
 0x2f7   : > { %6681 = vst [vmem:[#allocation62_spill] sm:$0xff] %v5367_v56 }
 0x2f8   : > { %v5345_v9 = vpop.xlane.xlu2 %1410  ;;  %v5350_v51 = vpop.xlane.xlu1 %1407 }
 0x2f9   : > { %4030 = vlog2.f32 %v5345_v9 }
 0x2fa   : > { %4032 = vlog2.f32 %v5337_v31 }
 0x2fd   : > { %1621 = vperm.xlu2 %3859, %v5233_v43  }
 0x2fe   : > { %3860 = vset.pattern.permute.xlu1 %v4659_v27  ;;  %v5375_v25 = vpop.permute.xlu0 %1639 }
 0x300   : > { %v5353_v18 = vpop.xlane.xlu2 %1419  ;;  %v5359_v57 = vpop.xlane.xlu1 %1416 }
 0x301   : > { %4034 = vlog2.f32 %v5353_v18 }
 0x302   : > { %4036 = vlog2.f32 %v5359_v57 }
 0x303   : > { %4038 = vlog2.f32 %v5350_v51 }
 0x305   : > { %3861 = vset.pattern.permute.xlu2 %v4650_v23 }
 0x306   : > { %1627 = vperm.xlu1 %3860, %v5233_v43  }
 0x308   : > { %v5361_v42 = vpop.xlane.xlu2 %1428  ;;  %v5369_v37 = vpop.xlane.xlu1 %1425 }
 0x309   : > { %6679 = vst [vmem:[#allocation60_spill] sm:$0xff] %v5361_v42  ;;  %v6688_v42 = vld [vmem:[#allocation12_spill] sm:$0xff]  ;;  %4040 = vlog2.f32 %v5369_v37 }
 0x30d   : > { %1633 = vperm.xlu2 %3861, %v5233_v43  }
 0x30e   : > { %3863 = vset.pattern.permute.xlu1 %v4680_v34 }
 0x310   : > { %v5365_v63 = vpop.xlane.xlu2 %1437  ;;  %v5377_v41 = vpop.xlane.xlu1 %1434 }
 0x311   : > { %6680 = vst [vmem:[#allocation61_spill] sm:$0xff] %v5365_v63  ;;  %v5383_v63 = vpop.permute.xlu0 %1669 }
 0x312   : > { %6683 = vst [vmem:[#allocation64_spill] sm:$0xff] %v5377_v41 }
 0x315   : > { %3864 = vset.pattern.permute.xlu2 %v4673_v32 }
 0x316   : > { %1645 = vperm.xlu1 %3863, %v5233_v43  }
 0x318   : > { %v5373_v5 = vpop.xlane.xlu2 %1446  ;;  %v5386_v56 = vpop.xlane.xlu1 %1443 }
 0x319   : > { %6682 = vst [vmem:[#allocation63_spill] sm:$0xff] %v5373_v5 }
 0x31a   : > { %6685 = vst [vmem:[#allocation66_spill] sm:$0xff] %v5386_v56 }
 0x31c   : > { %v5393_v5 = vpop.permute.xlu0 %1700 }
 0x31d   : > { %1651 = vperm.xlu2 %3864, %v5233_v43  }
 0x31e   : > { %3865 = vset.pattern.permute.xlu1 %v4702_v40 }
 0x320   : > { %v5381_v36 = vpop.xlane.xlu2 %1455  ;;  %v5395_v52 = vpop.xlane.xlu1 %1452 }
 0x321   : > { %6684 = vst [vmem:[#allocation65_spill] sm:$0xff] %v5381_v36 }
 0x322   : > { %6687 = vst [vmem:[#allocation68_spill] sm:$0xff] %v5395_v52 }
 0x325   : > { %3866 = vset.pattern.permute.xlu2 %v4693_v39 }
 0x326   : > { %1657 = vperm.xlu1 %3865, %v5233_v43  }
 0x328   : > { %v5389_v2 = vpop.xlane.xlu2 %1464  ;;  %v5403_v56 = vpop.xlane.xlu1 %1461 }
 0x329   : > { %6686 = vst [vmem:[#allocation67_spill] sm:$0xff] %v5389_v2 }
 0x32a   : > { %6690 = vst [vmem:[#allocation69_spill] sm:$0xff] %v5403_v56  ;;  %v6694_v56 = vmov 0.0  }
 0x32c   : > { %v5401_v35 = vpop.permute.xlu0 %1730 }
 0x32d   : > { %1663 = vperm.xlu2 %3866, %v5233_v43  }
 0x32e   : > { %3868 = vset.pattern.permute.xlu1 %v4723_v48 }
 0x330   : > { %v5399_v36 = vpop.xlane.xlu2 %1473  ;;  %v5411_v52 = vpop.xlane.xlu1 %1470 }
 0x331   : > { %6689 = vst [vmem:[#allocation12_spill] sm:$0xff] %v5399_v36 }
 0x332   : > { %6692 = vst [vmem:[#allocation71_spill] sm:$0xff] %v5411_v52 }
 0x335   : > { %3869 = vset.pattern.permute.xlu2 %v6688_v42 }
 0x336   : > { %1675 = vperm.xlu1 %3868, %v5233_v43  }
 0x338   : > { %v5407_v2 = vpop.xlane.xlu2 %1482 }
 0x339   : > { %6691 = vst [vmem:[#allocation70_spill] sm:$0xff] %v5407_v2  ;;  %v4090_v2 = vld [vmem:[%s4815_s14 + $0x8] sm:$0xff] }
 0x33c   : > { %v5409_v1 = vpop.permute.xlu0 %1760 }
 0x33d   : > { %1681 = vperm.xlu2 %3869, %v5233_v43   ;;  %v5419_v43 = vpop.xlane.xlu1 %1479 }
 0x33e   : > { %3870 = vset.pattern.permute.xlu1 %v4581_v3  ;;  %6693 = vst [vmem:[#allocation72_spill] sm:$0xff] %v5419_v43 }
 0x340   : > { %v5415_v36 = vpop.permute.xlu2 %1591 }
 0x345   : > { %3871 = vset.pattern.permute.xlu2 %v4599_v6 }
 0x346   : > { %1688 = vperm.xlu1 %3870, %v5280_v54  }
 0x348   : > { %v5425_v6 = vpop.permute.xlu2 %1609 }
 0x349   : > { %vm1783_vm3 = vcmp.eq.s32.totalorder %v4891_v15, %v5425_v6 }
 0x34c   : > { %v1598_v61 = vpop.permute.xlu0 %1597 }
 0x34d   : > { %vm1781_vm15 = vcmp.eq.s32.totalorder %v4891_v15, %v1598_v61  ;;  %1694 = vperm.xlu2 %3871, %v5280_v54   ;;  %v5429_v61 = vpop.xlane.xlu1 %1488 }
 0x34e   : > { %v3663_v55 = vsel %vm1781_vm15, 1.0, %v6694_v56  ;;  %3873 = vset.pattern.permute.xlu1 %v4613_v11  ;;  %6695 = vst [vmem:[#allocation73_spill] sm:$0xff] %v5429_v61 }
 0x34f   : > { %v1877_v49 = vmul.f32 %v4090_v2, %v3663_v55 }
 0x351   : > { %v1911_v52 = vsel %vm1201_vm0, %v1877_v49, 0.0 }
 0x352   : > { %1912 = vadd.xlane.f32.xlu0 %v1911_v52 }
 0x355   : > { %3874 = vset.pattern.permute.xlu2 %v4632_v17 }
 0x356   : > { %1706 = vperm.xlu1 %3873, %v5280_v54  }
 0x357   : > { %v5432_v43 = vpop.permute.xlu2 %1621 }
 0x358   : > { %v5435_v14 = vpop.permute.xlu1 %1603 }
 0x35d   : > { %1712 = vperm.xlu2 %3874, %v5280_v54  }
 0x35e   : > { %3875 = vset.pattern.permute.xlu1 %v4623_v13 }
 0x365   : > { %3876 = vset.pattern.permute.xlu2 %v4659_v27 }
 0x366   : > { %1718 = vperm.xlu1 %3875, %v5280_v54  }
 0x367   : > { %v1634_v55 = vpop.permute.xlu2 %1633 }
 0x368   : > { %v1616_v52 = vpop.permute.xlu1 %1615  ;;  %vm1787_vm4 = vcmp.eq.s32.totalorder %v4891_v15, %v1634_v55 }
 0x369   : > { %vm1784_vm15 = vcmp.eq.s32.totalorder %v4891_v15, %v1616_v52  ;;  %v3669_v61 = vsel %vm1787_vm4, 1.0, %v6694_v56  ;;  %vm1793_vm4 = vcmp.eq.s32.totalorder %v4891_v15, %v5383_v63 }
 0x36a   : > { %v3666_v2 = vsel %vm1784_vm15, 1.0, %v6694_v56  ;;  %v1883_v41 = vmul.f32 %v3669_v61, %v5090_v58 }
 0x36b   : > { %v1880_v49 = vmul.f32 %v3666_v2, %v5085_v28 }
 0x36c   : > { %v1929_v8 = vsel %vm1201_vm0, %v1883_v41, 0.0 }
 0x36d   : > { %1724 = vperm.xlu2 %3876, %v5280_v54   ;;  %v1920_v0 = vsel %vm1201_vm0, %v1880_v49, 0.0 }
 0x36e   : > { %3878 = vset.pattern.permute.xlu1 %v4619_v12  ;;  %1921 = vadd.xlane.f32.xlu0 %v1920_v0  ;;  %v3675_v0 = vsel %vm1793_vm4, 1.0, %v6694_v56  ;;  %vm1780_vm4 = vcmp.eq.s32.totalorder %v4891_v15, %v5415_v36 }
 0x36f   : > { %v1889_v41 = vmul.f32 %v3675_v0, %v5105_v10 }
 0x375   : > { %3879 = vset.pattern.permute.xlu2 %v4680_v34 }
 0x376   : > { %1736 = vperm.xlu1 %3878, %v5280_v54   ;;  %1930 = vadd.xlane.f32.xlu0 %v1929_v8  ;;  %v1947_v8 = vsel %vm1201_vm0, %v1889_v41, 0.0  ;;  %v3662_v41 = vsel %vm1780_vm4, 1.0, %v6694_v56 }
 0x377   : > { %v1652_v55 = vpop.permute.xlu2 %1651 }
 0x378   : > { %vm1790_vm15 = vcmp.eq.s32.totalorder %v4891_v15, %v1652_v55 }
 0x379   : > { %v3672_v28 = vsel %vm1790_vm15, 1.0, %v6694_v56 }
 0x37a   : > { %v1886_v52 = vmul.f32 %v3672_v28, %v5099_v21  ;;  %v1628_v21 = vpop.permute.xlu1 %1627 }
 0x37b   : > { %vm1786_vm14 = vcmp.eq.s32.totalorder %v4891_v15, %v1628_v21 }
 0x37c   : > { %v1938_v58 = vsel %vm1201_vm0, %v1886_v52, 0.0 }
 0x37d   : > { %1742 = vperm.xlu2 %3879, %v5280_v54  }
 0x37e   : > { %3880 = vset.pattern.permute.xlu1 %v4673_v32  ;;  %1939 = vadd.xlane.f32.xlu0 %v1938_v58 }
 0x385   : > { %3881 = vset.pattern.permute.xlu2 %v4702_v40 }
 0x386   : > { %1748 = vperm.xlu1 %3880, %v5280_v54   ;;  %1948 = vadd.xlane.f32.xlu0 %v1947_v8  ;;  %v4091_v8 = vld [vmem:[%s4815_s14] sm:$0xff] }
 0x387   : > { %v5470_v10 = vpop.permute.xlu2 %1663 }
 0x388   : > { %v1646_v63 = vpop.permute.xlu1 %1645 }
 0x38d   : > { %1754 = vperm.xlu2 %3881, %v5280_v54  }
 0x38e   : > { %3884 = vset.pattern.permute.xlu1 %v4640_v19 }
 0x395   : > { %3885 = vset.pattern.permute.xlu2 %v4723_v48 }
 0x396   : > { %1766 = vperm.xlu1 %3884, %v5280_v54  }
 0x397   : > { %v5476_v2 = vpop.permute.xlu2 %1681 }
 0x398   : > { %v5474_v61 = vpop.permute.xlu1 %1657 }
 0x39d   : > { %1772 = vperm.xlu2 %3885, %v5280_v54  }
 0x39e   : > { %3886 = vset.pattern.permute.xlu1 %v6688_v42 }
 0x3a5   : > { %3887 = vset.pattern.permute.xlu2 %v4581_v3 }
 0x3a6   : > { %1778 = vperm.xlu1 %3886, %v5280_v54  }
 0x3a7   : > { %v5481_v55 = vpop.permute.xlu2 %1694 }
 0x3a8   : > { %v5479_v49 = vpop.permute.xlu1 %1675 }
 0x3ae   : > { %3888 = vset.pattern.permute.xlu1 %v4604_v7  ;;  %v1876_v7 = vmul.f32 %v4091_v8, %v3662_v41 }
 0x3b0   : > { %v1908_v36 = vsel %vm1201_vm0, %v1876_v7, 0.0 }
 0x3b7   : > { %v5489_v58 = vpop.permute.xlu2 %1712 }
 0x3b8   : > { %v1689_v28 = vpop.permute.xlu1 %1688 }
 0x3b9   : > { %vm1796_vm15 = vcmp.eq.s32.totalorder %v4891_v15, %v1689_v28 }
 0x3ba   : > { %v3678_v52 = vsel %vm1796_vm15, 1.0, %v6694_v56  ;;  %vm1782_vm15 = vcmp.eq.s32.totalorder %v4891_v15, %v5435_v14 }
 0x3bb   : > { %v1892_v54 = vmul.f32 %v3678_v52, %v5114_v16  ;;  %v3665_v16 = vsel %vm1783_vm3, 1.0, %v6694_v56  ;;  %v3664_v52 = vsel %vm1782_vm15, 1.0, %v6694_v56  ;;  %vm1785_vm3 = vcmp.eq.s32.totalorder %v4891_v15, %v5432_v43  ;;  %v4094_v43 = vld [vmem:[%s4815_s14 + $0x28] sm:$0xff] }
 0x3bc   : > { %v1878_v14 = vmul.f32 %v3664_v52, %v5075_v62  ;;  %v3667_v62 = vsel %vm1785_vm3, 1.0, %v6694_v56  ;;  %vm1792_vm3 = vcmp.eq.s32.totalorder %v4891_v15, %v5470_v10 }
 0x3bd   : > { %v1956_v0 = vsel %vm1201_vm0, %v1892_v54, 0.0 }
 0x3be   : > { %1957 = vadd.xlane.f32.xlu0 %v1956_v0  ;;  %v4092_v0 = vld [vmem:[%s4815_s14 + $0x18] sm:$0xff]  ;;  %v1914_v21 = vsel %vm1201_vm0, %v1878_v14, 0.0  ;;  %v4095_v14 = vld [vmem:[%s4815_s14 + $0x48] sm:$0xff] }
 0x3bf   : > { %v1879_v3 = vmul.f32 %v4092_v0, %v3665_v16  ;;  %v3668_v16 = vsel %vm1786_vm14, 1.0, %v6694_v56  ;;  %vm1788_vm14 = vcmp.eq.s32.totalorder %v4891_v15, %v5375_v25 }
 0x3c1   : > { %v1917_v8 = vsel %vm1201_vm0, %v1879_v3, 0.0 }
 0x3c6   : > { %1909 = vadd.xlane.f32.xlu2 %v1908_v36 }
 0x3c7   : > { %v1725_v28 = vpop.permute.xlu2 %1724 }
 0x3c8   : > { %v1707_v54 = vpop.permute.xlu1 %1706  ;;  %vm1802_vm1 = vcmp.eq.s32.totalorder %v4891_v15, %v1725_v28  ;;  %v4093_v28 = vld [vmem:[%s4815_s14 + $0x30] sm:$0xff] }
 0x3c9   : > { %vm1799_vm4 = vcmp.eq.s32.totalorder %v4891_v15, %v1707_v54  ;;  %v3684_v41 = vsel %vm1802_vm1, 1.0, %v6694_v56  ;;  %v1882_v52 = vmul.f32 %v4093_v28, %v3668_v16  ;;  %vm1789_vm1 = vcmp.eq.s32.totalorder %v4891_v15, %v1646_v63 }
 0x3ca   : > { %v3681_v6 = vsel %vm1799_vm4, 1.0, %v6694_v56  ;;  %v1881_v54 = vmul.f32 %v4094_v43, %v3667_v62  ;;  %v3670_v63 = vsel %vm1788_vm14, 1.0, %v6694_v56  ;;  %vm1808_vm4 = vcmp.eq.s32.totalorder %v4891_v15, %v5409_v1  ;;  %v4098_v43 = vld [vmem:[%s4815_s14 + $0x58] sm:$0xff] }
 0x3cb   : > { %v1895_v7 = vmul.f32 %v3681_v6, %v5124_v38  ;;  %v1898_v38 = vmul.f32 %v3684_v41, %v5134_v4  ;;  %v1926_v0 = vsel %vm1201_vm0, %v1882_v52, 0.0  ;;  %v3671_v4 = vsel %vm1789_vm1, 1.0, %v6694_v56  ;;  %v4097_v52 = vld [vmem:[%s4815_s14 + $0x60] sm:$0xff] }
 0x3cc   : > { %v1885_v41 = vmul.f32 %v4095_v14, %v3671_v4  ;;  %vm1791_vm1 = vcmp.eq.s32.totalorder %v4891_v15, %v5474_v61  ;;  %v3674_v62 = vsel %vm1792_vm3, 1.0, %v6694_v56  ;;  %vm1795_vm14 = vcmp.eq.s32.totalorder %v4891_v15, %v5476_v2  ;;  %v4099_v2 = vld [vmem:[%s4815_s14 + $0x78] sm:$0xff] }
 0x3cd   : > { %v1965_v36 = vsel %vm1201_vm0, %v1895_v7, 0.0  ;;  %v1974_v3 = vsel %vm1201_vm0, %v1898_v38, 0.0  ;;  %v1923_v7 = vsel %vm1201_vm0, %v1881_v54, 0.0  ;;  %v3673_v28 = vsel %vm1791_vm1, 1.0, %v6694_v56 }
 0x3ce   : > { %1918 = vadd.xlane.f32.xlu2 %v1917_v8  ;;  %1966 = vadd.xlane.f32.xlu0 %v1965_v36  ;;  %v4096_v36 = vld [vmem:[%s4815_s14 + $0x40] sm:$0xff]  ;;  %v1935_v1 = vsel %vm1201_vm0, %v1885_v41, 0.0  ;;  %v1887_v54 = vmul.f32 %v4098_v43, %v3673_v28  ;;  %vm1797_vm3 = vcmp.eq.s32.totalorder %v4891_v15, %v5481_v55  ;;  %v4103_v28 = vld [vmem:[%s4815_s14 + $0xa8] sm:$0xff] }
 0x3cf   : > { %v1884_v16 = vmul.f32 %v4096_v36, %v3670_v63  ;;  %v4100_v63 = vld [vmem:[%s4815_s14 + $0x70] sm:$0xff] }
 0x3d0   : > { %1915 = vadd.xlane.f32.xlu1 %v1914_v21  ;;  %v3690_v21 = vsel %vm1808_vm4, 1.0, %v6694_v56  ;;  %v1941_v4 = vsel %vm1201_vm0, %v1887_v54, 0.0  ;;  %vm1798_vm4 = vcmp.eq.s32.totalorder %v4891_v15, %v5393_v5 }
 0x3d1   : > { %v1904_v10 = vmul.f32 %v3690_v21, %v5154_v20  ;;  %v3677_v20 = vsel %vm1795_vm14, 1.0, %v6694_v56  ;;  %v3680_v14 = vsel %vm1798_vm4, 1.0, %v6694_v56  ;;  %v4102_v21 = vld [vmem:[%s4815_s14 + $0x88] sm:$0xff]  ;;  %vm1800_vm14 = vcmp.eq.s32.totalorder %v4891_v15, %v5489_v58 }
 0x3d2   : > { %vm1803_vm4 = vcmp.eq.s32.totalorder %v4891_v15, %v5401_v35 }
 0x3d3   : > { %v1992_v61 = vsel %vm1201_vm0, %v1904_v10, 0.0 }
 0x3d6   : > { %1927 = vadd.xlane.f32.xlu2 %v1926_v0  ;;  %1975 = vadd.xlane.f32.xlu0 %v1974_v3  ;;  %v1888_v3 = vmul.f32 %v4097_v52, %v3674_v62 }
 0x3d7   : > { %v1743_v6 = vpop.permute.xlu2 %1742 }
 0x3d8   : > { %vm1805_vm15 = vcmp.eq.s32.totalorder %v4891_v15, %v1743_v6  ;;  %1924 = vadd.xlane.f32.xlu1 %v1923_v7  ;;  %v1944_v0 = vsel %vm1201_vm0, %v1888_v3, 0.0  ;;  %v1891_v7 = vmul.f32 %v4099_v2, %v3677_v20  ;;  %v1719_v36 = vpop.permute.xlu1 %1718  ;;  %v4104_v3 = vld [vmem:[%s4815_s14 + $0xa0] sm:$0xff]  ;;  %v3685_v20 = vsel %vm1803_vm4, 1.0, %v6694_v56 }
 0x3d9   : > { %v3687_v25 = vsel %vm1805_vm15, 1.0, %v6694_v56  ;;  %vm1794_vm15 = vcmp.eq.s32.totalorder %v4891_v15, %v5479_v49  ;;  %vm1801_vm1 = vcmp.eq.s32.totalorder %v4891_v15, %v1719_v36 }
 0x3da   : > { %v1901_v8 = vmul.f32 %v3687_v25, %v5144_v47  ;;  %v1932_v47 = vsel %vm1201_vm0, %v1884_v16, 0.0  ;;  %v3676_v6 = vsel %vm1794_vm15, 1.0, %v6694_v56  ;;  %v1953_v25 = vsel %vm1201_vm0, %v1891_v7, 0.0  ;;  %v4101_v16 = vld [vmem:[%s4815_s14 + $0x90] sm:$0xff]  ;;  %v4106_v7 = vld [vmem:[%s4815_s14 + $0xb8] sm:$0xff] }
 0x3db   : > { %v1890_v49 = vmul.f32 %v4100_v63, %v3676_v6  ;;  %v1894_v5 = vmul.f32 %v4101_v16, %v3680_v14  ;;  %v1899_v63 = vmul.f32 %v4106_v7, %v3685_v20 }
 0x3dc   : > { %v1983_v38 = vsel %vm1201_vm0, %v1901_v8, 0.0  ;;  %v3679_v8 = vsel %vm1797_vm3, 1.0, %v6694_v56 }
 0x3dd   : > { %v1950_v41 = vsel %vm1201_vm0, %v1890_v49, 0.0  ;;  %v1962_v55 = vsel %vm1201_vm0, %v1894_v5, 0.0  ;;  %v1977_v14 = vsel %vm1201_vm0, %v1899_v63, 0.0 }
 0x3de   : > { %1936 = vadd.xlane.f32.xlu2 %v1935_v1  ;;  %1984 = vadd.xlane.f32.xlu0 %v1983_v38  ;;  %v1893_v38 = vmul.f32 %v4102_v21, %v3679_v8  ;;  %v3683_v1 = vsel %vm1801_vm1, 1.0, %v6694_v56  ;;  %v4108_v21 = vld [vmem:[%s4815_s14 + $0xd0] sm:$0xff] }
 0x3df   : > { %v1897_v52 = vmul.f32 %v4103_v28, %v3683_v1 }
 0x3e0   : > { %1933 = vadd.xlane.f32.xlu1 %v1932_v47  ;;  %v1959_v62 = vsel %vm1201_vm0, %v1893_v38, 0.0  ;;  %v3682_v47 = vsel %vm1800_vm14, 1.0, %v6694_v56 }
 0x3e1   : > { %v1971_v43 = vsel %vm1201_vm0, %v1897_v52, 0.0  ;;  %v4110_v52 = vld [vmem:[%s4815_s14 + $0xe8] sm:$0xff] }
 0x3e6   : > { %1945 = vadd.xlane.f32.xlu2 %v1944_v0  ;;  %1993 = vadd.xlane.f32.xlu0 %v1992_v61  ;;  %v1896_v61 = vmul.f32 %v4104_v3, %v3682_v47 }
 0x3e7   : > { %v1755_v58 = vpop.permute.xlu2 %1754 }
 0x3e8   : > { %1942 = vadd.xlane.f32.xlu1 %v1941_v4  ;;  %v1737_v10 = vpop.permute.xlu1 %1736  ;;  %v1968_v0 = vsel %vm1201_vm0, %v1896_v61, 0.0  ;;  %v4105_v4 = vld [vmem:[%s4815_s14 + $0xc0] sm:$0xff]  ;;  %vm1807_vm3 = vcmp.eq.s32.totalorder %v4891_v15, %v1755_v58 }
 0x3e9   : > { %vm1804_vm15 = vcmp.eq.s32.totalorder %v4891_v15, %v1737_v10  ;;  %v3689_v35 = vsel %vm1807_vm3, 1.0, %v6694_v56  ;;  %vm370_vm3 = vcmp.eq.s32.totalorder %v5225_v60, 0  ;;  %v5620_v60 = vpop.xlane.xlu0 %1912 }
 0x3ea   : > { %v3686_v54 = vsel %vm1804_vm15, 1.0, %v6694_v56 }
 0x3eb   : > { %v1900_v6 = vmul.f32 %v4105_v4, %v3686_v54  ;;  %v2039_v54 = vld [vmem:[#allocation1] sm:$0xff] }
 0x3ec   : > { %v2041_v4 = vsel %vm1190_vm13, %v2039_v54, 0.0  ;;  %vm6740_vm13 = vcmask 720512  }
 0x3ed   : > { %v1980_v49 = vsel %vm1201_vm0, %v1900_v6, 0.0  ;;  %v3628_v6 = vsel %vm370_vm3, 1.0, %v6694_v56 }
 0x3ee   : > { %1954 = vadd.xlane.f32.xlu2 %v1953_v25 }
 0x3f0   : > { %1951 = vadd.xlane.f32.xlu1 %v1950_v41  ;;  %v4107_v41 = vld [vmem:[%s4815_s14 + $0xd8] sm:$0xff] }
 0x3f1   : > { %v1903_v8 = vmul.f32 %v4107_v41, %v3689_v35 }
 0x3f3   : > { %v1989_v5 = vsel %vm1201_vm0, %v1903_v8, 0.0 }
 0x3f6   : > { %1963 = vadd.xlane.f32.xlu2 %v1962_v55 }
 0x3f7   : > { %v1773_v25 = vpop.permute.xlu2 %1772 }
 0x3f8   : > { %1960 = vadd.xlane.f32.xlu1 %v1959_v62  ;;  %v1749_v2 = vpop.permute.xlu1 %1748  ;;  %vm1810_vm14 = vcmp.eq.s32.totalorder %v4891_v15, %v1773_v25  ;;  %v4109_v62 = vld [vmem:[%s4815_s14 + $0xf0] sm:$0xff] }
 0x3f9   : > { %vm1806_vm1 = vcmp.eq.s32.totalorder %v4891_v15, %v1749_v2  ;;  %v3692_v55 = vsel %vm1810_vm14, 1.0, %v6694_v56  ;;  %v2051_v2 = vsub.f32 0.0, %v3628_v6  ;;  %vm6743_vm14 = vcmask 851712  }
 0x3fa   : > { %v3688_v36 = vsel %vm1806_vm1, 1.0, %v6694_v56  ;;  %v1906_v47 = vmul.f32 %v4109_v62, %v3692_v55  ;;  %vm6741_vm1 = vcmask 786112  }
 0x3fb   : > { %v1902_v38 = vmul.f32 %v4108_v21, %v3688_v36  ;;  %v5610_v7 = vperm.slane %v2051_v2, 0 }
 0x3fc   : > { %v1998_v28 = vsel %vm1201_vm0, %v1906_v47, 0.0 }
 0x3fd   : > { %v1986_v1 = vsel %vm1201_vm0, %v1902_v38, 0.0 }
 0x3fe   : > { %1972 = vadd.xlane.f32.xlu2 %v1971_v43 }
 0x400   : > { %1969 = vadd.xlane.f32.xlu1 %v1968_v0 }
 0x406   : > { %1981 = vadd.xlane.f32.xlu2 %v1980_v49  ;;  %v5629_v49 = vpop.xlane.xlu0 %1921 }
 0x408   : > { %1978 = vadd.xlane.f32.xlu1 %v1977_v14  ;;  %v1767_v16 = vpop.permute.xlu1 %1766 }
 0x409   : > { %vm1809_vm15 = vcmp.eq.s32.totalorder %v4891_v15, %v1767_v16 }
 0x40a   : > { %v3691_v10 = vsel %vm1809_vm15, 1.0, %v6694_v56  ;;  %vm6747_vm15 = vcmask 982912  }
 0x40b   : > { %v1905_v3 = vmul.f32 %v4110_v52, %v3691_v10 }
 0x40d   : > { %v1995_v61 = vsel %vm1201_vm0, %v1905_v3, 0.0 }
 0x40e   : > { %1990 = vadd.xlane.f32.xlu2 %v1989_v5  ;;  %v5641_v8 = vpop.xlane.xlu0 %1930  ;;  %v6696_v5 = vmov 0  }
 0x410   : > { %1987 = vadd.xlane.f32.xlu1 %v1986_v1 }
 0x416   : > { %1999 = vadd.xlane.f32.xlu2 %v1998_v28  ;;  %v5653_v38 = vpop.xlane.xlu0 %1939 }
 0x418   : > { %1996 = vadd.xlane.f32.xlu1 %v1995_v61  ;;  %v1779_v58 = vpop.permute.xlu1 %1778 }
 0x419   : > { %vm1811_vm4 = vcmp.eq.s32.totalorder %v4891_v15, %v1779_v58 }
 0x41a   : > { %v3693_v43 = vsel %vm1811_vm4, 1.0, %v6694_v56  ;;  %vm6748_vm4 = vcmask 1048512  }
 0x41b   : > { %v1907_v0 = vmul.f32 %v3693_v43, %v5164_v45 }
 0x41d   : > { %v2001_v20 = vsel %vm1201_vm0, %v1907_v0, 0.0  ;;  %vm6739_vm0 = vcmask 654912  }
 0x41e   : > { %2002 = vadd.xlane.f32.xlu0 %v2001_v20  ;;  %v5661_v62 = vpop.xlane.xlu0 %1948 }
 0x420   : > { %2042 = vadd.xlane.f32.xlu1 %v2041_v4  ;;  %v4025_v4 = vpop.eup %4024 }
 0x421   : > { %v1491_v2 = vmul.f32 0.6931472, %v4025_v4 }
 0x423   : > { %v1554_v30 = vadd.f32 %v1491_v2, %v5107_v53 }
 0x42e   : > { %2058 = vperm.xlu2 %3887, %v5610_v7  }
 0x431   : > { %v5669_v28 = vpop.xlane.xlu0 %1957 }
 0x432   : > { %2064 = vperm.xlu0 %3883, %v5610_v7   ;;  %6699 = vst [vmem:[#allocation76_spill] sm:$0xff] %v5669_v28 }
 0x436   : > { %3889 = vset.pattern.permute.xlu2 %v4613_v11 }
 0x439   : > { %v5615_v45 = vpop.xlane.xlu2 %1909  ;;  %2070 = vperm.xlu1 %3888, %v5610_v7  }
 0x43a   : > { %3894 = vset.pattern.permute.xlu0 %v4619_v12 }
 0x43e   : > { %2076 = vperm.xlu2 %3889, %v5610_v7  }
 0x441   : > { %v5622_v63 = vpop.xlane.xlu2 %1918  ;;  %3890 = vset.pattern.permute.xlu1 %v4632_v17  ;;  %v5677_v61 = vpop.xlane.xlu0 %1966 }
 0x442   : > { %2106 = vperm.xlu0 %3894, %v5610_v7   ;;  %6702 = vst [vmem:[#allocation79_spill] sm:$0xff] %v5677_v61 }
 0x443   : > { %v5626_v35 = vpop.xlane.xlu1 %1915 }
 0x446   : > { %3891 = vset.pattern.permute.xlu2 %v4623_v13 }
 0x449   : > { %v5631_v25 = vpop.xlane.xlu2 %1927  ;;  %2082 = vperm.xlu1 %3890, %v5610_v7   ;;  %v5686_v54 = vpop.xlane.xlu0 %1975 }
 0x44a   : > { %3899 = vset.pattern.permute.xlu0 %v4640_v19  ;;  %6705 = vst [vmem:[#allocation82_spill] sm:$0xff] %v5686_v54 }
 0x44b   : > { %v5635_v14 = vpop.xlane.xlu1 %1924 }
 0x44e   : > { %2088 = vperm.xlu2 %3891, %v5610_v7  }
 0x451   : > { %v5638_v41 = vpop.xlane.xlu2 %1936  ;;  %3892 = vset.pattern.permute.xlu1 %v4659_v27 }
 0x452   : > { %2136 = vperm.xlu0 %3899, %v5610_v7  }
 0x453   : > { %v5644_v36 = vpop.xlane.xlu1 %1933 }
 0x456   : > { %3893 = vset.pattern.permute.xlu2 %v4650_v23 }
 0x459   : > { %v5647_v16 = vpop.xlane.xlu2 %1945  ;;  %2094 = vperm.xlu1 %3892, %v5610_v7  }
 0x45a   : > { %3904 = vset.pattern.permute.xlu0 %v6696_v5 }
 0x45b   : > { %v5651_v21 = vpop.xlane.xlu1 %1942 }
 0x45e   : > { %2100 = vperm.xlu2 %3893, %v5610_v7  }
 0x461   : > { %v5656_v55 = vpop.xlane.xlu2 %1954  ;;  %3895 = vset.pattern.permute.xlu1 %v4680_v34 }
 0x463   : > { %v5659_v1 = vpop.xlane.xlu1 %1951 }
 0x466   : > { %3896 = vset.pattern.permute.xlu2 %v4673_v32 }
 0x469   : > { %v5664_v47 = vpop.xlane.xlu2 %1963  ;;  %2112 = vperm.xlu1 %3895, %v5610_v7  }
 0x46a   : > { %6697 = vst [vmem:[#allocation74_spill] sm:$0xff] %v5664_v47 }
 0x46b   : > { %v5667_v10 = vpop.xlane.xlu1 %1960 }
 0x46c   : > { %6698 = vst [vmem:[#allocation75_spill] sm:$0xff] %v5667_v10 }
 0x46e   : > { %2118 = vperm.xlu2 %3896, %v5610_v7  }
 0x471   : > { %v5672_v52 = vpop.xlane.xlu2 %1972  ;;  %3897 = vset.pattern.permute.xlu1 %v4702_v40 }
 0x472   : > { %6700 = vst [vmem:[#allocation77_spill] sm:$0xff] %v5672_v52 }
 0x473   : > { %v5675_v3 = vpop.xlane.xlu1 %1969 }
 0x474   : > { %6701 = vst [vmem:[#allocation78_spill] sm:$0xff] %v5675_v3 }
 0x476   : > { %3898 = vset.pattern.permute.xlu2 %v4693_v39 }
 0x479   : > { %v5680_v58 = vpop.xlane.xlu2 %1981  ;;  %2124 = vperm.xlu1 %3897, %v5610_v7  }
 0x47a   : > { %6703 = vst [vmem:[#allocation80_spill] sm:$0xff] %v5680_v58 }
 0x47b   : > { %v5683_v43 = vpop.xlane.xlu1 %1978 }
 0x47c   : > { %6704 = vst [vmem:[#allocation81_spill] sm:$0xff] %v5683_v43  ;;  %v5699_v43 = vpop.xlane.xlu0 %1984 }
 0x47d   : > { %6709 = vst [vmem:[#allocation86_spill] sm:$0xff] %v5699_v43 }
 0x47e   : > { %2130 = vperm.xlu2 %3898, %v5610_v7  }
 0x481   : > { %v5689_v0 = vpop.xlane.xlu2 %1990  ;;  %3900 = vset.pattern.permute.xlu1 %v4723_v48 }
 0x482   : > { %6706 = vst [vmem:[#allocation83_spill] sm:$0xff] %v5689_v0  ;;  %v4027_v0 = vpop.eup %4026 }
 0x483   : > { %v5692_v20 = vpop.xlane.xlu1 %1987  ;;  %v1497_v29 = vmul.f32 0.6931472, %v4027_v0 }
 0x484   : > { %6707 = vst [vmem:[#allocation84_spill] sm:$0xff] %v5692_v20  ;;  %v5706_v20 = vsub.f32 %v1554_v30, %v5615_v45  ;;  %v5711_v4 = vpop.xlane.xlu0 %1993 }
 0x485   : > { %6711 = vst [vmem:[#allocation88_spill] sm:$0xff] %v5711_v4  ;;  %v1557_v53 = vadd.f32 %v1497_v29, %v5116_v22 }
 0x486   : > { %3901 = vset.pattern.permute.xlu2 %v6688_v42 }
 0x487   : > { %v5717_v45 = vsub.f32 %v1557_v53, %v5622_v63 }
 0x489   : > { %v5696_v6 = vpop.xlane.xlu2 %1999  ;;  %2142 = vperm.xlu1 %3900, %v5610_v7  }
 0x48a   : > { %6708 = vst [vmem:[#allocation85_spill] sm:$0xff] %v5696_v6 }
 0x48b   : > { %v5701_v52 = vpop.xlane.xlu1 %1996 }
 0x48c   : > { %6710 = vst [vmem:[#allocation87_spill] sm:$0xff] %v5701_v52 }
 0x48e   : > { %2148 = vperm.xlu2 %3901, %v5610_v7  }
 0x491   : > { %v2059_v47 = vpop.permute.xlu2 %2058  ;;  %3902 = vset.pattern.permute.xlu1 %v6696_v5  ;;  %v5721_v4 = vpop.xlane.xlu0 %2002 }
 0x492   : > { %v2166_v6 = vmul.f32 %v2059_v47, %v5706_v20  ;;  %v4029_v47 = vpop.eup %4028  ;;  %6712 = vst [vmem:[#allocation89_spill] sm:$0xff] %v5721_v4 }
 0x493   : > { %v2043_v28 = vpop.xlane.xlu1 %2042 }
 0x494   : > { %v2044_v52 = vrot.slane %v2043_v28, 4  ;;  %2199 = vperm.xlu1 %3902, %v2166_v6  }
 0x496   : > { %v2045_v7 = vadd.f32 %v2044_v52, %v2043_v28  ;;  %3903 = vset.pattern.permute.xlu2 %v6696_v5  ;;  %v1493_v28 = vmul.f32 0.6931472, %v4029_v47  ;;  %v4031_v52 = vpop.eup %4030 }
 0x497   : > { %v4033_v9 = vpop.eup %4032  ;;  %v1501_v29 = vmul.f32 0.6931472, %v4031_v52 }
 0x498   : > { %v2046_v0 = vrot.slane %v2045_v7, 2  ;;  %v1555_v63 = vadd.f32 %v1493_v28, %v5092_v50  ;;  %v1495_v43 = vmul.f32 0.6931472, %v4033_v9 }
 0x499   : > { %v2077_v2 = vpop.permute.xlu2 %2076  ;;  %v1559_v31 = vadd.f32 %v1501_v29, %v5177_v59 }
 0x49a   : > { %v2169_v30 = vmul.f32 %v2077_v2, %v5717_v45  ;;  %v2047_v46 = vadd.f32 %v2046_v0, %v2045_v7  ;;  %v5725_v53 = vsub.f32 %v1555_v63, %v5620_v60  ;;  %v1556_v47 = vadd.f32 %v1495_v43, %v5199_v24 }
 0x49b   : > { %v5731_v2 = vsub.f32 %v1559_v31, %v5635_v14 }
 0x49c   : > { %2208 = vperm.xlu1 %3902, %v2169_v30   ;;  %v2048_v22 = vrot.slane %v2047_v46, 1  ;;  %v4035_v30 = vpop.eup %4034 }
 0x49d   : > { %v1507_v14 = vmul.f32 0.6931472, %v4035_v30 }
 0x49e   : > { %v2049_v6 = vadd.f32 %v2048_v22, %v2047_v46  ;;  %v5737_v46 = vsub.f32 %v1556_v47, %v5626_v35  ;;  %v4037_v22 = vpop.eup %4036 }
 0x49f   : > { %v4039_v28 = vpop.eup %4038  ;;  %v1505_v57 = vmul.f32 0.6931472, %v4037_v22  ;;  %v1562_v24 = vadd.f32 %v1507_v14, %v5184_v33 }
 0x4a0   : > { %3705 = vpush %v2049_v6  ;;  %v1499_v52 = vmul.f32 0.6931472, %v4039_v28 }
 0x4a1   : > { %v5743_v43 = vsub.f32 %v1562_v24, %v5644_v36  ;;  %v1561_v35 = vadd.f32 %v1505_v57, %v5217_v44  ;;  %v6717_v24 = vld [vmem:[#allocation53_spill] sm:$0xff] }
 0x4a2   : > { %v1558_v29 = vadd.f32 %v1499_v52, %v5208_v26  ;;  %v6715_v26 = vld [vmem:[#allocation41_spill] sm:$0xff] }
 0x4a3   : > { %v5748_v9 = vsub.f32 %v1561_v35, %v5641_v8  ;;  %v6714_v8 = vld [vmem:[#allocation64_spill] sm:$0xff]  ;;  %v6718_v35 = vld [vmem:[#allocation43_spill] sm:$0xff] }
 0x4a4   : > { %v2065_v7 = vpop.permute.xlu0 %2064  ;;  %v5754_v36 = vsub.f32 %v1558_v29, %v5629_v49  ;;  %v6716_v49 = vld [vmem:[#allocation28_spill] sm:$0xff] }
 0x4a5   : > { %v2167_v0 = vmul.f32 %v2065_v7, %v5725_v53  ;;  %v6713_v7 = vld [vmem:[#allocation52_spill] sm:$0xff] }
 0x4a6   : > { %4042 = vlog2.f32 %v6713_v7  ;;  %v6719_v7 = vld [vmem:[#allocation54_spill] sm:$0xff] }
 0x4a7   : > { %2202 = vperm.xlu2 %3903, %v2167_v0   ;;  %v4041_v0 = vpop.eup %4040  ;;  %4044 = vlog2.f32 %v6714_v8  ;;  %v6721_v8 = vld [vmem:[#allocation55_spill] sm:$0xff] }
 0x4a8   : > { %v2089_v50 = vpop.permute.xlu2 %2088  ;;  %v1511_v37 = vmul.f32 0.6931472, %v4041_v0  ;;  %4046 = vlog2.f32 %v6717_v24 }
 0x4a9   : > { %v2171_v60 = vmul.f32 %v2089_v50, %v5731_v2  ;;  %4048 = vlog2.f32 %v6719_v7  ;;  %v6726_v7 = vld [vmem:[#allocation61_spill] sm:$0xff] }
 0x4aa   : > { %4050 = vlog2.f32 %v6721_v8  ;;  %v6727_v8 = vld [vmem:[#allocation38_spill] sm:$0xff] }
 0x4ab   : > { %2214 = vperm.xlu1 %3902, %v2171_v60   ;;  %v2071_v59 = vpop.permute.xlu1 %2070  ;;  %v1564_v60 = vadd.f32 %v1511_v37, %v6715_v26  ;;  %v6722_v37 = vld [vmem:[#allocation60_spill] sm:$0xff] }
 0x4ac   : > { %v2168_v18 = vmul.f32 %v2071_v59, %v5737_v46  ;;  %v4043_v47 = vpop.eup %4042  ;;  %4052 = vlog2.f32 %v6722_v37 }
 0x4ad   : > { %v1503_v50 = vmul.f32 0.6931472, %v4043_v47  ;;  %v4045_v30 = vpop.eup %4044  ;;  %v5761_v59 = vsub.f32 %v1564_v60, %v5653_v38  ;;  %4054 = vlog2.f32 %v6726_v7  ;;  %v6730_v7 = vld [vmem:[#allocation15_spill] sm:$0xff] }
 0x4ae   : > { %2205 = vperm.xlu0 %3904, %v2168_v18   ;;  %v1517_v22 = vmul.f32 0.6931472, %v4045_v30  ;;  %v6723_v30 = vld [vmem:[#allocation30_spill] sm:$0xff] }
 0x4af   : > { %v1560_v18 = vadd.f32 %v1503_v50, %v6716_v49 }
 0x4b1   : > { %v5766_v57 = vsub.f32 %v1560_v18, %v5631_v25 }
 0x4b4   : > { %v2107_v6 = vpop.permute.xlu0 %2106 }
 0x4b5   : > { %v2174_v51 = vmul.f32 %v2107_v6, %v5743_v43 }
 0x4b7   : > { %2223 = vperm.xlu1 %3902, %v2174_v51   ;;  %v1567_v51 = vadd.f32 %v1517_v22, %v6718_v35  ;;  %v6725_v35 = vld [vmem:[#allocation31_spill] sm:$0xff] }
 0x4b8   : > { %v2101_v63 = vpop.permute.xlu2 %2100 }
 0x4b9   : > { %v2173_v33 = vmul.f32 %v2101_v63, %v5748_v9  ;;  %v5772_v38 = vsub.f32 %v1567_v51, %v5661_v62  ;;  %v4047_v63 = vpop.eup %4046 }
 0x4ba   : > { %v1509_v25 = vmul.f32 0.6931472, %v4047_v63  ;;  %v4049_v0 = vpop.eup %4048 }
 0x4bb   : > { %2220 = vperm.xlu0 %3904, %v2173_v33   ;;  %v2083_v44 = vpop.permute.xlu1 %2082  ;;  %v1515_v62 = vmul.f32 0.6931472, %v4049_v0  ;;  %v4051_v60 = vpop.eup %4050 }
 0x4bc   : > { %v2170_v31 = vmul.f32 %v2083_v44, %v5754_v36  ;;  %v6720_v44 = vld [vmem:[#allocation29_spill] sm:$0xff]  ;;  %v4053_v18 = vpop.eup %4052 }
 0x4bd   : > { %v1566_v49 = vadd.f32 %v1515_v62, %v6723_v30  ;;  %v1513_v24 = vmul.f32 0.6931472, %v4053_v18 }
 0x4be   : > { %2211 = vperm.xlu2 %3903, %v2170_v31   ;;  %v1563_v31 = vadd.f32 %v1509_v25, %v6720_v44 }
 0x4bf   : > { %v5785_v22 = vsub.f32 %v1566_v49, %v5647_v16 }
 0x4c0   : > { %v5779_v47 = vsub.f32 %v1563_v31, %v5638_v41  ;;  %v4055_v31 = vpop.eup %4054 }
 0x4c1   : > { %v1519_v0 = vmul.f32 0.6931472, %v4055_v31  ;;  %v6731_v31 = vld [vmem:[#allocation16_spill] sm:$0xff] }
 0x4c3   : > { %v1568_v37 = vadd.f32 %v1519_v0, %v6727_v8 }
 0x4c4   : > { %v2137_v29 = vpop.permute.xlu0 %2136 }
 0x4c5   : > { %v2179_v33 = vmul.f32 %v2137_v29, %v5772_v38 }
 0x4c8   : > { %v2119_v14 = vpop.permute.xlu2 %2118 }
 0x4c9   : > { %v2176_v28 = vmul.f32 %v2119_v14, %v5761_v59 }
 0x4cb   : > { %2229 = vperm.xlu0 %3904, %v2176_v28   ;;  %v2095_v52 = vpop.permute.xlu1 %2094  ;;  %v1521_v28 = vmul.f32 0.6931472, %v4051_v60 }
 0x4cc   : > { %v2172_v6 = vmul.f32 %v2095_v52, %v5766_v57  ;;  %v6724_v52 = vld [vmem:[#allocation36_spill] sm:$0xff] }
 0x4cd   : > { %v1569_v51 = vadd.f32 %v1521_v28, %v6725_v35 }
 0x4ce   : > { %2217 = vperm.xlu2 %3903, %v2172_v6   ;;  %v1565_v6 = vadd.f32 %v1513_v24, %v6724_v52  ;;  %v6728_v24 = vld [vmem:[#allocation14_spill] sm:$0xff]  ;;  %v6729_v52 = vld [vmem:[#allocation13_spill] sm:$0xff] }
 0x4d0   : > { %v5791_v63 = vsub.f32 %v1565_v6, %v5651_v21 }
 0x4d1   : > { %s5999_s22 = spop %3705 }
 0x4d3   : > { %2238 = vperm.xlu0 %3904, %v2179_v33   ;;  %v5794_v33 = vsub.f32 %v1569_v51, %v5656_v55 }
 0x4d8   : > { %v2131_v14 = vpop.permute.xlu2 %2130 }
 0x4d9   : > { %v2178_v41 = vmul.f32 %v2131_v14, %v5785_v22 }
 0x4db   : > { %v2113_v50 = vpop.permute.xlu1 %2112 }
 0x4dc   : > { %v2175_v26 = vmul.f32 %v2113_v50, %v5779_v47  ;;  %v5801_v50 = vsub.f32 %v1568_v37, %v5659_v1  ;;  %v6732_v37 = vld [vmem:[#allocation18_spill] sm:$0xff] }
 0x4de   : > { %2226 = vperm.xlu2 %3903, %v2175_v26  }
 0x4e6   : > { %2235 = vperm.xlu2 %3903, %v2178_v41  }
 0x4e8   : > { %v2149_v29 = vpop.permute.xlu2 %2148 }
 0x4e9   : > { %v2181_v25 = vmul.f32 %v2149_v29, %v5794_v33 }
 0x4eb   : > { %v2125_v16 = vpop.permute.xlu1 %2124 }
 0x4ec   : > { %v2177_v44 = vmul.f32 %v2125_v16, %v5791_v63 }
 0x4ee   : > { %2244 = vperm.xlu2 %3903, %v2181_v25   ;;  %2232 = vperm.xlu1 %3902, %v2177_v44  }
 0x4fb   : > { %v2143_v21 = vpop.permute.xlu1 %2142 }
 0x4fc   : > { %v2180_v55 = vmul.f32 %v2143_v21, %v5801_v50 }
 0x4fe   : > { %2241 = vperm.xlu1 %3902, %v2180_v55   ;;  %v6733_v55 = vld [vmem:[#allocation17_spill] sm:$0xff] }
 0x501   : > { %v2203_v62 = vpop.permute.xlu2 %2202 }
 0x502   : > { %v2247_v6 = vperm.slane %v2203_v62, %v6729_v52  ;;  %v6734_v62 = vld [vmem:[#allocation19_spill] sm:$0xff] }
 0x506   : > { %v2200_v26 = vpop.permute.xlu1 %2199 }
 0x507   : > { %v2246_v28 = vperm.slane %v2200_v26, %v4891_v15 }
 0x509   : > { %v2248_v1 = vsel %vm6540_vm5, %v2247_v6, %v2246_v28 }
 0x50e   : > { %v2209_v30 = vpop.permute.xlu1 %2208 }
 0x50f   : > { %v2251_v16 = vperm.slane %v2209_v30, %v6730_v7 }
 0x518   : > { %v2212_v60 = vpop.permute.xlu2 %2211 }
 0x519   : > { %v2253_v0 = vperm.slane %v2212_v60, %v6731_v31  ;;  %v6736_v60 = vld [vmem:[#allocation20_spill] sm:$0xff] }
 0x51d   : > { %v2215_v14 = vpop.permute.xlu1 %2214 }
 0x51e   : > { %v2255_v26 = vperm.slane %v2215_v14, %v6733_v55 }
 0x520   : > { %v2206_v49 = vpop.permute.xlu0 %2205 }
 0x521   : > { %v2249_v41 = vperm.slane %v2206_v49, %v6728_v24 }
 0x523   : > { %v2250_v35 = vsel %vm6538_vm6, %v2249_v41, %v2248_v1 }
 0x524   : > { %v2252_v44 = vsel %vm6536_vm7, %v2251_v16, %v2250_v35  ;;  %v6735_v35 = vld [vmem:[#allocation22_spill] sm:$0xff] }
 0x525   : > { %v2254_v8 = vsel %vm6535_vm8, %v2253_v0, %v2252_v44  ;;  %v6737_v44 = vld [vmem:[#allocation21_spill] sm:$0xff] }
 0x526   : > { %v2256_v41 = vsel %vm6534_vm9, %v2255_v26, %v2254_v8  ;;  %v6742_v26 = vld [vmem:[#allocation23_spill] sm:$0xff] }
 0x528   : > { %v2218_v18 = vpop.permute.xlu2 %2217 }
 0x529   : > { %v2224_v25 = vpop.permute.xlu1 %2223  ;;  %v2257_v21 = vperm.slane %v2218_v18, %v6732_v37  ;;  %v6738_v18 = vld [vmem:[#allocation24_spill] sm:$0xff] }
 0x52a   : > { %v2261_v58 = vperm.slane %v2224_v25, %v6736_v60 }
 0x52b   : > { %v2258_v6 = vsel %vm6533_vm10, %v2257_v21, %v2256_v41 }
 0x52d   : > { %v2221_v51 = vpop.permute.xlu0 %2220 }
 0x52e   : > { %v2259_v49 = vperm.slane %v2221_v51, %v6734_v62 }
 0x530   : > { %v2260_v4 = vsel %vm6532_vm11, %v2259_v49, %v2258_v6  ;;  %v6744_v6 = vld [vmem:[#allocation25_spill] sm:$0xff] }
 0x531   : > { %v2262_v14 = vsel %vm6531_vm12, %v2261_v58, %v2260_v4 }
 0x538   : > { %v2227_v29 = vpop.permute.xlu2 %2226 }
 0x539   : > { %v2263_v16 = vperm.slane %v2227_v29, %v6735_v35 }
 0x53b   : > { %v2264_v51 = vsel %vm6739_vm0, %v2263_v16, %v2262_v14  ;;  %vm6529_vm0 = vcmask 1040384  }
 0x53d   : > { %v2230_v28 = vpop.permute.xlu0 %2229 }
 0x53e   : > { %v2265_v0 = vperm.slane %v2230_v28, %v6737_v44  ;;  %v6745_v28 = vld [vmem:[#allocation26_spill] sm:$0xff] }
 0x540   : > { %v2236_v1 = vpop.permute.xlu2 %2235  ;;  %v2266_v8 = vsel %vm6740_vm13, %v2265_v0, %v2264_v51 }
 0x541   : > { %v2269_v41 = vperm.slane %v2236_v1, %v6742_v26 }
 0x545   : > { %v2239_v61 = vpop.permute.xlu0 %2238 }
 0x546   : > { %v2271_v25 = vperm.slane %v2239_v61, %v6744_v6 }
 0x548   : > { %v2245_v49 = vpop.permute.xlu2 %2244 }
 0x560   : > { %v2233_v30 = vpop.permute.xlu1 %2232 }
 0x561   : > { %v2267_v54 = vperm.slane %v2233_v30, %v6738_v18  ;;  %v6746_v30 = vld [vmem:[#allocation27_spill] sm:$0xff] }
 0x562   : > { %v2275_v18 = vperm.slane %v2245_v49, %v6746_v30 }
 0x563   : > { %v2268_v21 = vsel %vm6741_vm1, %v2267_v54, %v2266_v8  ;;  %v4111_v8 = vld [vmem:[%s4545_s11 + $0x1] sm:$0x1] }
 0x564   : > { %v2270_v29 = vsel %vm6743_vm14, %v2269_v41, %v2268_v21  ;;  %vm371_vm3 = vcmp.eq.s32.totalorder %v4111_v8, 0 }
 0x565   : > { %v2272_v58 = vsel %vm6530_vm2, %v2271_v25, %v2270_v29  ;;  %v3629_v21 = vsel %vm371_vm3, 1.0, %v6694_v56 }
 0x566   : > { %v2792_v49 = vsub.f32 0.0, %v3629_v21 }
 0x568   : > { %v5841_v29 = vperm.slane %v2792_v49, 0 }
 0x570   : > { %v2242_v3 = vpop.permute.xlu1 %2241 }
 0x571   : > { %v2273_v10 = vperm.slane %v2242_v3, %v6745_v28 }
 0x573   : > { %v2274_v4 = vsel %vm6747_vm15, %v2273_v10, %v2272_v58 }
 0x574   : > { %v5835_v16 = vsel %vm6748_vm4, %v2275_v18, %v2274_v4 }
 0x575   : > { %2278 = vxpose.xlu0.b32.start.end [1/1] (short) %v5835_v16, 128 }
 0x619   : > { %v2294_v54 = vpop.trf.xlu0 }
 0x61a   : > { %2329 = vperm.xlu1 %3902, %v2294_v54  }
 0x621   : > { %v2295_v1 = vpop.trf.xlu0 }
 0x622   : > { %2334 = vperm.xlu2 %3903, %v2295_v1  }
 0x629   : > { %v2296_v61 = vpop.trf.xlu0 }
 0x62a   : > { %2339 = vperm.xlu1 %3902, %v2296_v61  }
 0x631   : > { %v2297_v0 = vpop.trf.xlu0 }
 0x632   : > { %2344 = vperm.xlu2 %3903, %v2297_v0   ;;  %v6749_v0 = vld [vmem:[#allocation7_spill] sm:$0xff] }
 0x633   : > { %vm6537_vm13 = vcmp.lt.s32.totalorder %v6749_v0, %v4891_v15 }
 0x639   : > { %v2298_v3 = vpop.trf.xlu0 }
 0x63a   : > { %2349 = vperm.xlu1 %3902, %v2298_v3   ;;  %v6750_v3 = vld [vmem:[#allocation8_spill] sm:$0xff] }
 0x641   : > { %v2299_v14 = vpop.trf.xlu0 }
 0x642   : > { %2354 = vperm.xlu2 %3903, %v2299_v14   ;;  %v2539_v14 = vsel %vm6529_vm0, %v6750_v3, 0.0 }
 0x649   : > { %v2300_v51 = vpop.trf.xlu0 }
 0x64a   : > { %2359 = vperm.xlu1 %3902, %v2300_v51  }
 0x651   : > { %v2301_v10 = vpop.trf.xlu0 }
 0x652   : > { %2364 = vperm.xlu2 %3903, %v2301_v10  }
 0x659   : > { %v2302_v18 = vpop.trf.xlu0 }
 0x65b   : > { %2369 = vperm.xlu0 %3904, %v2302_v18  }
 0x661   : > { %v2303_v41 = vpop.trf.xlu0 }
 0x662   : > { %2374 = vperm.xlu1 %3902, %v2303_v41  }
 0x663   : > { %3930 = vset.pattern.permute.xlu0 %v4650_v23 }
 0x669   : > { %v2304_v25 = vpop.trf.xlu0 }
 0x66a   : > { %2379 = vperm.xlu2 %3903, %v2304_v25  }
 0x66b   : > { %2841 = vperm.xlu0 %3930, %v5841_v29  }
 0x671   : > { %v2305_v58 = vpop.trf.xlu0 }
 0x672   : > { %2384 = vperm.xlu1 %3902, %v2305_v58  }
 0x673   : > { %3933 = vset.pattern.permute.xlu0 %v4673_v32 }
 0x679   : > { %v2306_v4 = vpop.trf.xlu0 }
 0x67a   : > { %2389 = vperm.xlu2 %3903, %v2306_v4   ;;  %v6751_v4 = vld [vmem:[#allocation10_spill] sm:$0xff] }
 0x67b   : > { %2859 = vperm.xlu0 %3933, %v5841_v29   ;;  %vm6539_vm14 = vcmp.lt.s32.totalorder %v6751_v4, %v4891_v15 }
 0x67c   : > { %v2335_v51 = vpop.permute.xlu2 %2334 }
 0x67d   : > { %vm2437_vm15 = vcmp.eq.f32.partialorder %v2335_v51, %v5835_v16  ;;  %vm2421_vm12 = vcmp.lt.f32.partialorder %v2335_v51, %v5835_v16 }
 0x67e   : > { %vm2469_vm11 = vmand %vm2437_vm15, %vm6539_vm14  ;;  %vm6544_vm15 = vcmp.lt.s32.totalorder %v4632_v17, %v4891_v15 }
 0x67f   : > { %vm2485_vm7 = vmor %vm2421_vm12, %vm2469_vm11 }
 0x681   : > { %v2307_v54 = vpop.trf.xlu0 }
 0x682   : > { %2394 = vperm.xlu1 %3902, %v2307_v54   ;;  %v6752_v54 = vld [vmem:[#allocation11_spill] sm:$0xff] }
 0x683   : > { %3938 = vset.pattern.permute.xlu0 %v6688_v42  ;;  %vm2454_vm4 = vcmp.lt.s32.totalorder %v6752_v54, %v4891_v15 }
 0x689   : > { %v2308_v1 = vpop.trf.xlu0 }
 0x68a   : > { %2399 = vperm.xlu2 %3903, %v2308_v1  }
 0x68b   : > { %2889 = vperm.xlu0 %3938, %v5841_v29  }
 0x68c   : > { %v2345_v10 = vpop.permute.xlu2 %2344  ;;  %v2330_v21 = vpop.permute.xlu1 %2329 }
 0x68d   : > { %vm2436_vm1 = vcmp.eq.f32.partialorder %v2330_v21, %v5835_v16  ;;  %vm2420_vm0 = vcmp.lt.f32.partialorder %v2330_v21, %v5835_v16  ;;  %vm2423_vm5 = vcmp.lt.f32.partialorder %v2345_v10, %v5835_v16 }
 0x68e   : > { %vm2468_vm2 = vmand %vm2436_vm1, %vm6537_vm13  ;;  %vm6545_vm1 = vcmp.lt.s32.totalorder %v4613_v11, %v4891_v15  ;;  %vm2439_vm13 = vcmp.eq.f32.partialorder %v2345_v10, %v5835_v16 }
 0x68f   : > { %vm2484_vm8 = vmor %vm2420_vm0, %vm2468_vm2 }
 0x690   : > { %v2500_v3 = vsel %vm2484_vm8, 1.0, %v6694_v56  ;;  %vm2471_vm2 = vmand %vm2439_vm13, %vm6545_vm1  ;;  %vm6543_vm8 = vcmp.lt.s32.totalorder %v4623_v13, %v4891_v15 }
 0x691   : > { %v2309_v61 = vpop.trf.xlu0 }
 0x692   : > { %2404 = vperm.xlu1 %3902, %v2309_v61   ;;  %3910 = vset.pattern.permute.xlu2 %v4623_v13 }
 0x693   : > { %3941 = vset.pattern.permute.xlu0 %v6696_v5 }
 0x69a   : > { %3905 = vset.pattern.permute.xlu1 %v6749_v0 }
 0x69c   : > { %v2355_v18 = vpop.permute.xlu2 %2354  ;;  %v2340_v49 = vpop.permute.xlu1 %2339 }
 0x69d   : > { %vm2438_vm3 = vcmp.eq.f32.partialorder %v2340_v49, %v5835_v16  ;;  %vm2422_vm10 = vcmp.lt.f32.partialorder %v2340_v49, %v5835_v16  ;;  %vm2441_vm12 = vcmp.eq.f32.partialorder %v2355_v18, %v5835_v16  ;;  %vm2425_vm13 = vcmp.lt.f32.partialorder %v2355_v18, %v5835_v16 }
 0x69e   : > { %vm2470_vm9 = vmand %vm2438_vm3, %vm2454_vm4 }
 0x69f   : > { %vm2486_vm6 = vmor %vm2422_vm10, %vm2470_vm9 }
 0x6a0   : > { %v2502_v51 = vsel %vm2486_vm6, 1.0, %v6694_v56  ;;  %vm2487_vm10 = vmor %vm2423_vm5, %vm2471_vm2  ;;  %vm6541_vm6 = vcmp.lt.s32.totalorder %v4659_v27, %v4891_v15  ;;  %vm6542_vm2 = vcmp.lt.s32.totalorder %v4650_v23, %v4891_v15 }
 0x6a1   : > { %vm2473_vm5 = vmand %vm2441_vm12, %vm6543_vm8  ;;  %vm6558_vm12 = vcmp.lt.s32.totalorder %v4619_v12, %v4891_v15 }
 0x6ac   : > { %v5853_v8 = vpop.permute.xlu2 %2364  ;;  %v2350_v58 = vpop.permute.xlu1 %2349 }
 0x6ad   : > { %vm2440_vm14 = vcmp.eq.f32.partialorder %v2350_v58, %v5835_v16  ;;  %vm2424_vm11 = vcmp.lt.f32.partialorder %v2350_v58, %v5835_v16 }
 0x6ae   : > { %vm2472_vm9 = vmand %vm2440_vm14, %vm6544_vm15 }
 0x6b3   : > { %2540 = vadd.xlane.f32.xlu2 %v2539_v14  ;;  %v2501_v14 = vsel %vm2485_vm7, 1.0, %v6694_v56  ;;  %vm2488_vm7 = vmor %vm2424_vm11, %vm2472_vm9  ;;  %vm2443_vm11 = vcmp.eq.f32.partialorder %v5853_v8, %v5835_v16 }
 0x6b4   : > { %v2516_v21 = vadd.f32 %v2501_v14, %v2500_v3  ;;  %v2503_v3 = vsel %vm2487_vm10, 1.0, %v6694_v56  ;;  %v2504_v14 = vsel %vm2488_vm7, 1.0, %v6694_v56  ;;  %vm2489_vm9 = vmor %vm2425_vm13, %vm2473_vm5  ;;  %vm6557_vm13 = vcmp.lt.s32.totalorder %v4680_v34, %v4891_v15 }
 0x6b6   : > { %v2517_v28 = vadd.f32 %v2516_v21, %v2502_v51 }
 0x6b8   : > { %v2518_v6 = vadd.f32 %v2517_v28, %v2503_v3 }
 0x6ba   : > { %v2519_v18 = vadd.f32 %v2518_v6, %v2504_v14  ;;  %v2505_v6 = vsel %vm2489_vm9, 1.0, %v6694_v56 }
 0x6bc   : > { %v2360_v61 = vpop.permute.xlu1 %2359 }
 0x6bd   : > { %vm2442_vm0 = vcmp.eq.f32.partialorder %v2360_v61, %v5835_v16  ;;  %vm2426_vm14 = vcmp.lt.f32.partialorder %v2360_v61, %v5835_v16 }
 0x6be   : > { %vm2474_vm3 = vmand %vm2442_vm0, %vm6541_vm6  ;;  %vm2427_vm0 = vcmp.lt.f32.partialorder %v5853_v8, %v5835_v16 }
 0x6bf   : > { %vm2490_vm10 = vmor %vm2426_vm14, %vm2474_vm3 }
 0x6c0   : > { %vm2475_vm6 = vmand %vm2443_vm11, %vm6542_vm2 }
 0x6c1   : > { %vm2491_vm11 = vmor %vm2427_vm0, %vm2475_vm6 }
 0x6c4   : > { %v5855_v41 = vpop.permute.xlu2 %2379 }
 0x6c5   : > { %vm2446_vm15 = vcmp.eq.f32.partialorder %v5855_v41, %v5835_v16  ;;  %vm2430_vm0 = vcmp.lt.f32.partialorder %v5855_v41, %v5835_v16 }
 0x6cd   : > { %v2370_v51 = vpop.permute.xlu0 %2369 }
 0x6ce   : > { %vm2444_vm7 = vcmp.eq.f32.partialorder %v2370_v51, %v5835_v16  ;;  %vm2428_vm14 = vcmp.lt.f32.partialorder %v2370_v51, %v5835_v16 }
 0x6cf   : > { %vm2476_vm3 = vmand %vm2444_vm7, %vm6558_vm12  ;;  %vm6547_vm7 = vcmp.lt.s32.totalorder %v4702_v40, %v4891_v15 }
 0x6d0   : > { %vm2492_vm9 = vmor %vm2428_vm14, %vm2476_vm3  ;;  %vm6548_vm3 = vcmp.lt.s32.totalorder %v4693_v39, %v4891_v15 }
 0x6d1   : > { %v2508_v14 = vsel %vm2492_vm9, 1.0, %v6694_v56 }
 0x6d4   : > { %v5857_v25 = vpop.permute.xlu2 %2389  ;;  %v2375_v10 = vpop.permute.xlu1 %2374 }
 0x6d5   : > { %vm2445_vm5 = vcmp.eq.f32.partialorder %v2375_v10, %v5835_v16  ;;  %vm2429_vm2 = vcmp.lt.f32.partialorder %v2375_v10, %v5835_v16  ;;  %v2507_v10 = vsel %vm2491_vm11, 1.0, %v6694_v56  ;;  %vm2448_vm11 = vcmp.eq.f32.partialorder %v5857_v25, %v5835_v16 }
 0x6d6   : > { %vm2477_vm8 = vmand %vm2445_vm5, %vm6557_vm13 }
 0x6d7   : > { %vm2493_vm1 = vmor %vm2429_vm2, %vm2477_vm8 }
 0x6e4   : > { %v5876_v1 = vpop.permute.xlu2 %2399  ;;  %v2385_v28 = vpop.permute.xlu1 %2384 }
 0x6e5   : > { %vm2447_vm6 = vcmp.eq.f32.partialorder %v2385_v28, %v5835_v16  ;;  %vm2431_vm8 = vcmp.lt.f32.partialorder %v2385_v28, %v5835_v16 }
 0x6e6   : > { %vm2479_vm2 = vmand %vm2447_vm6, %vm6547_vm7  ;;  %vm2450_vm7 = vcmp.eq.f32.partialorder %v5876_v1, %v5835_v16 }
 0x6e7   : > { %vm2495_vm9 = vmor %vm2431_vm8, %vm2479_vm2  ;;  %vm6554_vm2 = vcmp.lt.s32.totalorder %v4723_v48, %v4891_v15 }
 0x6e8   : > { %vm2480_vm6 = vmand %vm2448_vm11, %vm6548_vm3  ;;  %vm2434_vm3 = vcmp.lt.f32.partialorder %v5876_v1, %v5835_v16 }
 0x6f4   : > { %v2395_v51 = vpop.permute.xlu1 %2394 }
 0x726   : > { %v2541_v49 = vpop.xlane.xlu2 %2540 }
 0x727   : > { %v2542_v30 = vrot.slane %v2541_v49, 4 }
 0x729   : > { %v2543_v58 = vadd.f32 %v2542_v30, %v2541_v49  ;;  %v2506_v49 = vsel %vm2490_vm10, 1.0, %v6694_v56  ;;  %vm6546_vm10 = vcmp.lt.s32.totalorder %v4673_v32, %v4891_v15 }
 0x72a   : > { %vm2478_vm5 = vmand %vm2446_vm15, %vm6546_vm10  ;;  %vm6556_vm15 = vcmp.lt.s32.totalorder %v4640_v19, %v4891_v15  ;;  %vm2432_vm10 = vcmp.lt.f32.partialorder %v5857_v25, %v5835_v16 }
 0x72b   : > { %v2544_v21 = vrot.slane %v2543_v58, 2  ;;  %vm2494_vm14 = vmor %vm2430_vm0, %vm2478_vm5  ;;  %vm2433_vm0 = vcmp.lt.f32.partialorder %v2395_v51, %v5835_v16 }
 0x72c   : > { %v2510_v28 = vsel %vm2494_vm14, 1.0, %v6694_v56  ;;  %vm2496_vm8 = vmor %vm2432_vm10, %vm2480_vm6  ;;  %vm6555_vm14 = vcmp.lt.s32.totalorder %v6688_v42, %v4891_v15 }
 0x72d   : > { %v2545_v30 = vadd.f32 %v2544_v21, %v2543_v58  ;;  %v2520_v58 = vadd.f32 %v2519_v18, %v2505_v6  ;;  %v2405_v6 = vpop.permute.xlu1 %2404  ;;  %vm2482_vm10 = vmand %vm2450_vm7, %vm6554_vm2 }
 0x72f   : > { %v2546_v61 = vrot.slane %v2545_v30, 1  ;;  %v2521_v3 = vadd.f32 %v2520_v58, %v2506_v49 }
 0x731   : > { %v2547_v8 = vadd.f32 %v2546_v61, %v2545_v30  ;;  %v2522_v21 = vadd.f32 %v2521_v3, %v2507_v10  ;;  %v2509_v30 = vsel %vm2493_vm1, 1.0, %v6694_v56  ;;  %vm2449_vm1 = vcmp.eq.f32.partialorder %v2395_v51, %v5835_v16 }
 0x732   : > { %v2511_v61 = vsel %vm2495_vm9, 1.0, %v6694_v56  ;;  %vm2481_vm5 = vmand %vm2449_vm1, %vm6556_vm15  ;;  %vm2451_vm9 = vcmp.eq.f32.partialorder %v2405_v6, %v5835_v16  ;;  %vm2435_vm1 = vcmp.lt.f32.partialorder %v2405_v6, %v5835_v16 }
 0x733   : > { %3707 = vpush %v2547_v8  ;;  %v2523_v18 = vadd.f32 %v2522_v21, %v2508_v14  ;;  %vm2497_vm11 = vmor %vm2433_vm0, %vm2481_vm5  ;;  %v2512_v8 = vsel %vm2496_vm8, 1.0, %v6694_v56 }
 0x734   : > { %v2513_v58 = vsel %vm2497_vm11, 1.0, %v6694_v56  ;;  %vm2483_vm6 = vmand %vm2451_vm9, %vm6555_vm14  ;;  %vm6755_vm11 = vcmask 130112   ;;  %vm6756_vm9 = vcmask 195712  }
 0x735   : > { %v2524_v41 = vadd.f32 %v2523_v18, %v2509_v30  ;;  %vm2498_vm0 = vmor %vm2434_vm3, %vm2482_vm10  ;;  %vm6757_vm10 = vcmask 261312  }
 0x736   : > { %vm2499_vm5 = vmor %vm2435_vm1, %vm2483_vm6  ;;  %v2514_v1 = vsel %vm2498_vm0, 1.0, %v6694_v56  ;;  %vm6758_vm1 = vcmask 326912   ;;  %vm6759_vm6 = vcmask 392512   ;;  %vm6760_vm0 = vcmask 458112  }
 0x737   : > { %v2525_v49 = vadd.f32 %v2524_v41, %v2510_v28  ;;  %v2515_v14 = vsel %vm2499_vm5, 1.0, %v6694_v56  ;;  %vm6761_vm5 = vcmask 523712  }
 0x739   : > { %v2526_v25 = vadd.f32 %v2525_v49, %v2511_v61  ;;  %v6753_v49 = vld [vmem:[#allocation5_spill] sm:$0xff] }
 0x73a   : > { %vm6754_vm3 = vcmp.gt.s32.totalorder %v6753_v49, 0 }
 0x73b   : > { %v2527_v3 = vadd.f32 %v2526_v25, %v2512_v8 }
 0x73d   : > { %v2528_v10 = vadd.f32 %v2527_v3, %v2513_v58 }
 0x73f   : > { %v2529_v51 = vadd.f32 %v2528_v10, %v2514_v1 }
 0x741   : > { %v2530_v21 = vadd.f32 %v2529_v51, %v2515_v14 }
 0x743   : > { %v2531_v30 = vrot.slane %v2530_v21, 4 }
 0x745   : > { %v2532_v18 = vadd.f32 %v2531_v30, %v2530_v21 }
 0x747   : > { %v2533_v41 = vrot.slane %v2532_v18, 2 }
 0x749   : > { %v2534_v28 = vadd.f32 %v2533_v41, %v2532_v18 }
 0x74b   : > { %v2535_v16 = vrot.slane %v2534_v28, 1 }
 0x74d   : > { %v2536_v61 = vadd.f32 %v2535_v16, %v2534_v28 }
 0x764   : > { %s3708_s23 = spop %3707 }
 0x765   : > { %s2549_s27 = smul.f32 3.0, %s3708_s23  ;;  %s3518_s23 = sshll.u32 %s3514_s10, 4  ;;  %s3519_s23 = int_to_ptr.hbm [resolvable:$true] %s3518_s23 }
 0x767   : > { %v2550_v6 = vstv %s2549_s27 }
 0x768   : > { %vm2551_vm7 = vcmp.lt.f32.partialorder %v2536_v61, %v2550_v6 }
 0x769   : > { %vm2552_vm8 = vmor %vm6754_vm3, %vm2551_vm7  ;;  %vm6762_vm7 = vcmask 589312   ;;  %vm6763_vm3 = vcmask 654912  }
 0x76a   : > { %v3694_v25 = vsel %vm2552_vm8, 1.0, %v6694_v56  ;;  %vm6764_vm8 = vcmask 720512  }
 0x76b   : > { %v2556_v8 = vperm.slane %v3694_v25, 0 }
 0x76d   : > { %2591 = vperm.xlu2 %3910, %v2556_v8   ;;  %2561 = vperm.xlu1 %3905, %v2556_v8  }
 0x775   : > { %3914 = vset.pattern.permute.xlu2 %v4680_v34  ;;  %3906 = vset.pattern.permute.xlu1 %v6751_v4 }
 0x77d   : > { %2615 = vperm.xlu2 %3914, %v2556_v8   ;;  %2567 = vperm.xlu1 %3906, %v2556_v8  }
 0x785   : > { %3916 = vset.pattern.permute.xlu2 %v4702_v40  ;;  %3907 = vset.pattern.permute.xlu1 %v6752_v54 }
 0x78d   : > { %2627 = vperm.xlu2 %3916, %v2556_v8   ;;  %2573 = vperm.xlu1 %3907, %v2556_v8  }
 0x795   : > { %3918 = vset.pattern.permute.xlu2 %v4640_v19  ;;  %3908 = vset.pattern.permute.xlu1 %v4613_v11 }
 0x79d   : > { %2639 = vperm.xlu2 %3918, %v2556_v8   ;;  %2579 = vperm.xlu1 %3908, %v2556_v8  }
 0x7a5   : > { %3920 = vset.pattern.permute.xlu2 %v6688_v42  ;;  %3909 = vset.pattern.permute.xlu1 %v4632_v17 }
 0x7ad   : > { %2651 = vperm.xlu2 %3920, %v2556_v8   ;;  %2585 = vperm.xlu1 %3909, %v2556_v8  }
 0x7b5   : > { %3911 = vset.pattern.permute.xlu1 %v4659_v27  ;;  %3922 = vset.pattern.permute.xlu2 %v6696_v5 }
 0x7bd   : > { %2597 = vperm.xlu1 %3911, %v2556_v8  }
 0x7c5   : > { %3912 = vset.pattern.permute.xlu1 %v4650_v23 }
 0x7c7   : > { %v2592_v30 = vpop.permute.xlu2 %2591 }
 0x7cd   : > { %2603 = vperm.xlu1 %3912, %v2556_v8  }
 0x7d5   : > { %3913 = vset.pattern.permute.xlu1 %v4619_v12 }
 0x7d7   : > { %v2616_v6 = vpop.permute.xlu2 %2615 }
 0x7d8   : > { %v2678_v49 = vmul.f32 %v2616_v6, %v5779_v47 }
 0x7dd   : > { %2609 = vperm.xlu1 %3913, %v2556_v8  }
 0x7df   : > { %v2562_v58 = vpop.permute.xlu1 %2561 }
 0x7e0   : > { %v2669_v21 = vmul.f32 %v2562_v58, %v5706_v20 }
 0x7e5   : > { %3915 = vset.pattern.permute.xlu1 %v4673_v32 }
 0x7ed   : > { %2621 = vperm.xlu1 %3915, %v2556_v8  }
 0x7ef   : > { %v2568_v3 = vpop.permute.xlu1 %2567 }
 0x7f0   : > { %v2670_v10 = vmul.f32 %v2568_v3, %v5725_v53  ;;  %v2674_v53 = vmul.f32 %v2592_v30, %v5731_v2  ;;  %v2628_v2 = vpop.permute.xlu2 %2627 }
 0x7f2   : > { %2705 = vperm.xlu2 %3922, %v2670_v10  }
 0x7f5   : > { %3917 = vset.pattern.permute.xlu1 %v4693_v39 }
 0x7fd   : > { %2633 = vperm.xlu1 %3917, %v2556_v8  }
 0x7ff   : > { %v2574_v1 = vpop.permute.xlu1 %2573 }
 0x800   : > { %v2671_v18 = vmul.f32 %v2574_v1, %v5737_v46  ;;  %v2680_v46 = vmul.f32 %v2628_v2, %v5791_v63 }
 0x805   : > { %3919 = vset.pattern.permute.xlu1 %v4723_v48 }
 0x80d   : > { %2645 = vperm.xlu1 %3919, %v2556_v8  }
 0x80f   : > { %v2580_v14 = vpop.permute.xlu1 %2579 }
 0x810   : > { %v2672_v51 = vmul.f32 %v2580_v14, %v5717_v45 }
 0x812   : > { %2711 = vperm.xlu2 %3922, %v2672_v51  }
 0x815   : > { %3921 = vset.pattern.permute.xlu1 %v6696_v5 }
 0x816   : > { %2702 = vperm.xlu1 %3921, %v2669_v21  }
 0x81a   : > { %2717 = vperm.xlu2 %3922, %v2674_v53  }
 0x81e   : > { %2708 = vperm.xlu1 %3921, %v2671_v18  }
 0x81f   : > { %v2586_v41 = vpop.permute.xlu1 %2585 }
 0x820   : > { %v2673_v28 = vmul.f32 %v2586_v41, %v5754_v36  ;;  %v2640_v36 = vpop.permute.xlu2 %2639 }
 0x826   : > { %2714 = vperm.xlu1 %3921, %v2673_v28  }
 0x828   : > { %v2652_v58 = vpop.permute.xlu2 %2651 }
 0x82f   : > { %v2598_v16 = vpop.permute.xlu1 %2597 }
 0x830   : > { %v2675_v45 = vmul.f32 %v2598_v16, %v5766_v57  ;;  %v2682_v57 = vmul.f32 %v2640_v36, %v5772_v38 }
 0x832   : > { %2720 = vperm.xlu1 %3921, %v2675_v45  }
 0x83f   : > { %v2604_v61 = vpop.permute.xlu1 %2603 }
 0x840   : > { %v2676_v20 = vmul.f32 %v2604_v61, %v5748_v9  ;;  %v2684_v9 = vmul.f32 %v2652_v58, %v5794_v33 }
 0x842   : > { %2723 = vperm.xlu2 %3922, %v2676_v20  }
 0x84a   : > { %2729 = vperm.xlu2 %3922, %v2678_v49  }
 0x84f   : > { %v2610_v25 = vpop.permute.xlu1 %2609 }
 0x850   : > { %v2677_v8 = vmul.f32 %v2610_v25, %v5743_v43 }
 0x852   : > { %2735 = vperm.xlu2 %3922, %v2680_v46   ;;  %2726 = vperm.xlu1 %3921, %v2677_v8  }
 0x85a   : > { %2741 = vperm.xlu2 %3922, %v2682_v57  }
 0x85f   : > { %v2622_v3 = vpop.permute.xlu1 %2621 }
 0x860   : > { %v2679_v10 = vmul.f32 %v2622_v3, %v5761_v59  ;;  %v2706_v59 = vpop.permute.xlu2 %2705 }
 0x861   : > { %v2750_v16 = vperm.slane %v2706_v59, %v6729_v52 }
 0x862   : > { %2747 = vperm.xlu2 %3922, %v2684_v9   ;;  %2732 = vperm.xlu1 %3921, %v2679_v10  }
 0x86a   : > { %3923 = vset.pattern.permute.xlu2 %v6749_v0 }
 0x86f   : > { %v2634_v47 = vpop.permute.xlu1 %2633 }
 0x870   : > { %v2681_v63 = vmul.f32 %v2634_v47, %v5785_v22  ;;  %v2712_v22 = vpop.permute.xlu2 %2711 }
 0x871   : > { %v2754_v49 = vperm.slane %v2712_v22, %v6730_v7 }
 0x872   : > { %2799 = vperm.xlu2 %3923, %v5841_v29   ;;  %2738 = vperm.xlu1 %3921, %v2681_v63  }
 0x878   : > { %v2718_v33 = vpop.permute.xlu2 %2717 }
 0x879   : > { %v2758_v8 = vperm.slane %v2718_v33, %v6733_v55 }
 0x87a   : > { %3924 = vset.pattern.permute.xlu2 %v6751_v4 }
 0x87f   : > { %v2646_v43 = vpop.permute.xlu1 %2645 }
 0x880   : > { %v2683_v38 = vmul.f32 %v2646_v43, %v5801_v50 }
 0x882   : > { %2805 = vperm.xlu2 %3924, %v5841_v29   ;;  %2744 = vperm.xlu1 %3921, %v2683_v38  }
 0x888   : > { %v2703_v50 = vpop.permute.xlu1 %2702 }
 0x889   : > { %v2749_v18 = vperm.slane %v2703_v50, %v4891_v15 }
 0x88a   : > { %3925 = vset.pattern.permute.xlu2 %v6752_v54  ;;  %3928 = vset.pattern.permute.xlu1 %v4623_v13 }
 0x88b   : > { %v2751_v61 = vsel %vm6755_vm11, %v2750_v16, %v2749_v18  ;;  %vm6766_vm11 = vcmask 786112  }
 0x890   : > { %v2709_v14 = vpop.permute.xlu1 %2708 }
 0x891   : > { %v2752_v28 = vperm.slane %v2709_v14, %v6728_v24 }
 0x892   : > { %2811 = vperm.xlu2 %3925, %v5841_v29  }
 0x893   : > { %v2753_v20 = vsel %vm6756_vm9, %v2752_v28, %v2751_v61  ;;  %vm6767_vm9 = vcmask 851712   ;;  %v6768_v28 = vld [vmem:[#allocation25_spill] sm:$0xff]  ;;  %v6769_v61 = vld [vmem:[#allocation26_spill] sm:$0xff] }
 0x894   : > { %v2755_v2 = vsel %vm6757_vm10, %v2754_v49, %v2753_v20  ;;  %vm6771_vm10 = vcmask 917312  }
 0x898   : > { %v2715_v21 = vpop.permute.xlu1 %2714 }
 0x899   : > { %v2756_v6 = vperm.slane %v2715_v21, %v6731_v31 }
 0x89a   : > { %3926 = vset.pattern.permute.xlu2 %v4613_v11 }
 0x89b   : > { %v2757_v25 = vsel %vm6758_vm1, %v2756_v6, %v2755_v2  ;;  %v6770_v6 = vld [vmem:[#allocation27_spill] sm:$0xff]  ;;  %vm6772_vm1 = vcmask 982912  }
 0x89c   : > { %v2724_v1 = vpop.permute.xlu2 %2723  ;;  %v2759_v58 = vsel %vm6759_vm6, %v2758_v8, %v2757_v25  ;;  %vm6774_vm6 = vcmask 1048512  }
 0x89d   : > { %v2762_v10 = vperm.slane %v2724_v1, %v6734_v62  ;;  %v6765_v1 = vld [vmem:[#allocation24_spill] sm:$0xff] }
 0x8a2   : > { %2817 = vperm.xlu2 %3926, %v5841_v29  }
 0x8a4   : > { %v2730_v51 = vpop.permute.xlu2 %2729  ;;  %v2721_v53 = vpop.permute.xlu1 %2720 }
 0x8a5   : > { %v2760_v46 = vperm.slane %v2721_v53, %v6732_v37  ;;  %v2766_v38 = vperm.slane %v2730_v51, %v6735_v35 }
 0x8a7   : > { %v2761_v3 = vsel %vm6760_vm0, %v2760_v46, %v2759_v58  ;;  %v6773_v46 = vld [vmem:[#allocation63_spill] sm:$0xff]  ;;  %vm6775_vm0 = vcmask 1040384  }
 0x8a8   : > { %v2763_v47 = vsel %vm6761_vm5, %v2762_v10, %v2761_v3  ;;  %4056 = vlog2.f32 %v6773_v46  ;;  %v6777_v3 = vld [vmem:[#allocation68_spill] sm:$0xff]  ;;  %v6784_v46 = vld [vmem:[#allocation79_spill] sm:$0xff]  ;;  %vm6828_vm5 = vmmov %vm6775_vm0 }
 0x8aa   : > { %3927 = vset.pattern.permute.xlu2 %v4632_v17 }
 0x8ac   : > { %v2736_v30 = vpop.permute.xlu2 %2735 }
 0x8ad   : > { %v2770_v21 = vperm.slane %v2736_v30, %v6765_v1 }
 0x8ae   : > { %v4057_v58 = vpop.eup %4056 }
 0x8b2   : > { %2823 = vperm.xlu2 %3927, %v5841_v29  }
 0x8b4   : > { %v2742_v41 = vpop.permute.xlu2 %2741 }
 0x8b5   : > { %v2774_v16 = vperm.slane %v2742_v41, %v6768_v28  ;;  %v6776_v41 = vld [vmem:[#allocation65_spill] sm:$0xff] }
 0x8b6   : > { %4058 = vlog2.f32 %v6776_v41 }
 0x8b7   : > { %4060 = vlog2.f32 %v6777_v3 }
 0x8ba   : > { %3929 = vset.pattern.permute.xlu2 %v4659_v27 }
 0x8bc   : > { %v2748_v36 = vpop.permute.xlu2 %2747 }
 0x8bd   : > { %v2778_v49 = vperm.slane %v2748_v36, %v6770_v6  ;;  %v1525_v36 = vmul.f32 0.6931472, %v4057_v58  ;;  %v6785_v58 = vld [vmem:[#allocation48_spill] sm:$0xff] }
 0x8c2   : > { %2835 = vperm.xlu2 %3929, %v5841_v29  }
 0x8c4   : > { %v2727_v45 = vpop.permute.xlu1 %2726 }
 0x8c5   : > { %v2764_v9 = vperm.slane %v2727_v45, %v6736_v60 }
 0x8c7   : > { %v2765_v63 = vsel %vm6762_vm7, %v2764_v9, %v2763_v47  ;;  %v4059_v9 = vpop.eup %4058  ;;  %vm6829_vm7 = vcmask 130112  }
 0x8c8   : > { %v2767_v33 = vsel %vm6763_vm3, %v2766_v38, %v2765_v63  ;;  %v1531_v47 = vmul.f32 0.6931472, %v4059_v9  ;;  %v6778_v63 = vld [vmem:[#allocation39_spill] sm:$0xff]  ;;  %v4061_v38 = vpop.eup %4060  ;;  %vm6830_vm3 = vcmask 195712  }
 0x8ca   : > { %3931 = vset.pattern.permute.xlu2 %v4619_v12 }
 0x8cc   : > { %v6073_v59 = vpop.permute.xlu2 %2799 }
 0x8d2   : > { %2847 = vperm.xlu2 %3931, %v5841_v29  }
 0x8d4   : > { %v2733_v57 = vpop.permute.xlu1 %2732 }
 0x8d5   : > { %v2768_v43 = vperm.slane %v2733_v57, %v6737_v44 }
 0x8d7   : > { %v2769_v50 = vsel %vm6764_vm8, %v2768_v43, %v2767_v33  ;;  %v1571_v43 = vadd.f32 %v1525_v36, %v6778_v63  ;;  %v6786_v36 = vld [vmem:[#allocation82_spill] sm:$0xff]  ;;  %vm6831_vm8 = vcmask 261312  }
 0x8d8   : > { %v2771_v53 = vsel %vm6766_vm11, %v2770_v21, %v2769_v50  ;;  %v1529_v50 = vmul.f32 0.6931472, %v4061_v38  ;;  %vm6832_vm11 = vcmask 326912  }
 0x8da   : > { %3932 = vset.pattern.permute.xlu2 %v4680_v34 }
 0x8dc   : > { %v2806_v51 = vpop.permute.xlu2 %2805 }
 0x8e2   : > { %2853 = vperm.xlu2 %3932, %v5841_v29  }
 0x8e4   : > { %v2739_v22 = vpop.permute.xlu1 %2738 }
 0x8e5   : > { %v2772_v14 = vperm.slane %v2739_v22, %v6742_v26  ;;  %v6779_v22 = vld [vmem:[#allocation75_spill] sm:$0xff] }
 0x8e6   : > { %v6098_v33 = vsub.f32 %v1571_v43, %v6779_v22  ;;  %v6788_v22 = vld [vmem:[#allocation66_spill] sm:$0xff] }
 0x8e7   : > { %v2773_v18 = vsel %vm6767_vm9, %v2772_v14, %v2771_v53  ;;  %v6780_v14 = vld [vmem:[#allocation40_spill] sm:$0xff]  ;;  %vm6833_vm9 = vcmask 392512  }
 0x8e8   : > { %v2775_v2 = vsel %vm6771_vm10, %v2774_v16, %v2773_v18  ;;  %v1574_v21 = vadd.f32 %v1531_v47, %v6780_v14  ;;  %v2908_v53 = vmul.f32 %v2806_v51, %v6098_v33  ;;  %v6781_v18 = vld [vmem:[#allocation78_spill] sm:$0xff]  ;;  %vm6834_vm10 = vcmask 458112  }
 0x8e9   : > { %v6787_v47 = vld [vmem:[#allocation58_spill] sm:$0xff] }
 0x8ea   : > { %3935 = vset.pattern.permute.xlu2 %v4693_v39  ;;  %v6104_v16 = vsub.f32 %v1574_v21, %v6781_v18  ;;  %v6790_v21 = vld [vmem:[#allocation80_spill] sm:$0xff]  ;;  %v6791_v18 = vld [vmem:[#allocation71_spill] sm:$0xff] }
 0x8ec   : > { %v6092_v57 = vpop.permute.xlu2 %2811 }
 0x8f2   : > { %2871 = vperm.xlu2 %3935, %v5841_v29  }
 0x8f4   : > { %v2745_v45 = vpop.permute.xlu1 %2744 }
 0x8f5   : > { %v2776_v20 = vperm.slane %v2745_v45, %v6769_v61  ;;  %v6782_v45 = vld [vmem:[#allocation69_spill] sm:$0xff] }
 0x8f6   : > { %4062 = vlog2.f32 %v6782_v45 }
 0x8f7   : > { %v2777_v25 = vsel %vm6772_vm1, %v2776_v20, %v2775_v2  ;;  %4064 = vlog2.f32 %v6787_v47  ;;  %v6795_v47 = vld [vmem:[#allocation49_spill] sm:$0xff]  ;;  %vm6835_vm1 = vcmask 523712  }
 0x8f8   : > { %v2779_v30 = vsel %vm6774_vm6, %v2778_v49, %v2777_v25  ;;  %v6783_v49 = vld [vmem:[#allocation46_spill] sm:$0xff]  ;;  %4066 = vlog2.f32 %v6788_v22  ;;  %vm6836_vm6 = vcmask 589312  }
 0x8f9   : > { %v2781_v8 = vsel %vm6775_vm0, %v2779_v30, 0.0  ;;  %v1573_v2 = vadd.f32 %v1529_v50, %v6783_v49  ;;  %v6789_v50 = vld [vmem:[#allocation34_spill] sm:$0xff]  ;;  %4068 = vlog2.f32 %v6791_v18  ;;  %vm6837_vm0 = vcmask 654912  }
 0x8fa   : > { %3937 = vset.pattern.permute.xlu2 %v4723_v48  ;;  %2782 = vadd.xlane.f32.xlu1 %v2781_v8 }
 0x8fb   : > { %v6110_v30 = vsub.f32 %v1573_v2, %v6784_v46  ;;  %v6792_v2 = vld [vmem:[#allocation56_spill] sm:$0xff] }
 0x8fc   : > { %v2818_v10 = vpop.permute.xlu2 %2817  ;;  %v4063_v51 = vpop.eup %4062  ;;  %4070 = vlog2.f32 %v6792_v2 }
 0x8fd   : > { %v2910_v8 = vmul.f32 %v2818_v10, %v6110_v30  ;;  %v1535_v41 = vmul.f32 0.6931472, %v4063_v51  ;;  %v4065_v38 = vpop.eup %4064  ;;  %v6793_v51 = vld [vmem:[#allocation44_spill] sm:$0xff]  ;;  %v2842_v2 = vpop.permute.xlu0 %2841 }
 0x8fe   : > { %v1539_v10 = vmul.f32 0.6931472, %v4065_v38  ;;  %v4067_v49 = vpop.eup %4066 }
 0x8ff   : > { %v1576_v3 = vadd.f32 %v1535_v41, %v6785_v58  ;;  %v1523_v46 = vmul.f32 0.6931472, %v4067_v49 }
 0x900   : > { %v1578_v14 = vadd.f32 %v1539_v10, %v6789_v50  ;;  %v6796_v10 = vld [vmem:[#allocation86_spill] sm:$0xff]  ;;  %v6797_v50 = vld [vmem:[#allocation72_spill] sm:$0xff] }
 0x901   : > { %v6116_v9 = vsub.f32 %v1576_v3, %v6786_v36  ;;  %v1570_v41 = vadd.f32 %v1523_v46, %v6793_v51  ;;  %v6794_v3 = vld [vmem:[#allocation76_spill] sm:$0xff]  ;;  %4072 = vlog2.f32 %v6797_v50 }
 0x902   : > { %2883 = vperm.xlu2 %3937, %v5841_v29  }
 0x903   : > { %v6134_v36 = vsub.f32 %v1570_v41, %v6794_v3  ;;  %v6802_v3 = vld [vmem:[#allocation88_spill] sm:$0xff] }
 0x905   : > { %v2907_v38 = vmul.f32 %v6073_v59, %v6134_v36 }
 0x90a   : > { %3940 = vset.pattern.permute.xlu2 %v6696_v5 }
 0x90b   : > { %2943 = vperm.xlu2 %3940, %v2908_v53   ;;  %v6125_v53 = vsub.f32 %v1578_v14, %v6790_v21  ;;  %v6798_v21 = vld [vmem:[#allocation32_spill] sm:$0xff] }
 0x90c   : > { %v2824_v20 = vpop.permute.xlu2 %2823 }
 0x90d   : > { %v2911_v25 = vmul.f32 %v2824_v20, %v6104_v16 }
 0x90f   : > { %2952 = vperm.xlu0 %3941, %v2911_v25   ;;  %v4069_v25 = vpop.eup %4068 }
 0x910   : > { %v4071_v58 = vpop.eup %4070 }
 0x911   : > { %v4073_v49 = vpop.eup %4072 }
 0x912   : > { %v1547_v46 = vmul.f32 0.6931472, %v4073_v49 }
 0x913   : > { %2949 = vperm.xlu2 %3940, %v2910_v8   ;;  %2829 = vperm.xlu1 %3928, %v5841_v29   ;;  %v1541_v8 = vmul.f32 0.6931472, %v4069_v25  ;;  %v6800_v25 = vld [vmem:[#allocation73_spill] sm:$0xff] }
 0x914   : > { %4074 = vlog2.f32 %v6800_v25 }
 0x91a   : > { %v4075_v41 = vpop.eup %4074 }
 0x91b   : > { %3934 = vset.pattern.permute.xlu1 %v4702_v40 }
 0x91c   : > { %v2836_v63 = vpop.permute.xlu2 %2835 }
 0x91d   : > { %v2913_v43 = vmul.f32 %v2836_v63, %v6116_v9  ;;  %v1579_v63 = vadd.f32 %v1541_v8, %v6795_v47  ;;  %v6801_v8 = vld [vmem:[#allocation50_spill] sm:$0xff] }
 0x91e   : > { %v1582_v51 = vadd.f32 %v1547_v46, %v6801_v8  ;;  %v6807_v46 = vld [vmem:[#allocation57_spill] sm:$0xff] }
 0x91f   : > { %2958 = vperm.xlu2 %3940, %v2913_v43   ;;  %v1527_v43 = vmul.f32 0.6931472, %v4071_v58  ;;  %v6140_v22 = vsub.f32 %v1579_v63, %v6796_v10  ;;  %v2860_v58 = vpop.permute.xlu0 %2859  ;;  %v6804_v10 = vld [vmem:[#allocation51_spill] sm:$0xff]  ;;  %4076 = vlog2.f32 %v6807_v46 }
 0x920   : > { %v6154_v47 = vsub.f32 %v1582_v51, %v6802_v3  ;;  %v6808_v3 = vld [vmem:[#allocation67_spill] sm:$0xff] }
 0x921   : > { %v1572_v18 = vadd.f32 %v1527_v43, %v6798_v21  ;;  %v1553_v43 = vmul.f32 0.6931472, %v4075_v41  ;;  %4078 = vlog2.f32 %v6808_v3  ;;  %v6815_v3 = vld [vmem:[#allocation62_spill] sm:$0xff] }
 0x922   : > { %6803 = vst [vmem:[#allocation52_spill] sm:$0xff] %v6154_v47 }
 0x923   : > { %2865 = vperm.xlu1 %3934, %v5841_v29   ;;  %v1585_v50 = vadd.f32 %v1553_v43, %v6804_v10  ;;  %v6809_v43 = vld [vmem:[#allocation33_spill] sm:$0xff] }
 0x925   : > { %v4077_v41 = vpop.eup %4076 }
 0x927   : > { %v4079_v10 = vpop.eup %4078 }
 0x92b   : > { %3936 = vset.pattern.permute.xlu1 %v4640_v19 }
 0x92c   : > { %v2848_v45 = vpop.permute.xlu2 %2847 }
 0x92d   : > { %v2915_v20 = vmul.f32 %v2848_v45, %v6125_v53  ;;  %v6799_v45 = vld [vmem:[#allocation74_spill] sm:$0xff] }
 0x92f   : > { %2964 = vperm.xlu2 %3940, %v2915_v20   ;;  %v6147_v20 = vsub.f32 %v1572_v18, %v6799_v45 }
 0x931   : > { %v2909_v59 = vmul.f32 %v6092_v57, %v6147_v20  ;;  %v6805_v57 = vld [vmem:[#allocation89_spill] sm:$0xff] }
 0x933   : > { %2877 = vperm.xlu1 %3936, %v5841_v29  }
 0x93b   : > { %3939 = vset.pattern.permute.xlu1 %v6696_v5 }
 0x93c   : > { %v2854_v29 = vpop.permute.xlu2 %2853  ;;  %2940 = vperm.xlu1 %3939, %v2907_v38  }
 0x93d   : > { %v2916_v14 = vmul.f32 %v2854_v29, %v6140_v22  ;;  %v2890_v29 = vpop.permute.xlu0 %2889 }
 0x93f   : > { %2967 = vperm.xlu0 %3941, %v2916_v14   ;;  %v6159_v14 = vsub.f32 %v1585_v50, %v6805_v57  ;;  %v6810_v50 = vld [vmem:[#allocation59_spill] sm:$0xff] }
 0x940   : > { %4080 = vlog2.f32 %v6810_v50  ;;  %v6816_v50 = vld [vmem:[#allocation35_spill] sm:$0xff] }
 0x941   : > { %6806 = vst [vmem:[#allocation64_spill] sm:$0xff] %v6159_v14  ;;  %v2922_v21 = vmul.f32 %v2890_v29, %v6159_v14  ;;  %v6811_v29 = vld [vmem:[#allocation77_spill] sm:$0xff] }
 0x944   : > { %2946 = vperm.xlu1 %3939, %v2909_v59  }
 0x94c   : > { %v2872_v63 = vpop.permute.xlu2 %2871 }
 0x94d   : > { %v2919_v38 = vmul.f32 %v2872_v63, %v6154_v47  ;;  %v1533_v63 = vmul.f32 0.6931472, %v4077_v41 }
 0x94f   : > { %2976 = vperm.xlu0 %3941, %v2919_v38   ;;  %v1575_v38 = vadd.f32 %v1533_v63, %v6809_v43 }
 0x951   : > { %v6167_v57 = vsub.f32 %v1575_v38, %v6811_v29 }
 0x957   : > { %2985 = vperm.xlu0 %3941, %v2922_v21   ;;  %v6812_v21 = vld [vmem:[#allocation12_spill] sm:$0xff] }
 0x958   : > { %4082 = vlog2.f32 %v6812_v21 }
 0x959   : > { %4084 = vlog2.f32 %v6815_v3 }
 0x96d   : > { %v2783_v18 = vpop.xlane.xlu1 %2782 }
 0x96e   : > { %v2784_v45 = vrot.slane %v2783_v18, 4 }
 0x970   : > { %v2785_v49 = vadd.f32 %v2784_v45, %v2783_v18  ;;  %v1537_v45 = vmul.f32 0.6931472, %v4079_v10  ;;  %v6817_v10 = vld [vmem:[#allocation45_spill] sm:$0xff] }
 0x972   : > { %v2786_v59 = vrot.slane %v2785_v49, 2 }
 0x974   : > { %v2787_v25 = vadd.f32 %v2786_v59, %v2785_v49  ;;  %v4081_v59 = vpop.eup %4080 }
 0x975   : > { %v1545_v63 = vmul.f32 0.6931472, %v4081_v59 }
 0x976   : > { %v2788_v8 = vrot.slane %v2787_v25, 1 }
 0x977   : > { %v1581_v29 = vadd.f32 %v1545_v63, %v6816_v50  ;;  %v6822_v50 = vld [vmem:[#allocation85_spill] sm:$0xff] }
 0x978   : > { %v2789_v51 = vadd.f32 %v2788_v8, %v2787_v25  ;;  %v6813_v25 = vld [vmem:[#allocation42_spill] sm:$0xff]  ;;  %v4083_v8 = vpop.eup %4082 }
 0x979   : > { %v1577_v46 = vadd.f32 %v1537_v45, %v6813_v25  ;;  %v1543_v43 = vmul.f32 0.6931472, %v4083_v8  ;;  %v6819_v45 = vld [vmem:[#allocation84_spill] sm:$0xff]  ;;  %v6821_v8 = vld [vmem:[#allocation37_spill] sm:$0xff] }
 0x97a   : > { %3709 = vpush %v2789_v51  ;;  %v6814_v51 = vld [vmem:[#allocation81_spill] sm:$0xff] }
 0x97b   : > { %v6173_v41 = vsub.f32 %v1577_v46, %v6814_v51  ;;  %v1580_v21 = vadd.f32 %v1543_v43, %v6817_v10  ;;  %v6820_v46 = vld [vmem:[#allocation70_spill] sm:$0xff] }
 0x97c   : > { %4086 = vlog2.f32 %v6820_v46 }
 0x97d   : > { %v2914_v38 = vmul.f32 %v2842_v2, %v6173_v41  ;;  %v6183_v25 = vsub.f32 %v1580_v21, %v6819_v45 }
 0x97f   : > { %v2917_v59 = vmul.f32 %v2860_v58, %v6183_v25 }
 0x985   : > { %v2830_v18 = vpop.permute.xlu1 %2829 }
 0x986   : > { %v2912_v49 = vmul.f32 %v2830_v18, %v6167_v57  ;;  %v4085_v18 = vpop.eup %4084 }
 0x987   : > { %v1551_v3 = vmul.f32 0.6931472, %v4085_v18  ;;  %v4087_v43 = vpop.eup %4086  ;;  %v6825_v18 = vld [vmem:[#allocation87_spill] sm:$0xff] }
 0x988   : > { %2955 = vperm.xlu1 %3939, %v2912_v49   ;;  %v6818_v49 = vld [vmem:[#allocation83_spill] sm:$0xff]  ;;  %v1549_v10 = vmul.f32 0.6931472, %v4087_v43 }
 0x989   : > { %v6180_v14 = vsub.f32 %v1581_v29, %v6818_v49  ;;  %v1584_v63 = vadd.f32 %v1551_v3, %v6821_v8  ;;  %v6824_v49 = vld [vmem:[#allocation47_spill] sm:$0xff] }
 0x98a   : > { %v1583_v45 = vadd.f32 %v1549_v10, %v6824_v49 }
 0x98b   : > { %v6190_v29 = vsub.f32 %v1584_v63, %v6822_v50  ;;  %v2953_v50 = vpop.permute.xlu0 %2952 }
 0x98c   : > { %v6195_v46 = vsub.f32 %v1583_v45, %v6825_v18 }
 0x98d   : > { %6823 = vst [vmem:[#allocation41_spill] sm:$0xff] %v6190_v29 }
 0x98e   : > { %6826 = vst [vmem:[#allocation28_spill] sm:$0xff] %v6195_v46 }
 0x990   : > { %2961 = vperm.xlu1 %3939, %v2914_v38   ;;  %v2884_v38 = vpop.permute.xlu2 %2883 }
 0x991   : > { %v2921_v21 = vmul.f32 %v2884_v38, %v6190_v29 }
 0x995   : > { %v2866_v51 = vpop.permute.xlu1 %2865 }
 0x996   : > { %v2918_v2 = vmul.f32 %v2866_v51, %v6180_v14 }
 0x998   : > { %2973 = vperm.xlu2 %3940, %v2918_v2   ;;  %2970 = vperm.xlu1 %3939, %v2917_v59   ;;  %v2944_v3 = vpop.permute.xlu2 %2943 }
 0x999   : > { %v2988_v49 = vperm.slane %v2944_v3, %v6729_v52 }
 0x9a0   : > { %2982 = vperm.xlu2 %3940, %v2921_v21   ;;  %v2950_v8 = vpop.permute.xlu2 %2949  ;;  %v6827_v21 = vld [vmem:[#allocation9_spill] sm:$0xff] }
 0x9a1   : > { %v3240_v10 = vsel %vm6828_vm5, %v6827_v21, 0.0  ;;  %vm6838_vm5 = vcmask 720512  }
 0x9a5   : > { %v2878_v58 = vpop.permute.xlu1 %2877 }
 0x9a6   : > { %v2920_v51 = vmul.f32 %v2878_v58, %v6195_v46  ;;  %v2992_v58 = vperm.slane %v2950_v8, %v6730_v7 }
 0x9a8   : > { %2979 = vperm.xlu1 %3939, %v2920_v51   ;;  %v2959_v63 = vpop.permute.xlu2 %2958 }
 0x9ab   : > { %s6338_s28 = spop %3709 }
 0x9ae   : > { %v2941_v59 = vpop.permute.xlu1 %2940 }
 0x9af   : > { %v2987_v43 = vperm.slane %v2941_v59, %v4891_v15 }
 0x9b0   : > { %v2965_v29 = vpop.permute.xlu2 %2964 }
 0x9b1   : > { %v2989_v45 = vsel %vm6829_vm7, %v2988_v49, %v2987_v43  ;;  %v2998_v43 = vperm.slane %v2959_v63, %v6732_v37  ;;  %vm6839_vm7 = vcmask 786112  }
 0x9b6   : > { %v2947_v2 = vpop.permute.xlu1 %2946 }
 0x9b7   : > { %v2990_v38 = vperm.slane %v2947_v2, %v6728_v24  ;;  %v2994_v2 = vperm.slane %v2953_v50, %v6731_v31  ;;  %v2968_v24 = vpop.permute.xlu0 %2967 }
 0x9b9   : > { %v2991_v18 = vsel %vm6830_vm3, %v2990_v38, %v2989_v45  ;;  %vm6840_vm3 = vcmask 851712  }
 0x9ba   : > { %v2993_v46 = vsel %vm6831_vm8, %v2992_v58, %v2991_v18  ;;  %v3002_v18 = vperm.slane %v2965_v29, %v6736_v60  ;;  %vm6841_vm8 = vcmask 917312  }
 0x9bb   : > { %v2995_v21 = vsel %vm6832_vm11, %v2994_v2, %v2993_v46  ;;  %v3004_v46 = vperm.slane %v2968_v24, %v6735_v35  ;;  %vm6842_vm11 = vcmask 982912  }
 0x9c9   : > { %3241 = vadd.xlane.f32.xlu2 %v3240_v10 }
 0x9f2   : > { %v2974_v8 = vpop.permute.xlu2 %2973 }
 0x9f3   : > { %v3008_v63 = vperm.slane %v2974_v8, %v6765_v1 }
 0x9fa   : > { %v2956_v47 = vpop.permute.xlu1 %2955  ;;  %v2983_v2 = vpop.permute.xlu2 %2982 }
 0x9fb   : > { %v2996_v59 = vperm.slane %v2956_v47, %v6733_v55  ;;  %v2977_v47 = vpop.permute.xlu0 %2976 }
 0x9fd   : > { %v2997_v3 = vsel %vm6833_vm9, %v2996_v59, %v2995_v21  ;;  %vm6843_vm9 = vcmask 1048512  }
 0x9fe   : > { %v2999_v38 = vsel %vm6834_vm10, %v2998_v43, %v2997_v3  ;;  %v3010_v3 = vperm.slane %v2977_v47, %v6742_v26 }
 0xa02   : > { %v2962_v51 = vpop.permute.xlu1 %2961 }
 0xa03   : > { %v3000_v10 = vperm.slane %v2962_v51, %v6734_v62 }
 0xa05   : > { %v3001_v49 = vsel %vm6835_vm1, %v3000_v10, %v2999_v38  ;;  %v2986_v10 = vpop.permute.xlu0 %2985  ;;  %v3014_v38 = vperm.slane %v2983_v2, %v6769_v61 }
 0xa06   : > { %v3003_v50 = vsel %vm6836_vm6, %v3002_v18, %v3001_v49  ;;  %v3016_v24 = vperm.slane %v2986_v10, %v6770_v6 }
 0xa07   : > { %v3005_v59 = vsel %vm6837_vm0, %v3004_v46, %v3003_v50  ;;  %vm6844_vm0 = vcmp.lt.s32.totalorder %v6749_v0, %v4891_v15 }
 0xa0a   : > { %v2971_v45 = vpop.permute.xlu1 %2970 }
 0xa0b   : > { %v3006_v58 = vperm.slane %v2971_v45, %v6737_v44 }
 0xa0d   : > { %v3007_v51 = vsel %vm6838_vm5, %v3006_v58, %v3005_v59 }
 0xa0e   : > { %v3009_v21 = vsel %vm6839_vm7, %v3008_v63, %v3007_v51 }
 0xa0f   : > { %v3011_v49 = vsel %vm6840_vm3, %v3010_v3, %v3009_v21 }
 0xa1a   : > { %v2980_v29 = vpop.permute.xlu1 %2979 }
 0xa1b   : > { %v3012_v43 = vperm.slane %v2980_v29, %v6768_v28 }
 0xa1d   : > { %v3013_v45 = vsel %vm6841_vm8, %v3012_v43, %v3011_v49  ;;  %vm6845_vm8 = vcmp.lt.s32.totalorder %v6751_v4, %v4891_v15 }
 0xa1e   : > { %v3015_v18 = vsel %vm6842_vm11, %v3014_v38, %v3013_v45 }
 0xa1f   : > { %v6231_v8 = vsel %vm6843_vm9, %v3016_v24, %v3015_v18 }
 0xa20   : > { %3019 = vxpose.xlu1.b32.start.end [1/1] (short) %v6231_v8, 128 }
 0xac4   : > { %v3035_v47 = vpop.trf.xlu1 }
 0xac5   : > { %3053 = vperm.xlu2 %3940, %v3035_v47   ;;  %v3242_v47 = vpop.xlane.xlu2 %3241 }
 0xacc   : > { %v3036_v50 = vpop.trf.xlu1 }
 0xacd   : > { %3058 = vperm.xlu0 %3941, %v3036_v50   ;;  %v3243_v50 = vrot.slane %v3242_v47, 4 }
 0xad4   : > { %v3037_v58 = vpop.trf.xlu1 }
 0xad5   : > { %3063 = vperm.xlu0 %3941, %v3037_v58   ;;  %v3244_v58 = vadd.f32 %v3243_v50, %v3242_v47 }
 0xadc   : > { %v3038_v46 = vpop.trf.xlu1 }
 0xadd   : > { %3068 = vperm.xlu0 %3941, %v3038_v46  }
 0xae4   : > { %v3039_v59 = vpop.trf.xlu1 }
 0xae5   : > { %3073 = vperm.xlu0 %3941, %v3039_v59   ;;  %v3245_v59 = vrot.slane %v3244_v58, 2 }
 0xaec   : > { %v3040_v51 = vpop.trf.xlu1 }
 0xaed   : > { %3078 = vperm.xlu0 %3941, %v3040_v51   ;;  %v3246_v51 = vadd.f32 %v3245_v59, %v3244_v58 }
 0xaf4   : > { %v3041_v63 = vpop.trf.xlu1 }
 0xaf5   : > { %3083 = vperm.xlu0 %3941, %v3041_v63   ;;  %v3247_v63 = vrot.slane %v3246_v51, 1 }
 0xafc   : > { %v3042_v2 = vpop.trf.xlu1 }
 0xafd   : > { %3088 = vperm.xlu0 %3941, %v3042_v2  }
 0xb04   : > { %v3043_v21 = vpop.trf.xlu1 }
 0xb05   : > { %3093 = vperm.xlu2 %3940, %v3043_v21   ;;  %v3248_v21 = vadd.f32 %v3247_v63, %v3246_v51 }
 0xb07   : > { %3711 = vpush %v3248_v21 }
 0xb0c   : > { %v3044_v3 = vpop.trf.xlu1 }
 0xb0d   : > { %3098 = vperm.xlu1 %3939, %v3044_v3  }
 0xb14   : > { %v3045_v10 = vpop.trf.xlu1 }
 0xb15   : > { %3103 = vperm.xlu0 %3941, %v3045_v10  }
 0xb1c   : > { %v3046_v29 = vpop.trf.xlu1 }
 0xb1d   : > { %3108 = vperm.xlu0 %3941, %v3046_v29  }
 0xb1f   : > { %v3054_v29 = vpop.permute.xlu2 %3053 }
 0xb20   : > { %vm3154_vm10 = vcmp.eq.f32.partialorder %v3054_v29, %v6231_v8  ;;  %vm3138_vm6 = vcmp.lt.f32.partialorder %v3054_v29, %v6231_v8 }
 0xb21   : > { %vm3170_vm5 = vmand %vm3154_vm10, %vm6844_vm0 }
 0xb22   : > { %vm6247_vm9 = vmor %vm3138_vm6, %vm3170_vm5 }
 0xb24   : > { %v3047_v43 = vpop.trf.xlu1 }
 0xb25   : > { %3113 = vperm.xlu0 %3941, %v3047_v43  }
 0xb2c   : > { %v3048_v38 = vpop.trf.xlu1 }
 0xb2d   : > { %3118 = vperm.xlu2 %3940, %v3048_v38  }
 0xb34   : > { %v3049_v49 = vpop.trf.xlu1 }
 0xb35   : > { %3123 = vperm.xlu0 %3941, %v3049_v49  }
 0xb38   : > { %s3712_s29 = spop %3711 }
 0xb39   : > { %s3250_s30 = smul.f32 3.0, %s3712_s29 }
 0xb3c   : > { %v3050_v24 = vpop.trf.xlu1 }
 0xb3d   : > { %3128 = vperm.xlu2 %3940, %v3050_v24   ;;  %3942 = vset.pattern.permute.xlu0 %v6749_v0  ;;  %v3202_v24 = vsel %vm6247_vm9, 1.0, %v6694_v56 }
 0xb3f   : > { %v3059_v45 = vpop.permute.xlu0 %3058 }
 0xb40   : > { %vm3155_vm1 = vcmp.eq.f32.partialorder %v3059_v45, %v6231_v8  ;;  %vm3139_vm3 = vcmp.lt.f32.partialorder %v3059_v45, %v6231_v8 }
 0xb41   : > { %vm3171_vm11 = vmand %vm3155_vm1, %vm6845_vm8  ;;  %vm6848_vm1 = vcmp.lt.s32.totalorder %v4613_v11, %v4891_v15 }
 0xb42   : > { %vm3187_vm0 = vmor %vm3139_vm3, %vm3171_vm11 }
 0xb45   : > { %3943 = vset.pattern.permute.xlu2 %v6751_v4  ;;  %v3203_v4 = vsel %vm3187_vm0, 1.0, %v6694_v56 }
 0xb47   : > { %v3064_v18 = vpop.permute.xlu0 %3063 }
 0xb48   : > { %vm3156_vm7 = vcmp.eq.f32.partialorder %v3064_v18, %v6231_v8  ;;  %vm3140_vm14 = vcmp.lt.f32.partialorder %v3064_v18, %v6231_v8  ;;  %v3218_v18 = vadd.f32 %v3203_v4, %v3202_v24 }
 0xb49   : > { %vm3172_vm10 = vmand %vm3156_vm7, %vm2454_vm4  ;;  %vm6849_vm4 = vcmp.lt.s32.totalorder %v4632_v17, %v4891_v15 }
 0xb4a   : > { %vm3188_vm5 = vmor %vm3140_vm14, %vm3172_vm10  ;;  %vm6850_vm14 = vcmp.lt.s32.totalorder %v4623_v13, %v4891_v15 }
 0xb4b   : > { %v3204_v45 = vsel %vm3188_vm5, 1.0, %v6694_v56 }
 0xb4f   : > { %v3069_v46 = vpop.permute.xlu0 %3068 }
 0xb50   : > { %vm3157_vm2 = vcmp.eq.f32.partialorder %v3069_v46, %v6231_v8  ;;  %vm3141_vm13 = vcmp.lt.f32.partialorder %v3069_v46, %v6231_v8  ;;  %v3219_v46 = vadd.f32 %v3218_v18, %v3204_v45 }
 0xb51   : > { %vm3173_vm6 = vmand %vm3157_vm2, %vm6848_vm1 }
 0xb52   : > { %vm3189_vm3 = vmor %vm3141_vm13, %vm3173_vm6 }
 0xb53   : > { %v3205_v47 = vsel %vm3189_vm3, 1.0, %v6694_v56 }
 0xb54   : > { %v3220_v63 = vadd.f32 %v3219_v46, %v3205_v47 }
 0xb57   : > { %v3074_v2 = vpop.permute.xlu0 %3073 }
 0xb58   : > { %vm3158_vm15 = vcmp.eq.f32.partialorder %v3074_v2, %v6231_v8  ;;  %vm3142_vm12 = vcmp.lt.f32.partialorder %v3074_v2, %v6231_v8 }
 0xb59   : > { %vm3174_vm7 = vmand %vm3158_vm15, %vm6849_vm4  ;;  %vm6851_vm15 = vcmp.lt.s32.totalorder %v4659_v27, %v4891_v15 }
 0xb5a   : > { %vm3190_vm0 = vmor %vm3142_vm12, %vm3174_vm7  ;;  %vm6852_vm12 = vcmp.lt.s32.totalorder %v4650_v23, %v4891_v15 }
 0xb5b   : > { %v3206_v59 = vsel %vm3190_vm0, 1.0, %v6694_v56 }
 0xb5c   : > { %v3221_v21 = vadd.f32 %v3220_v63, %v3206_v59 }
 0xb5f   : > { %v3079_v3 = vpop.permute.xlu0 %3078  ;;  %v3094_v50 = vpop.permute.xlu2 %3093 }
 0xb60   : > { %vm3159_vm8 = vcmp.eq.f32.partialorder %v3079_v3, %v6231_v8  ;;  %vm3143_vm2 = vcmp.lt.f32.partialorder %v3079_v3, %v6231_v8  ;;  %vm3162_vm4 = vcmp.eq.f32.partialorder %v3094_v50, %v6231_v8 }
 0xb61   : > { %vm3175_vm10 = vmand %vm3159_vm8, %vm6850_vm14  ;;  %vm6853_vm14 = vcmp.lt.s32.totalorder %v4619_v12, %v4891_v15 }
 0xb62   : > { %vm3191_vm6 = vmor %vm3143_vm2, %vm3175_vm10  ;;  %vm3146_vm2 = vcmp.lt.f32.partialorder %v3094_v50, %v6231_v8 }
 0xb63   : > { %v3207_v2 = vsel %vm3191_vm6, 1.0, %v6694_v56  ;;  %vm3178_vm10 = vmand %vm3162_vm4, %vm6853_vm14 }
 0xb67   : > { %v3084_v10 = vpop.permute.xlu0 %3083 }
 0xb68   : > { %vm3160_vm11 = vcmp.eq.f32.partialorder %v3084_v10, %v6231_v8  ;;  %vm3144_vm13 = vcmp.lt.f32.partialorder %v3084_v10, %v6231_v8  ;;  %v3222_v10 = vadd.f32 %v3221_v21, %v3207_v2 }
 0xb69   : > { %vm3176_vm9 = vmand %vm3160_vm11, %vm6851_vm15 }
 0xb6a   : > { %vm3192_vm7 = vmor %vm3144_vm13, %vm3176_vm9  ;;  %vm6854_vm13 = vcmp.lt.s32.totalorder %v4680_v34, %v4891_v15 }
 0xb6b   : > { %v3208_v3 = vsel %vm3192_vm7, 1.0, %v6694_v56  ;;  %vm3194_vm9 = vmor %vm3146_vm2, %vm3178_vm10 }
 0xb6c   : > { %v3223_v4 = vadd.f32 %v3222_v10, %v3208_v3  ;;  %v3210_v45 = vsel %vm3194_vm9, 1.0, %v6694_v56 }
 0xb6f   : > { %v3089_v43 = vpop.permute.xlu0 %3088 }
 0xb70   : > { %vm3161_vm1 = vcmp.eq.f32.partialorder %v3089_v43, %v6231_v8  ;;  %vm3145_vm5 = vcmp.lt.f32.partialorder %v3089_v43, %v6231_v8 }
 0xb71   : > { %vm3177_vm8 = vmand %vm3161_vm1, %vm6852_vm12  ;;  %vm6855_vm12 = vcmp.lt.s32.totalorder %v4673_v32, %v4891_v15 }
 0xb72   : > { %vm3193_vm3 = vmor %vm3145_vm5, %vm3177_vm8 }
 0xb73   : > { %v3209_v29 = vsel %vm3193_vm3, 1.0, %v6694_v56 }
 0xb74   : > { %v3224_v24 = vadd.f32 %v3223_v4, %v3209_v29 }
 0xb7f   : > { %v3099_v51 = vpop.permute.xlu1 %3098 }
 0xb80   : > { %vm3163_vm11 = vcmp.eq.f32.partialorder %v3099_v51, %v6231_v8  ;;  %vm3147_vm1 = vcmp.lt.f32.partialorder %v3099_v51, %v6231_v8 }
 0xb81   : > { %vm3179_vm15 = vmand %vm3163_vm11, %vm6854_vm13  ;;  %vm6856_vm11 = vcmp.lt.s32.totalorder %v4702_v40, %v4891_v15 }
 0xb82   : > { %vm3195_vm4 = vmor %vm3147_vm1, %vm3179_vm15 }
 0xb83   : > { %v3211_v18 = vsel %vm3195_vm4, 1.0, %v6694_v56 }
 0xb87   : > { %v3104_v49 = vpop.permute.xlu0 %3103  ;;  %v3119_v43 = vpop.permute.xlu2 %3118 }
 0xb88   : > { %vm3164_vm0 = vcmp.eq.f32.partialorder %v3104_v49, %v6231_v8  ;;  %vm3148_vm5 = vcmp.lt.f32.partialorder %v3104_v49, %v6231_v8  ;;  %v3225_v49 = vadd.f32 %v3224_v24, %v3210_v45  ;;  %vm3167_vm15 = vcmp.eq.f32.partialorder %v3119_v43, %v6231_v8 }
 0xb89   : > { %vm3180_vm8 = vmand %vm3164_vm0, %vm6855_vm12  ;;  %vm6857_vm0 = vcmp.lt.s32.totalorder %v4693_v39, %v4891_v15  ;;  %vm6858_vm12 = vcmp.lt.s32.totalorder %v4640_v19, %v4891_v15 }
 0xb8a   : > { %vm3196_vm2 = vmor %vm3148_vm5, %vm3180_vm8  ;;  %vm3151_vm5 = vcmp.lt.f32.partialorder %v3119_v43, %v6231_v8 }
 0xb8b   : > { %v3212_v47 = vsel %vm3196_vm2, 1.0, %v6694_v56  ;;  %vm3183_vm8 = vmand %vm3167_vm15, %vm6858_vm12  ;;  %vm6869_vm12 = vcmask 195712  }
 0xb8f   : > { %v3109_v58 = vpop.permute.xlu0 %3108 }
 0xb90   : > { %vm3165_vm6 = vcmp.eq.f32.partialorder %v3109_v58, %v6231_v8  ;;  %vm3149_vm3 = vcmp.lt.f32.partialorder %v3109_v58, %v6231_v8  ;;  %v3226_v58 = vadd.f32 %v3225_v49, %v3211_v18 }
 0xb91   : > { %vm3181_vm14 = vmand %vm3165_vm6, %vm6856_vm11 }
 0xb92   : > { %vm3197_vm1 = vmor %vm3149_vm3, %vm3181_vm14  ;;  %v3227_v59 = vadd.f32 %v3226_v58, %v3212_v47  ;;  %v6861_v58 = vld [vmem:[#allocation6_spill] sm:$0xff] }
 0xb93   : > { %v3213_v46 = vsel %vm3197_vm1, 1.0, %v6694_v56  ;;  %vm3199_vm11 = vmor %vm3151_vm5, %vm3183_vm8  ;;  %vm6867_vm5 = vcmask 130112   ;;  %vm6870_vm8 = vcmask 261312  }
 0xb94   : > { %v3228_v63 = vadd.f32 %v3227_v59, %v3213_v46  ;;  %v3215_v3 = vsel %vm3199_vm11, 1.0, %v6694_v56  ;;  %vm6874_vm11 = vcmask 523712  }
 0xb97   : > { %v3114_v38 = vpop.permute.xlu0 %3113  ;;  %v3129_v50 = vpop.permute.xlu2 %3128 }
 0xb98   : > { %vm3166_vm7 = vcmp.eq.f32.partialorder %v3114_v38, %v6231_v8  ;;  %vm3150_vm10 = vcmp.lt.f32.partialorder %v3114_v38, %v6231_v8  ;;  %vm3169_vm9 = vcmp.eq.f32.partialorder %v3129_v50, %v6231_v8  ;;  %vm3153_vm4 = vcmp.lt.f32.partialorder %v3129_v50, %v6231_v8 }
 0xb99   : > { %vm3182_vm13 = vmand %vm3166_vm7, %vm6857_vm0  ;;  %vm6859_vm7 = vcmp.lt.s32.totalorder %v6688_v42, %v4891_v15  ;;  %vm6860_vm0 = vcmp.lt.s32.totalorder %v4723_v48, %v4891_v15  ;;  %v3251_v50 = vstv %s3250_s30  ;;  %s4132_s30 = scalar_lea.hbm %s6449_s4, 16 }
 0xb9a   : > { %vm3198_vm6 = vmor %vm3150_vm10, %vm3182_vm13 }
 0xb9b   : > { %v3214_v51 = vsel %vm3198_vm6, 1.0, %v6694_v56  ;;  %vm3185_vm3 = vmand %vm3169_vm9, %vm6859_vm7  ;;  %vm6862_vm6 = vcmp.gt.s32.totalorder %v6861_v58, 0  ;;  %vm6872_vm7 = vcmask 392512  }
 0xb9c   : > { %v3229_v2 = vadd.f32 %v3228_v63, %v3214_v51  ;;  %vm3201_vm14 = vmor %vm3153_vm4, %vm3185_vm3  ;;  %vm6871_vm4 = vcmask 326912   ;;  %vm6873_vm3 = vcmask 458112  }
 0xb9d   : > { %v3217_v38 = vsel %vm3201_vm14, 1.0, %v6694_v56  ;;  %vm6875_vm14 = vcmask 589312  }
 0xb9e   : > { %v3230_v10 = vadd.f32 %v3229_v2, %v3215_v3  ;;  %v6864_v3 = vld [vmem:[#allocation28_spill] sm:$0xff] }
 0xba7   : > { %v3124_v21 = vpop.permute.xlu0 %3123 }
 0xba8   : > { %vm3152_vm2 = vcmp.lt.f32.partialorder %v3124_v21, %v6231_v8  ;;  %vm3168_vm10 = vcmp.eq.f32.partialorder %v3124_v21, %v6231_v8 }
 0xba9   : > { %vm3184_vm13 = vmand %vm3168_vm10, %vm6860_vm0  ;;  %vm6877_vm10 = vcmask 720512   ;;  %vm6878_vm0 = vcmask 786112  }
 0xbaa   : > { %vm3200_vm1 = vmor %vm3152_vm2, %vm3184_vm13  ;;  %vm6876_vm2 = vcmask 654912   ;;  %vm6879_vm13 = vcmask 851712  }
 0xbab   : > { %v3216_v29 = vsel %vm3200_vm1, 1.0, %v6694_v56  ;;  %vm6880_vm1 = vcmask 917312  }
 0xbac   : > { %v3231_v43 = vadd.f32 %v3230_v10, %v3216_v29  ;;  %v6865_v29 = vld [vmem:[#allocation64_spill] sm:$0xff] }
 0xbae   : > { %v3232_v4 = vadd.f32 %v3231_v43, %v3217_v38  ;;  %v6866_v38 = vld [vmem:[#allocation41_spill] sm:$0xff] }
 0xbb0   : > { %v3233_v24 = vrot.slane %v3232_v4, 4 }
 0xbb2   : > { %v3234_v45 = vadd.f32 %v3233_v24, %v3232_v4 }
 0xbb4   : > { %v3235_v18 = vrot.slane %v3234_v45, 2 }
 0xbb6   : > { %v3236_v8 = vadd.f32 %v3235_v18, %v3234_v45 }
 0xbb8   : > { %v3237_v49 = vrot.slane %v3236_v8, 1 }
 0xbba   : > { %v3238_v47 = vadd.f32 %v3237_v49, %v3236_v8 }
 0xbbc   : > { %vm3252_vm15 = vcmp.lt.f32.partialorder %v3238_v47, %v3251_v50 }
 0xbbd   : > { %vm3253_vm9 = vmor %vm6862_vm6, %vm3252_vm15  ;;  %vm6881_vm15 = vcmask 982912   ;;  %vm6882_vm6 = vcmask 1048512  }
 0xbbe   : > { %v3695_v46 = vsel %vm3253_vm9, 1.0, %v6694_v56  ;;  %vm6883_vm9 = vcmask 1040384  }
 0xbbf   : > { %v3257_v59 = vperm.slane %v3695_v46, 0 }
 0xbc1   : > { %3268 = vperm.xlu2 %3943, %v3257_v59   ;;  %3262 = vperm.xlu0 %3942, %v3257_v59  }
 0xbc9   : > { %3944 = vset.pattern.permute.xlu2 %v6752_v54  ;;  %3945 = vset.pattern.permute.xlu0 %v4613_v11 }
 0xbd1   : > { %3274 = vperm.xlu2 %3944, %v3257_v59   ;;  %3280 = vperm.xlu0 %3945, %v3257_v59  }
 0xbd9   : > { %3946 = vset.pattern.permute.xlu2 %v4632_v17  ;;  %3948 = vset.pattern.permute.xlu0 %v4659_v27 }
 0xbe1   : > { %3286 = vperm.xlu2 %3946, %v3257_v59   ;;  %3298 = vperm.xlu0 %3948, %v3257_v59  }
 0xbe9   : > { %3947 = vset.pattern.permute.xlu2 %v4623_v13  ;;  %3951 = vset.pattern.permute.xlu0 %v4680_v34 }
 0xbf1   : > { %3292 = vperm.xlu2 %3947, %v3257_v59   ;;  %3316 = vperm.xlu0 %3951, %v3257_v59  }
 0xbf9   : > { %3949 = vset.pattern.permute.xlu2 %v4650_v23  ;;  %3954 = vset.pattern.permute.xlu0 %v4693_v39 }
 0xc01   : > { %3304 = vperm.xlu2 %3949, %v3257_v59   ;;  %3334 = vperm.xlu0 %3954, %v3257_v59  }
 0xc09   : > { %3950 = vset.pattern.permute.xlu2 %v4619_v12  ;;  %3957 = vset.pattern.permute.xlu0 %v6688_v42 }
 0xc11   : > { %3310 = vperm.xlu2 %3950, %v3257_v59   ;;  %3352 = vperm.xlu0 %3957, %v3257_v59  }
 0xc19   : > { %3952 = vset.pattern.permute.xlu2 %v4673_v32  ;;  %3959 = vset.pattern.permute.xlu0 %v6696_v5 }
 0xc1b   : > { %v3269_v11 = vpop.permute.xlu2 %3268 }
 0xc1c   : > { %v3371_v56 = vmul.f32 %v3269_v11, %v6098_v33 }
 0xc21   : > { %3322 = vperm.xlu2 %3952, %v3257_v59  }
 0xc29   : > { %3953 = vset.pattern.permute.xlu2 %v4702_v40 }
 0xc2b   : > { %v3275_v13 = vpop.permute.xlu2 %3274 }
 0xc2c   : > { %v3372_v17 = vmul.f32 %v3275_v13, %v6147_v20 }
 0xc2e   : > { %3409 = vperm.xlu0 %3959, %v3372_v17   ;;  %v6868_v17 = vld [vmem:[#allocation14_spill] sm:$0xff] }
 0xc31   : > { %3328 = vperm.xlu2 %3953, %v3257_v59  }
 0xc33   : > { %v3263_v23 = vpop.permute.xlu0 %3262 }
 0xc34   : > { %v3370_v39 = vmul.f32 %v3263_v23, %v6134_v36 }
 0xc39   : > { %3955 = vset.pattern.permute.xlu2 %v4640_v19 }
 0xc3b   : > { %v3287_v12 = vpop.permute.xlu2 %3286 }
 0xc3c   : > { %v3374_v36 = vmul.f32 %v3287_v12, %v6104_v16 }
 0xc41   : > { %3340 = vperm.xlu2 %3955, %v3257_v59  }
 0xc43   : > { %v3281_v34 = vpop.permute.xlu0 %3280 }
 0xc44   : > { %v3373_v20 = vmul.f32 %v3281_v34, %v6110_v30  ;;  %v6863_v30 = vld [vmem:[#allocation52_spill] sm:$0xff] }
 0xc49   : > { %3956 = vset.pattern.permute.xlu2 %v4723_v48 }
 0xc4b   : > { %v3293_v27 = vpop.permute.xlu2 %3292 }
 0xc4c   : > { %v3375_v32 = vmul.f32 %v3293_v27, %v6167_v57 }
 0xc4e   : > { %3418 = vperm.xlu0 %3959, %v3375_v32  }
 0xc51   : > { %3346 = vperm.xlu2 %3956, %v3257_v59  }
 0xc53   : > { %v3299_v40 = vpop.permute.xlu0 %3298 }
 0xc59   : > { %3958 = vset.pattern.permute.xlu2 %v6696_v5  ;;  %v3376_v5 = vmul.f32 %v3299_v40, %v6116_v9 }
 0xc5a   : > { %3403 = vperm.xlu2 %3958, %v3370_v39  }
 0xc5b   : > { %v3305_v42 = vpop.permute.xlu2 %3304 }
 0xc5c   : > { %v3377_v19 = vmul.f32 %v3305_v42, %v6173_v41 }
 0xc5e   : > { %3424 = vperm.xlu0 %3959, %v3377_v19  }
 0xc62   : > { %3406 = vperm.xlu2 %3958, %v3371_v56  }
 0xc63   : > { %v3317_v48 = vpop.permute.xlu0 %3316 }
 0xc64   : > { %v3379_v54 = vmul.f32 %v3317_v48, %v6140_v22 }
 0xc66   : > { %3430 = vperm.xlu0 %3959, %v3379_v54  }
 0xc6a   : > { %3412 = vperm.xlu2 %3958, %v3373_v20  }
 0xc6b   : > { %v3311_v57 = vpop.permute.xlu2 %3310 }
 0xc6c   : > { %v3378_v41 = vmul.f32 %v3311_v57, %v6125_v53 }
 0xc72   : > { %3415 = vperm.xlu2 %3958, %v3374_v36  }
 0xc73   : > { %v3335_v2 = vpop.permute.xlu0 %3334 }
 0xc74   : > { %v3382_v21 = vmul.f32 %v3335_v2, %v6863_v30 }
 0xc7a   : > { %3421 = vperm.xlu2 %3958, %v3376_v5  }
 0xc7b   : > { %v3323_v51 = vpop.permute.xlu2 %3322 }
 0xc7c   : > { %v3380_v33 = vmul.f32 %v3323_v51, %v6183_v25 }
 0xc82   : > { %3427 = vperm.xlu2 %3958, %v3378_v41  }
 0xc83   : > { %v3353_v10 = vpop.permute.xlu0 %3352 }
 0xc84   : > { %v3385_v53 = vmul.f32 %v3353_v10, %v6865_v29 }
 0xc8a   : > { %3433 = vperm.xlu2 %3958, %v3380_v33  }
 0xc8b   : > { %v3329_v63 = vpop.permute.xlu2 %3328 }
 0xc8c   : > { %v3381_v22 = vmul.f32 %v3329_v63, %v6180_v14 }
 0xc8e   : > { %3436 = vperm.xlu0 %3959, %v3381_v22  }
 0xc92   : > { %3439 = vperm.xlu2 %3958, %v3382_v21  }
 0xc9b   : > { %v3341_v16 = vpop.permute.xlu2 %3340 }
 0xc9c   : > { %v3383_v9 = vmul.f32 %v3341_v16, %v6864_v3 }
 0xc9e   : > { %3442 = vperm.xlu0 %3959, %v3383_v9  }
 0xca0   : > { %v3410_v18 = vpop.permute.xlu0 %3409 }
 0xca1   : > { %v3453_v12 = vperm.slane %v3410_v18, %v6868_v17 }
 0xca6   : > { %3448 = vperm.xlu0 %3959, %v3385_v53   ;;  %v3500_v53 = vstv %s5997_s20 }
 0xcab   : > { %v3347_v43 = vpop.permute.xlu2 %3346 }
 0xcac   : > { %v3384_v25 = vmul.f32 %v3347_v43, %v6866_v38 }
 0xcae   : > { %3445 = vperm.xlu2 %3958, %v3384_v25  }
 0xcb4   : > { %v3404_v4 = vpop.permute.xlu2 %3403 }
 0xcb5   : > { %v3450_v46 = vperm.slane %v3404_v4, %v4891_v15 }
 0xcbc   : > { %v3407_v24 = vpop.permute.xlu2 %3406 }
 0xcbd   : > { %v3451_v58 = vperm.slane %v3407_v24, %v6729_v52 }
 0xcbf   : > { %v3452_v11 = vsel %vm6867_vm5, %v3451_v58, %v3450_v46  ;;  %vm3495_vm5 = vcmp.eq.s32.totalorder %v6749_v0, 2 }
 0xcc0   : > { %v3419_v8 = vpop.permute.xlu0 %3418  ;;  %v3454_v32 = vsel %vm6869_vm12, %v3453_v12, %v3452_v11  ;;  %vm3494_vm12 = vcmp.eq.s32.totalorder %v6749_v0, 1 }
 0xcc1   : > { %v3459_v15 = vperm.slane %v3419_v8, %v6733_v55 }
 0xcc4   : > { %v3413_v14 = vpop.permute.xlu2 %3412 }
 0xcc5   : > { %v3455_v13 = vperm.slane %v3413_v14, %v6730_v7 }
 0xcc7   : > { %v3456_v34 = vsel %vm6870_vm8, %v3455_v13, %v3454_v32  ;;  %vm3493_vm8 = vcmp.eq.s32.totalorder %v6749_v0, 0 }
 0xccc   : > { %v3416_v45 = vpop.permute.xlu2 %3415 }
 0xccd   : > { %v3457_v23 = vperm.slane %v3416_v45, %v6731_v31 }
 0xccf   : > { %v3458_v39 = vsel %vm6871_vm4, %v3457_v23, %v3456_v34 }
 0xcd0   : > { %v3425_v47 = vpop.permute.xlu0 %3424  ;;  %v3460_v42 = vsel %vm6872_vm7, %v3459_v15, %v3458_v39 }
 0xcd1   : > { %v3463_v31 = vperm.slane %v3425_v47, %v6734_v62 }
 0xcd4   : > { %v3422_v49 = vpop.permute.xlu2 %3421 }
 0xcd5   : > { %v3461_v52 = vperm.slane %v3422_v49, %v6732_v37 }
 0xcd7   : > { %v3462_v7 = vsel %vm6873_vm3, %v3461_v52, %v3460_v42 }
 0xcd8   : > { %v3431_v59 = vpop.permute.xlu0 %3430  ;;  %v3464_v56 = vsel %vm6874_vm11, %v3463_v31, %v3462_v7 }
 0xcd9   : > { %v3467_v37 = vperm.slane %v3431_v59, %v6735_v35 }
 0xcdc   : > { %v3428_v50 = vpop.permute.xlu2 %3427 }
 0xcdd   : > { %v3465_v19 = vperm.slane %v3428_v50, %v6736_v60 }
 0xcdf   : > { %v3466_v54 = vsel %vm6875_vm14, %v3465_v19, %v3464_v56 }
 0xce0   : > { %v3468_v5 = vsel %vm6876_vm2, %v3467_v37, %v3466_v54 }
 0xce4   : > { %v3434_v27 = vpop.permute.xlu2 %3433 }
 0xce5   : > { %v3469_v20 = vperm.slane %v3434_v27, %v6737_v44 }
 0xce7   : > { %v3470_v57 = vsel %vm6877_vm10, %v3469_v20, %v3468_v5 }
 0xcec   : > { %v3440_v48 = vpop.permute.xlu2 %3439 }
 0xced   : > { %v3473_v41 = vperm.slane %v3440_v48, %v6742_v26 }
 0xd00   : > { %v3437_v40 = vpop.permute.xlu0 %3436 }
 0xd01   : > { %v3471_v55 = vperm.slane %v3437_v40, %v6765_v1 }
 0xd03   : > { %v3472_v60 = vsel %vm6878_vm0, %v3471_v55, %v3470_v57 }
 0xd04   : > { %v3474_v33 = vsel %vm6879_vm13, %v3473_v41, %v3472_v60 }
 0xd08   : > { %v3446_v51 = vpop.permute.xlu2 %3445 }
 0xd09   : > { %v3477_v35 = vperm.slane %v3446_v51, %v6769_v61 }
 0xd10   : > { %v3443_v36 = vpop.permute.xlu0 %3442 }
 0xd11   : > { %v3475_v62 = vperm.slane %v3443_v36, %v6768_v28 }
 0xd13   : > { %v3476_v44 = vsel %vm6880_vm1, %v3475_v62, %v3474_v33 }
 0xd14   : > { %v3478_v22 = vsel %vm6881_vm15, %v3477_v35, %v3476_v44 }
 0xd18   : > { %v3449_v1 = vpop.permute.xlu0 %3448 }
 0xd19   : > { %v3479_v63 = vperm.slane %v3449_v1, %v6770_v6  ;;  %v3496_v6 = vstv %s5999_s22  ;;  %s4126_s22 = sshra.s32 %s3519_s23, 4  ;;  %s4127_s22 = int_to_ptr.hbm [resolvable:$true] %s4126_s22 }
 0xd1a   : > { %v3497_v10 = vsel %vm3495_vm5, %v3496_v6, 0.0  ;;  %s4128_s27 = scalar_lea.hbm %s4127_s22, 8  ;;  %p4133_p0 = scmp.lt.s32.totalorder %s4127_s22, %s6449_s4 }
 0xd1b   : > { %v3480_v2 = vsel %vm6882_vm6, %v3479_v63, %v3478_v22  ;;  %p4129_p11 = scmp.ne.s32.totalorder %s4127_s22, %s4128_s27  ;;  %p4134_p1 = scmp.lt.s32.totalorder %s4132_s30, %s4128_s27 }
 0xd1c   : > { %v3482_v28 = vsel %vm6883_vm9, %v3480_v2, 0.0 }
 0xd1d   : > { %3483 = vadd.xlane.f32.xlu2 %v3482_v28  ;;  %p4130_p12 = pnand %p4129_p11, %p4241_p5  ;;  %p4135_p2 = por %p4134_p1, %p4133_p0 }
 0xd1f   : > { %p4131_p13 = pneg %p4130_p12 }
 0xd21   : > { %p4136_p3 = pnand %p4135_p2, %p4131_p13 }
 0xd90   : > { %v3484_v26 = vpop.xlane.xlu2 %3483 }
 0xd91   : > { %v3485_v30 = vrot.slane %v3484_v26, 4 }
 0xd93   : > { %v3486_v21 = vadd.f32 %v3485_v30, %v3484_v26 }
 0xd95   : > { %v3487_v16 = vrot.slane %v3486_v21, 2 }
 0xd97   : > { %v3488_v3 = vadd.f32 %v3487_v16, %v3486_v21 }
 0xd99   : > { %v3489_v9 = vrot.slane %v3488_v3, 1 }
 0xd9b   : > { %v3490_v61 = vadd.f32 %v3489_v9, %v3488_v3 }
 0xd9d   : > { %3713 = vpush %v3490_v61 }
 0xdce   : > { %s3714_s11 = spop %3713 }
 0xdcf   : > { %s3492_s14 = sadd.f32 %s3714_s11, %s6338_s28 }
 0xdd1   : > { %v3498_v29 = vstv %s3492_s14 }
 0xdd2   : > { %v3499_v43 = vsel %vm3494_vm12, %v3498_v29, %v3497_v10 }
 0xdd3   : > { %v3501_v38 = vsel %vm3493_vm8, %v3500_v53, %v3499_v43 }
 0xdd4   : > { %3502 = vst [vmem:[%s243_s12] sm:$0xff] %v3501_v38 }
 0xdd5   : > { %4139 = shalt.err (!%p4136_p3)
}
 0xdd6   : > { %3715 = dma.vmem_to_hbm [thread:$0]  (%p4241_p5), %s3517_s13, 128, %s3519_s23, %s3504_s19  }
 0xdd7 PF: > { %p3721_p4 = scmp.ge.s32.totalorder %s4174_s18, 2  ;;  %s3530_s20 = sand.u32 1, %s4162_s15  }
 0xdd8   : > { %s3531_s5 = scalar_lea.sflag [#allocation3], %s3530_s20 }
 0xdd9   : > { %p3718_p7 = pnand %p3721_p4, %p4245_p6 }
 0xddb   : > { %p3719_p8 = pneg %p3718_p7 }
 0xddd   : > { %4157 = dma.done.wait (%p3719_p8), %s3531_s5, 128  }
 0xdde   : > { %4159 = vsyncadd (%p3719_p8), %s3531_s5, 4294967168  ;;  %p14_p9 = scmp.ge.s32.totalorder %s4228_s21, 4   ;;  %s6884_s15 = smov %s4166_s16 }
 0xddf   : > { %s6885_s16 = smov %s4170_s17  ;;  %s6886_s17 = smov %s4239_s24 }
 0xde0   : > { %s6887_s18 = smov %s4228_s21  ;;  %16 = sbr.rel (!%p14_p9) target bundleno = 3 (0x3), region = 81 }
 0xde5   :  { %3537 = vsyncpa [#allocation3], 1 }
 0xde6   :  { %3539 = vsyncpa [#allocation3 + $0x1], 1 }

</bundles_post_ra>
